<compile_context>
chip_gen: v6e
topology: v6e:2x2x1
jax: 0.10.0
libtpu: 0.0.40
codegen_flags: <defaults>
</compile_context>

<pallas_src>
import math

import numpy as np
import jax
import jax.numpy as jnp
from jax.experimental import pallas as pl
from jax.experimental.pallas import tpu as pltpu


# ---------------------------------------------------------------------------
# Packed-parameter offsets (1-D f32 array of length 305, lives in SMEM)
# ---------------------------------------------------------------------------
W1_OFF, B1_OFF = 0, 8          # (8,1) / (8,1)
W2_OFF, B2_OFF = 16, 144       # (16,8) row-major / (16,1)
W3_OFF, B3_OFF = 160, 288      # (8,16) row-major / (8,1)
W4_OFF, B4_OFF = 296, 304      # (1,8) / (1,1)
P_LEN = 305


# ---------------------------------------------------------------------------
# Kernel: one dense (rows, lanes) batch tile, parameters as SMEM scalars
# ---------------------------------------------------------------------------
def theta_kernel(p_ref, t_ref, o_ref):
    # p_ref: (305,) f32 in SMEM   -- all weights/biases as scalars
    # t_ref: (rows, lanes) f32    -- dense batch tile
    # o_ref: (rows, lanes) f32
    x = t_ref[...]

    # Layer 1 (1 -> 8): one scalar FMA per output feature (pure VPU).
    h1 = [jnp.maximum(p_ref[W1_OFF + j] * x + p_ref[B1_OFF + j], 0.0)
          for j in range(8)]

    # Layer 2 (8 -> 16): unrolled scalar*vector FMAs (VPU, no MXU).
    h2 = []
    for k in range(16):
        acc = h1[0] * p_ref[W2_OFF + k * 8]
        for j in range(1, 8):
            acc = acc + h1[j] * p_ref[W2_OFF + k * 8 + j]
        h2.append(jnp.maximum(acc + p_ref[B2_OFF + k], 0.0))

    # Layer 3 (16 -> 8): unrolled scalar*vector FMAs.
    h3 = []
    for m in range(8):
        acc = h2[0] * p_ref[W3_OFF + m * 16]
        for k in range(1, 16):
            acc = acc + h2[k] * p_ref[W3_OFF + m * 16 + k]
        h3.append(jnp.maximum(acc + p_ref[B3_OFF + m], 0.0))

    # Layer 4 (8 -> 1): scalar FMAs (no sublane reduction needed).
    y = h3[0] * p_ref[W4_OFF]
    for m in range(1, 8):
        y = y + h3[m] * p_ref[W4_OFF + m]
    y = y + p_ref[B4_OFF]

    # 2*pi*tanh on a fully dense tile (EUP).
    o_ref[...] = (2.0 * jnp.pi) * jnp.tanh(y)


# ---------------------------------------------------------------------------
# Parameter packing: one tiny 1-D SMEM array instead of 8 tiny VMEM tiles
# ---------------------------------------------------------------------------
def pack_params(params):
    w1, b1, w2, b2, w3, b3, w4, b4 = params
    p = jnp.concatenate([
        w1.reshape(-1), b1.reshape(-1),     # 8 + 8
        w2.reshape(-1), b2.reshape(-1),     # 128 + 16
        w3.reshape(-1), b3.reshape(-1),     # 128 + 8
        w4.reshape(-1), b4.reshape(-1),     # 8 + 1
    ]).astype(jnp.float32)
    assert p.shape == (P_LEN,)
    return p


# ---------------------------------------------------------------------------
# Tile sizing
# ---------------------------------------------------------------------------
def _choose_lanes(n, rows, max_lanes):
    """Largest lane count (multiple of 128, <= max_lanes) that still yields
    >= 2 grid steps when N allows it (keeps both v7x TensorCores busy).
    On single-TC chips (v5e/v6e) raise max_lanes to grow the block instead."""
    lanes = (n // (2 * rows)) // 128 * 128
    return max(128, min(max_lanes, lanes))


# ---------------------------------------------------------------------------
# Wrapper
# ---------------------------------------------------------------------------
def theta_forward(t, params, *, rows=8, max_lanes=1024):
    """t: (N, 1) float32. Returns (N, 1) float32.

    Each grid step processes a dense (rows, lanes) batch tile; rows % 8 == 0
    and lanes % 128 == 0.  When N is a multiple of rows*lanes, the wrapper
    does only free reshapes (no pad / slice HBM passes).
    """
    assert rows % 8 == 0
    N = t.shape[0]

    p = pack_params(params)

    lanes = _choose_lanes(N, rows, max_lanes)
    tile = rows * lanes
    n_pad = pl.cdiv(N, tile) * tile

    t_flat = t.reshape(-1).astype(jnp.float32)
    if n_pad != N:
        # Ragged tail only; prefer N % (rows*lanes) == 0 to avoid this copy.
        t_flat = jnp.pad(t_flat, (0, n_pad - N))
    t_2d = t_flat.reshape(n_pad // lanes, lanes)

    grid = (n_pad // tile,)

    out_2d = pl.pallas_call(
        theta_kernel,
        out_shape=jax.ShapeDtypeStruct(t_2d.shape, jnp.float32),
        grid_spec=pltpu.PrefetchScalarGridSpec(
            num_scalar_prefetch=0,
            grid=grid,
            in_specs=[
                # Whole packed-parameter vector, resident in SMEM.
                pl.BlockSpec(memory_space=pltpu.MemorySpace.SMEM),
                # Dense (rows, lanes) batch tile.
                pl.BlockSpec((rows, lanes), lambda i: (i, 0)),
            ],
            out_specs=pl.BlockSpec((rows, lanes), lambda i: (i, 0)),
        ),
        compiler_params=pltpu.CompilerParams(
            dimension_semantics=("parallel",),   # shard grid across v7x TCs
        ),
    )(p, t_2d)

    out = out_2d.reshape(n_pad)
    if n_pad != N:
        out = out[:N]
    return out.reshape(N, 1)


# ---------------------------------------------------------------------------
# Init + reference (float64 numpy, exact)
# ---------------------------------------------------------------------------
def init_params(key):
    """PyTorch nn.Linear-style init: U(-1/sqrt(fan_in), 1/sqrt(fan_in)).
    Weights stored torch-style (out_features, in_features); biases (out, 1)."""
    dims = [(1, 8), (8, 16), (16, 8), (8, 1)]
    params = []
    for fan_in, fan_out in dims:
        key, kw, kb = jax.random.split(key, 3)
        bound = 1.0 / math.sqrt(fan_in)
        w = jax.random.uniform(kw, (fan_out, fan_in), jnp.float32, -bound, bound)
        b = jax.random.uniform(kb, (fan_out, 1), jnp.float32, -bound, bound)
        params += [w, b]
    return tuple(params)


def theta_reference(t, params):
    w1, b1, w2, b2, w3, b3, w4, b4 = [np.asarray(a, dtype=np.float64) for a in params]
    x = np.asarray(t, dtype=np.float64)               # (N, 1)
    h = np.maximum(x @ w1.T + b1.T, 0.0)
    h = np.maximum(h @ w2.T + b2.T, 0.0)
    h = np.maximum(h @ w3.T + b3.T, 0.0)
    return 2.0 * np.pi * np.tanh(h @ w4.T + b4.T)     # (N, 1)


# ---------------------------------------------------------------------------
if __name__ == "__main__":
    key = jax.random.PRNGKey(0)
    k_t, k_p = jax.random.split(key)

    N = 2048                      # batch of scalar time values
    t = jax.random.normal(k_t, (N, 1), dtype=jnp.float32)
    params = init_params(k_p)

    # N=2048 -> lanes=128, tile=(8,128)=1024 samples, grid=(2,): no padding,
    # both v7x TensorCores get one step each.
    out = theta_forward(t, params)
    out = jax.block_until_ready(out)

    ref = theta_reference(t, params)
    assert out.shape == (N, 1)
    assert np.allclose(np.asarray(out, dtype=np.float64), ref,
                       atol=1e-3, rtol=1e-3), "mismatch vs reference"

    print("KERNEL_OK")
</pallas_src>

<mosaic_0001>
module attributes {stable_mosaic.version = 11 : i64} {
  func.func @theta_kernel(%arg0: i32, %arg1: memref<305xf32, #tpu.memory_space<smem>>, %arg2: memref<8x128xf32, #tpu.memory_space<vmem>>, %arg3: memref<8x128xf32, #tpu.memory_space<vmem>>) attributes {dimension_semantics = [#tpu.dimension_semantics<parallel>], iteration_bounds = array<i64: 2>, scalar_prefetch = 0 : i64, scratch_operands = 0 : i64, tpu.core_type = #tpu.core_type<tc>, window_params = [{transform_indices = @transform_0, window_bounds = array<i64: 305>}, {transform_indices = @transform_1, window_bounds = array<i64: 8, 128>}, {transform_indices = @transform_2, window_bounds = array<i64: 8, 128>}]} {
    %c0 = arith.constant 0 : index
    %c0_0 = arith.constant 0 : index
    %0 = vector.load %arg2[%c0, %c0_0] : memref<8x128xf32, #tpu.memory_space<vmem>>, vector<8x128xf32>
    %c0_1 = arith.constant 0 : index
    %1 = memref.load %arg1[%c0_1] : memref<305xf32, #tpu.memory_space<smem>>
    %2 = vector.broadcast %1 : f32 to vector<8x128xf32>
    %3 = arith.mulf %2, %0 : vector<8x128xf32>
    %c8 = arith.constant 8 : index
    %4 = memref.load %arg1[%c8] : memref<305xf32, #tpu.memory_space<smem>>
    %5 = vector.broadcast %4 : f32 to vector<8x128xf32>
    %6 = arith.addf %3, %5 : vector<8x128xf32>
    %cst = arith.constant 0.000000e+00 : f32
    %7 = vector.broadcast %cst : f32 to vector<8x128xf32>
    %8 = arith.maximumf %6, %7 : vector<8x128xf32>
    %c1 = arith.constant 1 : index
    %9 = memref.load %arg1[%c1] : memref<305xf32, #tpu.memory_space<smem>>
    %10 = vector.broadcast %9 : f32 to vector<8x128xf32>
    %11 = arith.mulf %10, %0 : vector<8x128xf32>
    %c9 = arith.constant 9 : index
    %12 = memref.load %arg1[%c9] : memref<305xf32, #tpu.memory_space<smem>>
    %13 = vector.broadcast %12 : f32 to vector<8x128xf32>
    %14 = arith.addf %11, %13 : vector<8x128xf32>
    %cst_2 = arith.constant 0.000000e+00 : f32
    %15 = vector.broadcast %cst_2 : f32 to vector<8x128xf32>
    %16 = arith.maximumf %14, %15 : vector<8x128xf32>
    %c2 = arith.constant 2 : index
    %17 = memref.load %arg1[%c2] : memref<305xf32, #tpu.memory_space<smem>>
    %18 = vector.broadcast %17 : f32 to vector<8x128xf32>
    %19 = arith.mulf %18, %0 : vector<8x128xf32>
    %c10 = arith.constant 10 : index
    %20 = memref.load %arg1[%c10] : memref<305xf32, #tpu.memory_space<smem>>
    %21 = vector.broadcast %20 : f32 to vector<8x128xf32>
    %22 = arith.addf %19, %21 : vector<8x128xf32>
    %cst_3 = arith.constant 0.000000e+00 : f32
    %23 = vector.broadcast %cst_3 : f32 to vector<8x128xf32>
    %24 = arith.maximumf %22, %23 : vector<8x128xf32>
    %c3 = arith.constant 3 : index
    %25 = memref.load %arg1[%c3] : memref<305xf32, #tpu.memory_space<smem>>
    %26 = vector.broadcast %25 : f32 to vector<8x128xf32>
    %27 = arith.mulf %26, %0 : vector<8x128xf32>
    %c11 = arith.constant 11 : index
    %28 = memref.load %arg1[%c11] : memref<305xf32, #tpu.memory_space<smem>>
    %29 = vector.broadcast %28 : f32 to vector<8x128xf32>
    %30 = arith.addf %27, %29 : vector<8x128xf32>
    %cst_4 = arith.constant 0.000000e+00 : f32
    %31 = vector.broadcast %cst_4 : f32 to vector<8x128xf32>
    %32 = arith.maximumf %30, %31 : vector<8x128xf32>
    %c4 = arith.constant 4 : index
    %33 = memref.load %arg1[%c4] : memref<305xf32, #tpu.memory_space<smem>>
    %34 = vector.broadcast %33 : f32 to vector<8x128xf32>
    %35 = arith.mulf %34, %0 : vector<8x128xf32>
    %c12 = arith.constant 12 : index
    %36 = memref.load %arg1[%c12] : memref<305xf32, #tpu.memory_space<smem>>
    %37 = vector.broadcast %36 : f32 to vector<8x128xf32>
    %38 = arith.addf %35, %37 : vector<8x128xf32>
    %cst_5 = arith.constant 0.000000e+00 : f32
    %39 = vector.broadcast %cst_5 : f32 to vector<8x128xf32>
    %40 = arith.maximumf %38, %39 : vector<8x128xf32>
    %c5 = arith.constant 5 : index
    %41 = memref.load %arg1[%c5] : memref<305xf32, #tpu.memory_space<smem>>
    %42 = vector.broadcast %41 : f32 to vector<8x128xf32>
    %43 = arith.mulf %42, %0 : vector<8x128xf32>
    %c13 = arith.constant 13 : index
    %44 = memref.load %arg1[%c13] : memref<305xf32, #tpu.memory_space<smem>>
    %45 = vector.broadcast %44 : f32 to vector<8x128xf32>
    %46 = arith.addf %43, %45 : vector<8x128xf32>
    %cst_6 = arith.constant 0.000000e+00 : f32
    %47 = vector.broadcast %cst_6 : f32 to vector<8x128xf32>
    %48 = arith.maximumf %46, %47 : vector<8x128xf32>
    %c6 = arith.constant 6 : index
    %49 = memref.load %arg1[%c6] : memref<305xf32, #tpu.memory_space<smem>>
    %50 = vector.broadcast %49 : f32 to vector<8x128xf32>
    %51 = arith.mulf %50, %0 : vector<8x128xf32>
    %c14 = arith.constant 14 : index
    %52 = memref.load %arg1[%c14] : memref<305xf32, #tpu.memory_space<smem>>
    %53 = vector.broadcast %52 : f32 to vector<8x128xf32>
    %54 = arith.addf %51, %53 : vector<8x128xf32>
    %cst_7 = arith.constant 0.000000e+00 : f32
    %55 = vector.broadcast %cst_7 : f32 to vector<8x128xf32>
    %56 = arith.maximumf %54, %55 : vector<8x128xf32>
    %c7 = arith.constant 7 : index
    %57 = memref.load %arg1[%c7] : memref<305xf32, #tpu.memory_space<smem>>
    %58 = vector.broadcast %57 : f32 to vector<8x128xf32>
    %59 = arith.mulf %58, %0 : vector<8x128xf32>
    %c15 = arith.constant 15 : index
    %60 = memref.load %arg1[%c15] : memref<305xf32, #tpu.memory_space<smem>>
    %61 = vector.broadcast %60 : f32 to vector<8x128xf32>
    %62 = arith.addf %59, %61 : vector<8x128xf32>
    %cst_8 = arith.constant 0.000000e+00 : f32
    %63 = vector.broadcast %cst_8 : f32 to vector<8x128xf32>
    %64 = arith.maximumf %62, %63 : vector<8x128xf32>
    %c16 = arith.constant 16 : index
    %65 = memref.load %arg1[%c16] : memref<305xf32, #tpu.memory_space<smem>>
    %66 = vector.broadcast %65 : f32 to vector<8x128xf32>
    %67 = arith.mulf %8, %66 : vector<8x128xf32>
    %c17 = arith.constant 17 : index
    %68 = memref.load %arg1[%c17] : memref<305xf32, #tpu.memory_space<smem>>
    %69 = vector.broadcast %68 : f32 to vector<8x128xf32>
    %70 = arith.mulf %16, %69 : vector<8x128xf32>
    %71 = arith.addf %67, %70 : vector<8x128xf32>
    %c18 = arith.constant 18 : index
    %72 = memref.load %arg1[%c18] : memref<305xf32, #tpu.memory_space<smem>>
    %73 = vector.broadcast %72 : f32 to vector<8x128xf32>
    %74 = arith.mulf %24, %73 : vector<8x128xf32>
    %75 = arith.addf %71, %74 : vector<8x128xf32>
    %c19 = arith.constant 19 : index
    %76 = memref.load %arg1[%c19] : memref<305xf32, #tpu.memory_space<smem>>
    %77 = vector.broadcast %76 : f32 to vector<8x128xf32>
    %78 = arith.mulf %32, %77 : vector<8x128xf32>
    %79 = arith.addf %75, %78 : vector<8x128xf32>
    %c20 = arith.constant 20 : index
    %80 = memref.load %arg1[%c20] : memref<305xf32, #tpu.memory_space<smem>>
    %81 = vector.broadcast %80 : f32 to vector<8x128xf32>
    %82 = arith.mulf %40, %81 : vector<8x128xf32>
    %83 = arith.addf %79, %82 : vector<8x128xf32>
    %c21 = arith.constant 21 : index
    %84 = memref.load %arg1[%c21] : memref<305xf32, #tpu.memory_space<smem>>
    %85 = vector.broadcast %84 : f32 to vector<8x128xf32>
    %86 = arith.mulf %48, %85 : vector<8x128xf32>
    %87 = arith.addf %83, %86 : vector<8x128xf32>
    %c22 = arith.constant 22 : index
    %88 = memref.load %arg1[%c22] : memref<305xf32, #tpu.memory_space<smem>>
    %89 = vector.broadcast %88 : f32 to vector<8x128xf32>
    %90 = arith.mulf %56, %89 : vector<8x128xf32>
    %91 = arith.addf %87, %90 : vector<8x128xf32>
    %c23 = arith.constant 23 : index
    %92 = memref.load %arg1[%c23] : memref<305xf32, #tpu.memory_space<smem>>
    %93 = vector.broadcast %92 : f32 to vector<8x128xf32>
    %94 = arith.mulf %64, %93 : vector<8x128xf32>
    %95 = arith.addf %91, %94 : vector<8x128xf32>
    %c144 = arith.constant 144 : index
    %96 = memref.load %arg1[%c144] : memref<305xf32, #tpu.memory_space<smem>>
    %97 = vector.broadcast %96 : f32 to vector<8x128xf32>
    %98 = arith.addf %95, %97 : vector<8x128xf32>
    %cst_9 = arith.constant 0.000000e+00 : f32
    %99 = vector.broadcast %cst_9 : f32 to vector<8x128xf32>
    %100 = arith.maximumf %98, %99 : vector<8x128xf32>
    %c24 = arith.constant 24 : index
    %101 = memref.load %arg1[%c24] : memref<305xf32, #tpu.memory_space<smem>>
    %102 = vector.broadcast %101 : f32 to vector<8x128xf32>
    %103 = arith.mulf %8, %102 : vector<8x128xf32>
    %c25 = arith.constant 25 : index
    %104 = memref.load %arg1[%c25] : memref<305xf32, #tpu.memory_space<smem>>
    %105 = vector.broadcast %104 : f32 to vector<8x128xf32>
    %106 = arith.mulf %16, %105 : vector<8x128xf32>
    %107 = arith.addf %103, %106 : vector<8x128xf32>
    %c26 = arith.constant 26 : index
    %108 = memref.load %arg1[%c26] : memref<305xf32, #tpu.memory_space<smem>>
    %109 = vector.broadcast %108 : f32 to vector<8x128xf32>
    %110 = arith.mulf %24, %109 : vector<8x128xf32>
    %111 = arith.addf %107, %110 : vector<8x128xf32>
    %c27 = arith.constant 27 : index
    %112 = memref.load %arg1[%c27] : memref<305xf32, #tpu.memory_space<smem>>
    %113 = vector.broadcast %112 : f32 to vector<8x128xf32>
    %114 = arith.mulf %32, %113 : vector<8x128xf32>
    %115 = arith.addf %111, %114 : vector<8x128xf32>
    %c28 = arith.constant 28 : index
    %116 = memref.load %arg1[%c28] : memref<305xf32, #tpu.memory_space<smem>>
    %117 = vector.broadcast %116 : f32 to vector<8x128xf32>
    %118 = arith.mulf %40, %117 : vector<8x128xf32>
    %119 = arith.addf %115, %118 : vector<8x128xf32>
    %c29 = arith.constant 29 : index
    %120 = memref.load %arg1[%c29] : memref<305xf32, #tpu.memory_space<smem>>
    %121 = vector.broadcast %120 : f32 to vector<8x128xf32>
    %122 = arith.mulf %48, %121 : vector<8x128xf32>
    %123 = arith.addf %119, %122 : vector<8x128xf32>
    %c30 = arith.constant 30 : index
    %124 = memref.load %arg1[%c30] : memref<305xf32, #tpu.memory_space<smem>>
    %125 = vector.broadcast %124 : f32 to vector<8x128xf32>
    %126 = arith.mulf %56, %125 : vector<8x128xf32>
    %127 = arith.addf %123, %126 : vector<8x128xf32>
    %c31 = arith.constant 31 : index
    %128 = memref.load %arg1[%c31] : memref<305xf32, #tpu.memory_space<smem>>
    %129 = vector.broadcast %128 : f32 to vector<8x128xf32>
    %130 = arith.mulf %64, %129 : vector<8x128xf32>
    %131 = arith.addf %127, %130 : vector<8x128xf32>
    %c145 = arith.constant 145 : index
    %132 = memref.load %arg1[%c145] : memref<305xf32, #tpu.memory_space<smem>>
    %133 = vector.broadcast %132 : f32 to vector<8x128xf32>
    %134 = arith.addf %131, %133 : vector<8x128xf32>
    %cst_10 = arith.constant 0.000000e+00 : f32
    %135 = vector.broadcast %cst_10 : f32 to vector<8x128xf32>
    %136 = arith.maximumf %134, %135 : vector<8x128xf32>
    %c32 = arith.constant 32 : index
    %137 = memref.load %arg1[%c32] : memref<305xf32, #tpu.memory_space<smem>>
    %138 = vector.broadcast %137 : f32 to vector<8x128xf32>
    %139 = arith.mulf %8, %138 : vector<8x128xf32>
    %c33 = arith.constant 33 : index
    %140 = memref.load %arg1[%c33] : memref<305xf32, #tpu.memory_space<smem>>
    %141 = vector.broadcast %140 : f32 to vector<8x128xf32>
    %142 = arith.mulf %16, %141 : vector<8x128xf32>
    %143 = arith.addf %139, %142 : vector<8x128xf32>
    %c34 = arith.constant 34 : index
    %144 = memref.load %arg1[%c34] : memref<305xf32, #tpu.memory_space<smem>>
    %145 = vector.broadcast %144 : f32 to vector<8x128xf32>
    %146 = arith.mulf %24, %145 : vector<8x128xf32>
    %147 = arith.addf %143, %146 : vector<8x128xf32>
    %c35 = arith.constant 35 : index
    %148 = memref.load %arg1[%c35] : memref<305xf32, #tpu.memory_space<smem>>
    %149 = vector.broadcast %148 : f32 to vector<8x128xf32>
    %150 = arith.mulf %32, %149 : vector<8x128xf32>
    %151 = arith.addf %147, %150 : vector<8x128xf32>
    %c36 = arith.constant 36 : index
    %152 = memref.load %arg1[%c36] : memref<305xf32, #tpu.memory_space<smem>>
    %153 = vector.broadcast %152 : f32 to vector<8x128xf32>
    %154 = arith.mulf %40, %153 : vector<8x128xf32>
    %155 = arith.addf %151, %154 : vector<8x128xf32>
    %c37 = arith.constant 37 : index
    %156 = memref.load %arg1[%c37] : memref<305xf32, #tpu.memory_space<smem>>
    %157 = vector.broadcast %156 : f32 to vector<8x128xf32>
    %158 = arith.mulf %48, %157 : vector<8x128xf32>
    %159 = arith.addf %155, %158 : vector<8x128xf32>
    %c38 = arith.constant 38 : index
    %160 = memref.load %arg1[%c38] : memref<305xf32, #tpu.memory_space<smem>>
    %161 = vector.broadcast %160 : f32 to vector<8x128xf32>
    %162 = arith.mulf %56, %161 : vector<8x128xf32>
    %163 = arith.addf %159, %162 : vector<8x128xf32>
    %c39 = arith.constant 39 : index
    %164 = memref.load %arg1[%c39] : memref<305xf32, #tpu.memory_space<smem>>
    %165 = vector.broadcast %164 : f32 to vector<8x128xf32>
    %166 = arith.mulf %64, %165 : vector<8x128xf32>
    %167 = arith.addf %163, %166 : vector<8x128xf32>
    %c146 = arith.constant 146 : index
    %168 = memref.load %arg1[%c146] : memref<305xf32, #tpu.memory_space<smem>>
    %169 = vector.broadcast %168 : f32 to vector<8x128xf32>
    %170 = arith.addf %167, %169 : vector<8x128xf32>
    %cst_11 = arith.constant 0.000000e+00 : f32
    %171 = vector.broadcast %cst_11 : f32 to vector<8x128xf32>
    %172 = arith.maximumf %170, %171 : vector<8x128xf32>
    %c40 = arith.constant 40 : index
    %173 = memref.load %arg1[%c40] : memref<305xf32, #tpu.memory_space<smem>>
    %174 = vector.broadcast %173 : f32 to vector<8x128xf32>
    %175 = arith.mulf %8, %174 : vector<8x128xf32>
    %c41 = arith.constant 41 : index
    %176 = memref.load %arg1[%c41] : memref<305xf32, #tpu.memory_space<smem>>
    %177 = vector.broadcast %176 : f32 to vector<8x128xf32>
    %178 = arith.mulf %16, %177 : vector<8x128xf32>
    %179 = arith.addf %175, %178 : vector<8x128xf32>
    %c42 = arith.constant 42 : index
    %180 = memref.load %arg1[%c42] : memref<305xf32, #tpu.memory_space<smem>>
    %181 = vector.broadcast %180 : f32 to vector<8x128xf32>
    %182 = arith.mulf %24, %181 : vector<8x128xf32>
    %183 = arith.addf %179, %182 : vector<8x128xf32>
    %c43 = arith.constant 43 : index
    %184 = memref.load %arg1[%c43] : memref<305xf32, #tpu.memory_space<smem>>
    %185 = vector.broadcast %184 : f32 to vector<8x128xf32>
    %186 = arith.mulf %32, %185 : vector<8x128xf32>
    %187 = arith.addf %183, %186 : vector<8x128xf32>
    %c44 = arith.constant 44 : index
    %188 = memref.load %arg1[%c44] : memref<305xf32, #tpu.memory_space<smem>>
    %189 = vector.broadcast %188 : f32 to vector<8x128xf32>
    %190 = arith.mulf %40, %189 : vector<8x128xf32>
    %191 = arith.addf %187, %190 : vector<8x128xf32>
    %c45 = arith.constant 45 : index
    %192 = memref.load %arg1[%c45] : memref<305xf32, #tpu.memory_space<smem>>
    %193 = vector.broadcast %192 : f32 to vector<8x128xf32>
    %194 = arith.mulf %48, %193 : vector<8x128xf32>
    %195 = arith.addf %191, %194 : vector<8x128xf32>
    %c46 = arith.constant 46 : index
    %196 = memref.load %arg1[%c46] : memref<305xf32, #tpu.memory_space<smem>>
    %197 = vector.broadcast %196 : f32 to vector<8x128xf32>
    %198 = arith.mulf %56, %197 : vector<8x128xf32>
    %199 = arith.addf %195, %198 : vector<8x128xf32>
    %c47 = arith.constant 47 : index
    %200 = memref.load %arg1[%c47] : memref<305xf32, #tpu.memory_space<smem>>
    %201 = vector.broadcast %200 : f32 to vector<8x128xf32>
    %202 = arith.mulf %64, %201 : vector<8x128xf32>
    %203 = arith.addf %199, %202 : vector<8x128xf32>
    %c147 = arith.constant 147 : index
    %204 = memref.load %arg1[%c147] : memref<305xf32, #tpu.memory_space<smem>>
    %205 = vector.broadcast %204 : f32 to vector<8x128xf32>
    %206 = arith.addf %203, %205 : vector<8x128xf32>
    %cst_12 = arith.constant 0.000000e+00 : f32
    %207 = vector.broadcast %cst_12 : f32 to vector<8x128xf32>
    %208 = arith.maximumf %206, %207 : vector<8x128xf32>
    %c48 = arith.constant 48 : index
    %209 = memref.load %arg1[%c48] : memref<305xf32, #tpu.memory_space<smem>>
    %210 = vector.broadcast %209 : f32 to vector<8x128xf32>
    %211 = arith.mulf %8, %210 : vector<8x128xf32>
    %c49 = arith.constant 49 : index
    %212 = memref.load %arg1[%c49] : memref<305xf32, #tpu.memory_space<smem>>
    %213 = vector.broadcast %212 : f32 to vector<8x128xf32>
    %214 = arith.mulf %16, %213 : vector<8x128xf32>
    %215 = arith.addf %211, %214 : vector<8x128xf32>
    %c50 = arith.constant 50 : index
    %216 = memref.load %arg1[%c50] : memref<305xf32, #tpu.memory_space<smem>>
    %217 = vector.broadcast %216 : f32 to vector<8x128xf32>
    %218 = arith.mulf %24, %217 : vector<8x128xf32>
    %219 = arith.addf %215, %218 : vector<8x128xf32>
    %c51 = arith.constant 51 : index
    %220 = memref.load %arg1[%c51] : memref<305xf32, #tpu.memory_space<smem>>
    %221 = vector.broadcast %220 : f32 to vector<8x128xf32>
    %222 = arith.mulf %32, %221 : vector<8x128xf32>
    %223 = arith.addf %219, %222 : vector<8x128xf32>
    %c52 = arith.constant 52 : index
    %224 = memref.load %arg1[%c52] : memref<305xf32, #tpu.memory_space<smem>>
    %225 = vector.broadcast %224 : f32 to vector<8x128xf32>
    %226 = arith.mulf %40, %225 : vector<8x128xf32>
    %227 = arith.addf %223, %226 : vector<8x128xf32>
    %c53 = arith.constant 53 : index
    %228 = memref.load %arg1[%c53] : memref<305xf32, #tpu.memory_space<smem>>
    %229 = vector.broadcast %228 : f32 to vector<8x128xf32>
    %230 = arith.mulf %48, %229 : vector<8x128xf32>
    %231 = arith.addf %227, %230 : vector<8x128xf32>
    %c54 = arith.constant 54 : index
    %232 = memref.load %arg1[%c54] : memref<305xf32, #tpu.memory_space<smem>>
    %233 = vector.broadcast %232 : f32 to vector<8x128xf32>
    %234 = arith.mulf %56, %233 : vector<8x128xf32>
    %235 = arith.addf %231, %234 : vector<8x128xf32>
    %c55 = arith.constant 55 : index
    %236 = memref.load %arg1[%c55] : memref<305xf32, #tpu.memory_space<smem>>
    %237 = vector.broadcast %236 : f32 to vector<8x128xf32>
    %238 = arith.mulf %64, %237 : vector<8x128xf32>
    %239 = arith.addf %235, %238 : vector<8x128xf32>
    %c148 = arith.constant 148 : index
    %240 = memref.load %arg1[%c148] : memref<305xf32, #tpu.memory_space<smem>>
    %241 = vector.broadcast %240 : f32 to vector<8x128xf32>
    %242 = arith.addf %239, %241 : vector<8x128xf32>
    %cst_13 = arith.constant 0.000000e+00 : f32
    %243 = vector.broadcast %cst_13 : f32 to vector<8x128xf32>
    %244 = arith.maximumf %242, %243 : vector<8x128xf32>
    %c56 = arith.constant 56 : index
    %245 = memref.load %arg1[%c56] : memref<305xf32, #tpu.memory_space<smem>>
    %246 = vector.broadcast %245 : f32 to vector<8x128xf32>
    %247 = arith.mulf %8, %246 : vector<8x128xf32>
    %c57 = arith.constant 57 : index
    %248 = memref.load %arg1[%c57] : memref<305xf32, #tpu.memory_space<smem>>
    %249 = vector.broadcast %248 : f32 to vector<8x128xf32>
    %250 = arith.mulf %16, %249 : vector<8x128xf32>
    %251 = arith.addf %247, %250 : vector<8x128xf32>
    %c58 = arith.constant 58 : index
    %252 = memref.load %arg1[%c58] : memref<305xf32, #tpu.memory_space<smem>>
    %253 = vector.broadcast %252 : f32 to vector<8x128xf32>
    %254 = arith.mulf %24, %253 : vector<8x128xf32>
    %255 = arith.addf %251, %254 : vector<8x128xf32>
    %c59 = arith.constant 59 : index
    %256 = memref.load %arg1[%c59] : memref<305xf32, #tpu.memory_space<smem>>
    %257 = vector.broadcast %256 : f32 to vector<8x128xf32>
    %258 = arith.mulf %32, %257 : vector<8x128xf32>
    %259 = arith.addf %255, %258 : vector<8x128xf32>
    %c60 = arith.constant 60 : index
    %260 = memref.load %arg1[%c60] : memref<305xf32, #tpu.memory_space<smem>>
    %261 = vector.broadcast %260 : f32 to vector<8x128xf32>
    %262 = arith.mulf %40, %261 : vector<8x128xf32>
    %263 = arith.addf %259, %262 : vector<8x128xf32>
    %c61 = arith.constant 61 : index
    %264 = memref.load %arg1[%c61] : memref<305xf32, #tpu.memory_space<smem>>
    %265 = vector.broadcast %264 : f32 to vector<8x128xf32>
    %266 = arith.mulf %48, %265 : vector<8x128xf32>
    %267 = arith.addf %263, %266 : vector<8x128xf32>
    %c62 = arith.constant 62 : index
    %268 = memref.load %arg1[%c62] : memref<305xf32, #tpu.memory_space<smem>>
    %269 = vector.broadcast %268 : f32 to vector<8x128xf32>
    %270 = arith.mulf %56, %269 : vector<8x128xf32>
    %271 = arith.addf %267, %270 : vector<8x128xf32>
    %c63 = arith.constant 63 : index
    %272 = memref.load %arg1[%c63] : memref<305xf32, #tpu.memory_space<smem>>
    %273 = vector.broadcast %272 : f32 to vector<8x128xf32>
    %274 = arith.mulf %64, %273 : vector<8x128xf32>
    %275 = arith.addf %271, %274 : vector<8x128xf32>
    %c149 = arith.constant 149 : index
    %276 = memref.load %arg1[%c149] : memref<305xf32, #tpu.memory_space<smem>>
    %277 = vector.broadcast %276 : f32 to vector<8x128xf32>
    %278 = arith.addf %275, %277 : vector<8x128xf32>
    %cst_14 = arith.constant 0.000000e+00 : f32
    %279 = vector.broadcast %cst_14 : f32 to vector<8x128xf32>
    %280 = arith.maximumf %278, %279 : vector<8x128xf32>
    %c64 = arith.constant 64 : index
    %281 = memref.load %arg1[%c64] : memref<305xf32, #tpu.memory_space<smem>>
    %282 = vector.broadcast %281 : f32 to vector<8x128xf32>
    %283 = arith.mulf %8, %282 : vector<8x128xf32>
    %c65 = arith.constant 65 : index
    %284 = memref.load %arg1[%c65] : memref<305xf32, #tpu.memory_space<smem>>
    %285 = vector.broadcast %284 : f32 to vector<8x128xf32>
    %286 = arith.mulf %16, %285 : vector<8x128xf32>
    %287 = arith.addf %283, %286 : vector<8x128xf32>
    %c66 = arith.constant 66 : index
    %288 = memref.load %arg1[%c66] : memref<305xf32, #tpu.memory_space<smem>>
    %289 = vector.broadcast %288 : f32 to vector<8x128xf32>
    %290 = arith.mulf %24, %289 : vector<8x128xf32>
    %291 = arith.addf %287, %290 : vector<8x128xf32>
    %c67 = arith.constant 67 : index
    %292 = memref.load %arg1[%c67] : memref<305xf32, #tpu.memory_space<smem>>
    %293 = vector.broadcast %292 : f32 to vector<8x128xf32>
    %294 = arith.mulf %32, %293 : vector<8x128xf32>
    %295 = arith.addf %291, %294 : vector<8x128xf32>
    %c68 = arith.constant 68 : index
    %296 = memref.load %arg1[%c68] : memref<305xf32, #tpu.memory_space<smem>>
    %297 = vector.broadcast %296 : f32 to vector<8x128xf32>
    %298 = arith.mulf %40, %297 : vector<8x128xf32>
    %299 = arith.addf %295, %298 : vector<8x128xf32>
    %c69 = arith.constant 69 : index
    %300 = memref.load %arg1[%c69] : memref<305xf32, #tpu.memory_space<smem>>
    %301 = vector.broadcast %300 : f32 to vector<8x128xf32>
    %302 = arith.mulf %48, %301 : vector<8x128xf32>
    %303 = arith.addf %299, %302 : vector<8x128xf32>
    %c70 = arith.constant 70 : index
    %304 = memref.load %arg1[%c70] : memref<305xf32, #tpu.memory_space<smem>>
    %305 = vector.broadcast %304 : f32 to vector<8x128xf32>
    %306 = arith.mulf %56, %305 : vector<8x128xf32>
    %307 = arith.addf %303, %306 : vector<8x128xf32>
    %c71 = arith.constant 71 : index
    %308 = memref.load %arg1[%c71] : memref<305xf32, #tpu.memory_space<smem>>
    %309 = vector.broadcast %308 : f32 to vector<8x128xf32>
    %310 = arith.mulf %64, %309 : vector<8x128xf32>
    %311 = arith.addf %307, %310 : vector<8x128xf32>
    %c150 = arith.constant 150 : index
    %312 = memref.load %arg1[%c150] : memref<305xf32, #tpu.memory_space<smem>>
    %313 = vector.broadcast %312 : f32 to vector<8x128xf32>
    %314 = arith.addf %311, %313 : vector<8x128xf32>
    %cst_15 = arith.constant 0.000000e+00 : f32
    %315 = vector.broadcast %cst_15 : f32 to vector<8x128xf32>
    %316 = arith.maximumf %314, %315 : vector<8x128xf32>
    %c72 = arith.constant 72 : index
    %317 = memref.load %arg1[%c72] : memref<305xf32, #tpu.memory_space<smem>>
    %318 = vector.broadcast %317 : f32 to vector<8x128xf32>
    %319 = arith.mulf %8, %318 : vector<8x128xf32>
    %c73 = arith.constant 73 : index
    %320 = memref.load %arg1[%c73] : memref<305xf32, #tpu.memory_space<smem>>
    %321 = vector.broadcast %320 : f32 to vector<8x128xf32>
    %322 = arith.mulf %16, %321 : vector<8x128xf32>
    %323 = arith.addf %319, %322 : vector<8x128xf32>
    %c74 = arith.constant 74 : index
    %324 = memref.load %arg1[%c74] : memref<305xf32, #tpu.memory_space<smem>>
    %325 = vector.broadcast %324 : f32 to vector<8x128xf32>
    %326 = arith.mulf %24, %325 : vector<8x128xf32>
    %327 = arith.addf %323, %326 : vector<8x128xf32>
    %c75 = arith.constant 75 : index
    %328 = memref.load %arg1[%c75] : memref<305xf32, #tpu.memory_space<smem>>
    %329 = vector.broadcast %328 : f32 to vector<8x128xf32>
    %330 = arith.mulf %32, %329 : vector<8x128xf32>
    %331 = arith.addf %327, %330 : vector<8x128xf32>
    %c76 = arith.constant 76 : index
    %332 = memref.load %arg1[%c76] : memref<305xf32, #tpu.memory_space<smem>>
    %333 = vector.broadcast %332 : f32 to vector<8x128xf32>
    %334 = arith.mulf %40, %333 : vector<8x128xf32>
    %335 = arith.addf %331, %334 : vector<8x128xf32>
    %c77 = arith.constant 77 : index
    %336 = memref.load %arg1[%c77] : memref<305xf32, #tpu.memory_space<smem>>
    %337 = vector.broadcast %336 : f32 to vector<8x128xf32>
    %338 = arith.mulf %48, %337 : vector<8x128xf32>
    %339 = arith.addf %335, %338 : vector<8x128xf32>
    %c78 = arith.constant 78 : index
    %340 = memref.load %arg1[%c78] : memref<305xf32, #tpu.memory_space<smem>>
    %341 = vector.broadcast %340 : f32 to vector<8x128xf32>
    %342 = arith.mulf %56, %341 : vector<8x128xf32>
    %343 = arith.addf %339, %342 : vector<8x128xf32>
    %c79 = arith.constant 79 : index
    %344 = memref.load %arg1[%c79] : memref<305xf32, #tpu.memory_space<smem>>
    %345 = vector.broadcast %344 : f32 to vector<8x128xf32>
    %346 = arith.mulf %64, %345 : vector<8x128xf32>
    %347 = arith.addf %343, %346 : vector<8x128xf32>
    %c151 = arith.constant 151 : index
    %348 = memref.load %arg1[%c151] : memref<305xf32, #tpu.memory_space<smem>>
    %349 = vector.broadcast %348 : f32 to vector<8x128xf32>
    %350 = arith.addf %347, %349 : vector<8x128xf32>
    %cst_16 = arith.constant 0.000000e+00 : f32
    %351 = vector.broadcast %cst_16 : f32 to vector<8x128xf32>
    %352 = arith.maximumf %350, %351 : vector<8x128xf32>
    %c80 = arith.constant 80 : index
    %353 = memref.load %arg1[%c80] : memref<305xf32, #tpu.memory_space<smem>>
    %354 = vector.broadcast %353 : f32 to vector<8x128xf32>
    %355 = arith.mulf %8, %354 : vector<8x128xf32>
    %c81 = arith.constant 81 : index
    %356 = memref.load %arg1[%c81] : memref<305xf32, #tpu.memory_space<smem>>
    %357 = vector.broadcast %356 : f32 to vector<8x128xf32>
    %358 = arith.mulf %16, %357 : vector<8x128xf32>
    %359 = arith.addf %355, %358 : vector<8x128xf32>
    %c82 = arith.constant 82 : index
    %360 = memref.load %arg1[%c82] : memref<305xf32, #tpu.memory_space<smem>>
    %361 = vector.broadcast %360 : f32 to vector<8x128xf32>
    %362 = arith.mulf %24, %361 : vector<8x128xf32>
    %363 = arith.addf %359, %362 : vector<8x128xf32>
    %c83 = arith.constant 83 : index
    %364 = memref.load %arg1[%c83] : memref<305xf32, #tpu.memory_space<smem>>
    %365 = vector.broadcast %364 : f32 to vector<8x128xf32>
    %366 = arith.mulf %32, %365 : vector<8x128xf32>
    %367 = arith.addf %363, %366 : vector<8x128xf32>
    %c84 = arith.constant 84 : index
    %368 = memref.load %arg1[%c84] : memref<305xf32, #tpu.memory_space<smem>>
    %369 = vector.broadcast %368 : f32 to vector<8x128xf32>
    %370 = arith.mulf %40, %369 : vector<8x128xf32>
    %371 = arith.addf %367, %370 : vector<8x128xf32>
    %c85 = arith.constant 85 : index
    %372 = memref.load %arg1[%c85] : memref<305xf32, #tpu.memory_space<smem>>
    %373 = vector.broadcast %372 : f32 to vector<8x128xf32>
    %374 = arith.mulf %48, %373 : vector<8x128xf32>
    %375 = arith.addf %371, %374 : vector<8x128xf32>
    %c86 = arith.constant 86 : index
    %376 = memref.load %arg1[%c86] : memref<305xf32, #tpu.memory_space<smem>>
    %377 = vector.broadcast %376 : f32 to vector<8x128xf32>
    %378 = arith.mulf %56, %377 : vector<8x128xf32>
    %379 = arith.addf %375, %378 : vector<8x128xf32>
    %c87 = arith.constant 87 : index
    %380 = memref.load %arg1[%c87] : memref<305xf32, #tpu.memory_space<smem>>
    %381 = vector.broadcast %380 : f32 to vector<8x128xf32>
    %382 = arith.mulf %64, %381 : vector<8x128xf32>
    %383 = arith.addf %379, %382 : vector<8x128xf32>
    %c152 = arith.constant 152 : index
    %384 = memref.load %arg1[%c152] : memref<305xf32, #tpu.memory_space<smem>>
    %385 = vector.broadcast %384 : f32 to vector<8x128xf32>
    %386 = arith.addf %383, %385 : vector<8x128xf32>
    %cst_17 = arith.constant 0.000000e+00 : f32
    %387 = vector.broadcast %cst_17 : f32 to vector<8x128xf32>
    %388 = arith.maximumf %386, %387 : vector<8x128xf32>
    %c88 = arith.constant 88 : index
    %389 = memref.load %arg1[%c88] : memref<305xf32, #tpu.memory_space<smem>>
    %390 = vector.broadcast %389 : f32 to vector<8x128xf32>
    %391 = arith.mulf %8, %390 : vector<8x128xf32>
    %c89 = arith.constant 89 : index
    %392 = memref.load %arg1[%c89] : memref<305xf32, #tpu.memory_space<smem>>
    %393 = vector.broadcast %392 : f32 to vector<8x128xf32>
    %394 = arith.mulf %16, %393 : vector<8x128xf32>
    %395 = arith.addf %391, %394 : vector<8x128xf32>
    %c90 = arith.constant 90 : index
    %396 = memref.load %arg1[%c90] : memref<305xf32, #tpu.memory_space<smem>>
    %397 = vector.broadcast %396 : f32 to vector<8x128xf32>
    %398 = arith.mulf %24, %397 : vector<8x128xf32>
    %399 = arith.addf %395, %398 : vector<8x128xf32>
    %c91 = arith.constant 91 : index
    %400 = memref.load %arg1[%c91] : memref<305xf32, #tpu.memory_space<smem>>
    %401 = vector.broadcast %400 : f32 to vector<8x128xf32>
    %402 = arith.mulf %32, %401 : vector<8x128xf32>
    %403 = arith.addf %399, %402 : vector<8x128xf32>
    %c92 = arith.constant 92 : index
    %404 = memref.load %arg1[%c92] : memref<305xf32, #tpu.memory_space<smem>>
    %405 = vector.broadcast %404 : f32 to vector<8x128xf32>
    %406 = arith.mulf %40, %405 : vector<8x128xf32>
    %407 = arith.addf %403, %406 : vector<8x128xf32>
    %c93 = arith.constant 93 : index
    %408 = memref.load %arg1[%c93] : memref<305xf32, #tpu.memory_space<smem>>
    %409 = vector.broadcast %408 : f32 to vector<8x128xf32>
    %410 = arith.mulf %48, %409 : vector<8x128xf32>
    %411 = arith.addf %407, %410 : vector<8x128xf32>
    %c94 = arith.constant 94 : index
    %412 = memref.load %arg1[%c94] : memref<305xf32, #tpu.memory_space<smem>>
    %413 = vector.broadcast %412 : f32 to vector<8x128xf32>
    %414 = arith.mulf %56, %413 : vector<8x128xf32>
    %415 = arith.addf %411, %414 : vector<8x128xf32>
    %c95 = arith.constant 95 : index
    %416 = memref.load %arg1[%c95] : memref<305xf32, #tpu.memory_space<smem>>
    %417 = vector.broadcast %416 : f32 to vector<8x128xf32>
    %418 = arith.mulf %64, %417 : vector<8x128xf32>
    %419 = arith.addf %415, %418 : vector<8x128xf32>
    %c153 = arith.constant 153 : index
    %420 = memref.load %arg1[%c153] : memref<305xf32, #tpu.memory_space<smem>>
    %421 = vector.broadcast %420 : f32 to vector<8x128xf32>
    %422 = arith.addf %419, %421 : vector<8x128xf32>
    %cst_18 = arith.constant 0.000000e+00 : f32
    %423 = vector.broadcast %cst_18 : f32 to vector<8x128xf32>
    %424 = arith.maximumf %422, %423 : vector<8x128xf32>
    %c96 = arith.constant 96 : index
    %425 = memref.load %arg1[%c96] : memref<305xf32, #tpu.memory_space<smem>>
    %426 = vector.broadcast %425 : f32 to vector<8x128xf32>
    %427 = arith.mulf %8, %426 : vector<8x128xf32>
    %c97 = arith.constant 97 : index
    %428 = memref.load %arg1[%c97] : memref<305xf32, #tpu.memory_space<smem>>
    %429 = vector.broadcast %428 : f32 to vector<8x128xf32>
    %430 = arith.mulf %16, %429 : vector<8x128xf32>
    %431 = arith.addf %427, %430 : vector<8x128xf32>
    %c98 = arith.constant 98 : index
    %432 = memref.load %arg1[%c98] : memref<305xf32, #tpu.memory_space<smem>>
    %433 = vector.broadcast %432 : f32 to vector<8x128xf32>
    %434 = arith.mulf %24, %433 : vector<8x128xf32>
    %435 = arith.addf %431, %434 : vector<8x128xf32>
    %c99 = arith.constant 99 : index
    %436 = memref.load %arg1[%c99] : memref<305xf32, #tpu.memory_space<smem>>
    %437 = vector.broadcast %436 : f32 to vector<8x128xf32>
    %438 = arith.mulf %32, %437 : vector<8x128xf32>
    %439 = arith.addf %435, %438 : vector<8x128xf32>
    %c100 = arith.constant 100 : index
    %440 = memref.load %arg1[%c100] : memref<305xf32, #tpu.memory_space<smem>>
    %441 = vector.broadcast %440 : f32 to vector<8x128xf32>
    %442 = arith.mulf %40, %441 : vector<8x128xf32>
    %443 = arith.addf %439, %442 : vector<8x128xf32>
    %c101 = arith.constant 101 : index
    %444 = memref.load %arg1[%c101] : memref<305xf32, #tpu.memory_space<smem>>
    %445 = vector.broadcast %444 : f32 to vector<8x128xf32>
    %446 = arith.mulf %48, %445 : vector<8x128xf32>
    %447 = arith.addf %443, %446 : vector<8x128xf32>
    %c102 = arith.constant 102 : index
    %448 = memref.load %arg1[%c102] : memref<305xf32, #tpu.memory_space<smem>>
    %449 = vector.broadcast %448 : f32 to vector<8x128xf32>
    %450 = arith.mulf %56, %449 : vector<8x128xf32>
    %451 = arith.addf %447, %450 : vector<8x128xf32>
    %c103 = arith.constant 103 : index
    %452 = memref.load %arg1[%c103] : memref<305xf32, #tpu.memory_space<smem>>
    %453 = vector.broadcast %452 : f32 to vector<8x128xf32>
    %454 = arith.mulf %64, %453 : vector<8x128xf32>
    %455 = arith.addf %451, %454 : vector<8x128xf32>
    %c154 = arith.constant 154 : index
    %456 = memref.load %arg1[%c154] : memref<305xf32, #tpu.memory_space<smem>>
    %457 = vector.broadcast %456 : f32 to vector<8x128xf32>
    %458 = arith.addf %455, %457 : vector<8x128xf32>
    %cst_19 = arith.constant 0.000000e+00 : f32
    %459 = vector.broadcast %cst_19 : f32 to vector<8x128xf32>
    %460 = arith.maximumf %458, %459 : vector<8x128xf32>
    %c104 = arith.constant 104 : index
    %461 = memref.load %arg1[%c104] : memref<305xf32, #tpu.memory_space<smem>>
    %462 = vector.broadcast %461 : f32 to vector<8x128xf32>
    %463 = arith.mulf %8, %462 : vector<8x128xf32>
    %c105 = arith.constant 105 : index
    %464 = memref.load %arg1[%c105] : memref<305xf32, #tpu.memory_space<smem>>
    %465 = vector.broadcast %464 : f32 to vector<8x128xf32>
    %466 = arith.mulf %16, %465 : vector<8x128xf32>
    %467 = arith.addf %463, %466 : vector<8x128xf32>
    %c106 = arith.constant 106 : index
    %468 = memref.load %arg1[%c106] : memref<305xf32, #tpu.memory_space<smem>>
    %469 = vector.broadcast %468 : f32 to vector<8x128xf32>
    %470 = arith.mulf %24, %469 : vector<8x128xf32>
    %471 = arith.addf %467, %470 : vector<8x128xf32>
    %c107 = arith.constant 107 : index
    %472 = memref.load %arg1[%c107] : memref<305xf32, #tpu.memory_space<smem>>
    %473 = vector.broadcast %472 : f32 to vector<8x128xf32>
    %474 = arith.mulf %32, %473 : vector<8x128xf32>
    %475 = arith.addf %471, %474 : vector<8x128xf32>
    %c108 = arith.constant 108 : index
    %476 = memref.load %arg1[%c108] : memref<305xf32, #tpu.memory_space<smem>>
    %477 = vector.broadcast %476 : f32 to vector<8x128xf32>
    %478 = arith.mulf %40, %477 : vector<8x128xf32>
    %479 = arith.addf %475, %478 : vector<8x128xf32>
    %c109 = arith.constant 109 : index
    %480 = memref.load %arg1[%c109] : memref<305xf32, #tpu.memory_space<smem>>
    %481 = vector.broadcast %480 : f32 to vector<8x128xf32>
    %482 = arith.mulf %48, %481 : vector<8x128xf32>
    %483 = arith.addf %479, %482 : vector<8x128xf32>
    %c110 = arith.constant 110 : index
    %484 = memref.load %arg1[%c110] : memref<305xf32, #tpu.memory_space<smem>>
    %485 = vector.broadcast %484 : f32 to vector<8x128xf32>
    %486 = arith.mulf %56, %485 : vector<8x128xf32>
    %487 = arith.addf %483, %486 : vector<8x128xf32>
    %c111 = arith.constant 111 : index
    %488 = memref.load %arg1[%c111] : memref<305xf32, #tpu.memory_space<smem>>
    %489 = vector.broadcast %488 : f32 to vector<8x128xf32>
    %490 = arith.mulf %64, %489 : vector<8x128xf32>
    %491 = arith.addf %487, %490 : vector<8x128xf32>
    %c155 = arith.constant 155 : index
    %492 = memref.load %arg1[%c155] : memref<305xf32, #tpu.memory_space<smem>>
    %493 = vector.broadcast %492 : f32 to vector<8x128xf32>
    %494 = arith.addf %491, %493 : vector<8x128xf32>
    %cst_20 = arith.constant 0.000000e+00 : f32
    %495 = vector.broadcast %cst_20 : f32 to vector<8x128xf32>
    %496 = arith.maximumf %494, %495 : vector<8x128xf32>
    %c112 = arith.constant 112 : index
    %497 = memref.load %arg1[%c112] : memref<305xf32, #tpu.memory_space<smem>>
    %498 = vector.broadcast %497 : f32 to vector<8x128xf32>
    %499 = arith.mulf %8, %498 : vector<8x128xf32>
    %c113 = arith.constant 113 : index
    %500 = memref.load %arg1[%c113] : memref<305xf32, #tpu.memory_space<smem>>
    %501 = vector.broadcast %500 : f32 to vector<8x128xf32>
    %502 = arith.mulf %16, %501 : vector<8x128xf32>
    %503 = arith.addf %499, %502 : vector<8x128xf32>
    %c114 = arith.constant 114 : index
    %504 = memref.load %arg1[%c114] : memref<305xf32, #tpu.memory_space<smem>>
    %505 = vector.broadcast %504 : f32 to vector<8x128xf32>
    %506 = arith.mulf %24, %505 : vector<8x128xf32>
    %507 = arith.addf %503, %506 : vector<8x128xf32>
    %c115 = arith.constant 115 : index
    %508 = memref.load %arg1[%c115] : memref<305xf32, #tpu.memory_space<smem>>
    %509 = vector.broadcast %508 : f32 to vector<8x128xf32>
    %510 = arith.mulf %32, %509 : vector<8x128xf32>
    %511 = arith.addf %507, %510 : vector<8x128xf32>
    %c116 = arith.constant 116 : index
    %512 = memref.load %arg1[%c116] : memref<305xf32, #tpu.memory_space<smem>>
    %513 = vector.broadcast %512 : f32 to vector<8x128xf32>
    %514 = arith.mulf %40, %513 : vector<8x128xf32>
    %515 = arith.addf %511, %514 : vector<8x128xf32>
    %c117 = arith.constant 117 : index
    %516 = memref.load %arg1[%c117] : memref<305xf32, #tpu.memory_space<smem>>
    %517 = vector.broadcast %516 : f32 to vector<8x128xf32>
    %518 = arith.mulf %48, %517 : vector<8x128xf32>
    %519 = arith.addf %515, %518 : vector<8x128xf32>
    %c118 = arith.constant 118 : index
    %520 = memref.load %arg1[%c118] : memref<305xf32, #tpu.memory_space<smem>>
    %521 = vector.broadcast %520 : f32 to vector<8x128xf32>
    %522 = arith.mulf %56, %521 : vector<8x128xf32>
    %523 = arith.addf %519, %522 : vector<8x128xf32>
    %c119 = arith.constant 119 : index
    %524 = memref.load %arg1[%c119] : memref<305xf32, #tpu.memory_space<smem>>
    %525 = vector.broadcast %524 : f32 to vector<8x128xf32>
    %526 = arith.mulf %64, %525 : vector<8x128xf32>
    %527 = arith.addf %523, %526 : vector<8x128xf32>
    %c156 = arith.constant 156 : index
    %528 = memref.load %arg1[%c156] : memref<305xf32, #tpu.memory_space<smem>>
    %529 = vector.broadcast %528 : f32 to vector<8x128xf32>
    %530 = arith.addf %527, %529 : vector<8x128xf32>
    %cst_21 = arith.constant 0.000000e+00 : f32
    %531 = vector.broadcast %cst_21 : f32 to vector<8x128xf32>
    %532 = arith.maximumf %530, %531 : vector<8x128xf32>
    %c120 = arith.constant 120 : index
    %533 = memref.load %arg1[%c120] : memref<305xf32, #tpu.memory_space<smem>>
    %534 = vector.broadcast %533 : f32 to vector<8x128xf32>
    %535 = arith.mulf %8, %534 : vector<8x128xf32>
    %c121 = arith.constant 121 : index
    %536 = memref.load %arg1[%c121] : memref<305xf32, #tpu.memory_space<smem>>
    %537 = vector.broadcast %536 : f32 to vector<8x128xf32>
    %538 = arith.mulf %16, %537 : vector<8x128xf32>
    %539 = arith.addf %535, %538 : vector<8x128xf32>
    %c122 = arith.constant 122 : index
    %540 = memref.load %arg1[%c122] : memref<305xf32, #tpu.memory_space<smem>>
    %541 = vector.broadcast %540 : f32 to vector<8x128xf32>
    %542 = arith.mulf %24, %541 : vector<8x128xf32>
    %543 = arith.addf %539, %542 : vector<8x128xf32>
    %c123 = arith.constant 123 : index
    %544 = memref.load %arg1[%c123] : memref<305xf32, #tpu.memory_space<smem>>
    %545 = vector.broadcast %544 : f32 to vector<8x128xf32>
    %546 = arith.mulf %32, %545 : vector<8x128xf32>
    %547 = arith.addf %543, %546 : vector<8x128xf32>
    %c124 = arith.constant 124 : index
    %548 = memref.load %arg1[%c124] : memref<305xf32, #tpu.memory_space<smem>>
    %549 = vector.broadcast %548 : f32 to vector<8x128xf32>
    %550 = arith.mulf %40, %549 : vector<8x128xf32>
    %551 = arith.addf %547, %550 : vector<8x128xf32>
    %c125 = arith.constant 125 : index
    %552 = memref.load %arg1[%c125] : memref<305xf32, #tpu.memory_space<smem>>
    %553 = vector.broadcast %552 : f32 to vector<8x128xf32>
    %554 = arith.mulf %48, %553 : vector<8x128xf32>
    %555 = arith.addf %551, %554 : vector<8x128xf32>
    %c126 = arith.constant 126 : index
    %556 = memref.load %arg1[%c126] : memref<305xf32, #tpu.memory_space<smem>>
    %557 = vector.broadcast %556 : f32 to vector<8x128xf32>
    %558 = arith.mulf %56, %557 : vector<8x128xf32>
    %559 = arith.addf %555, %558 : vector<8x128xf32>
    %c127 = arith.constant 127 : index
    %560 = memref.load %arg1[%c127] : memref<305xf32, #tpu.memory_space<smem>>
    %561 = vector.broadcast %560 : f32 to vector<8x128xf32>
    %562 = arith.mulf %64, %561 : vector<8x128xf32>
    %563 = arith.addf %559, %562 : vector<8x128xf32>
    %c157 = arith.constant 157 : index
    %564 = memref.load %arg1[%c157] : memref<305xf32, #tpu.memory_space<smem>>
    %565 = vector.broadcast %564 : f32 to vector<8x128xf32>
    %566 = arith.addf %563, %565 : vector<8x128xf32>
    %cst_22 = arith.constant 0.000000e+00 : f32
    %567 = vector.broadcast %cst_22 : f32 to vector<8x128xf32>
    %568 = arith.maximumf %566, %567 : vector<8x128xf32>
    %c128 = arith.constant 128 : index
    %569 = memref.load %arg1[%c128] : memref<305xf32, #tpu.memory_space<smem>>
    %570 = vector.broadcast %569 : f32 to vector<8x128xf32>
    %571 = arith.mulf %8, %570 : vector<8x128xf32>
    %c129 = arith.constant 129 : index
    %572 = memref.load %arg1[%c129] : memref<305xf32, #tpu.memory_space<smem>>
    %573 = vector.broadcast %572 : f32 to vector<8x128xf32>
    %574 = arith.mulf %16, %573 : vector<8x128xf32>
    %575 = arith.addf %571, %574 : vector<8x128xf32>
    %c130 = arith.constant 130 : index
    %576 = memref.load %arg1[%c130] : memref<305xf32, #tpu.memory_space<smem>>
    %577 = vector.broadcast %576 : f32 to vector<8x128xf32>
    %578 = arith.mulf %24, %577 : vector<8x128xf32>
    %579 = arith.addf %575, %578 : vector<8x128xf32>
    %c131 = arith.constant 131 : index
    %580 = memref.load %arg1[%c131] : memref<305xf32, #tpu.memory_space<smem>>
    %581 = vector.broadcast %580 : f32 to vector<8x128xf32>
    %582 = arith.mulf %32, %581 : vector<8x128xf32>
    %583 = arith.addf %579, %582 : vector<8x128xf32>
    %c132 = arith.constant 132 : index
    %584 = memref.load %arg1[%c132] : memref<305xf32, #tpu.memory_space<smem>>
    %585 = vector.broadcast %584 : f32 to vector<8x128xf32>
    %586 = arith.mulf %40, %585 : vector<8x128xf32>
    %587 = arith.addf %583, %586 : vector<8x128xf32>
    %c133 = arith.constant 133 : index
    %588 = memref.load %arg1[%c133] : memref<305xf32, #tpu.memory_space<smem>>
    %589 = vector.broadcast %588 : f32 to vector<8x128xf32>
    %590 = arith.mulf %48, %589 : vector<8x128xf32>
    %591 = arith.addf %587, %590 : vector<8x128xf32>
    %c134 = arith.constant 134 : index
    %592 = memref.load %arg1[%c134] : memref<305xf32, #tpu.memory_space<smem>>
    %593 = vector.broadcast %592 : f32 to vector<8x128xf32>
    %594 = arith.mulf %56, %593 : vector<8x128xf32>
    %595 = arith.addf %591, %594 : vector<8x128xf32>
    %c135 = arith.constant 135 : index
    %596 = memref.load %arg1[%c135] : memref<305xf32, #tpu.memory_space<smem>>
    %597 = vector.broadcast %596 : f32 to vector<8x128xf32>
    %598 = arith.mulf %64, %597 : vector<8x128xf32>
    %599 = arith.addf %595, %598 : vector<8x128xf32>
    %c158 = arith.constant 158 : index
    %600 = memref.load %arg1[%c158] : memref<305xf32, #tpu.memory_space<smem>>
    %601 = vector.broadcast %600 : f32 to vector<8x128xf32>
    %602 = arith.addf %599, %601 : vector<8x128xf32>
    %cst_23 = arith.constant 0.000000e+00 : f32
    %603 = vector.broadcast %cst_23 : f32 to vector<8x128xf32>
    %604 = arith.maximumf %602, %603 : vector<8x128xf32>
    %c136 = arith.constant 136 : index
    %605 = memref.load %arg1[%c136] : memref<305xf32, #tpu.memory_space<smem>>
    %606 = vector.broadcast %605 : f32 to vector<8x128xf32>
    %607 = arith.mulf %8, %606 : vector<8x128xf32>
    %c137 = arith.constant 137 : index
    %608 = memref.load %arg1[%c137] : memref<305xf32, #tpu.memory_space<smem>>
    %609 = vector.broadcast %608 : f32 to vector<8x128xf32>
    %610 = arith.mulf %16, %609 : vector<8x128xf32>
    %611 = arith.addf %607, %610 : vector<8x128xf32>
    %c138 = arith.constant 138 : index
    %612 = memref.load %arg1[%c138] : memref<305xf32, #tpu.memory_space<smem>>
    %613 = vector.broadcast %612 : f32 to vector<8x128xf32>
    %614 = arith.mulf %24, %613 : vector<8x128xf32>
    %615 = arith.addf %611, %614 : vector<8x128xf32>
    %c139 = arith.constant 139 : index
    %616 = memref.load %arg1[%c139] : memref<305xf32, #tpu.memory_space<smem>>
    %617 = vector.broadcast %616 : f32 to vector<8x128xf32>
    %618 = arith.mulf %32, %617 : vector<8x128xf32>
    %619 = arith.addf %615, %618 : vector<8x128xf32>
    %c140 = arith.constant 140 : index
    %620 = memref.load %arg1[%c140] : memref<305xf32, #tpu.memory_space<smem>>
    %621 = vector.broadcast %620 : f32 to vector<8x128xf32>
    %622 = arith.mulf %40, %621 : vector<8x128xf32>
    %623 = arith.addf %619, %622 : vector<8x128xf32>
    %c141 = arith.constant 141 : index
    %624 = memref.load %arg1[%c141] : memref<305xf32, #tpu.memory_space<smem>>
    %625 = vector.broadcast %624 : f32 to vector<8x128xf32>
    %626 = arith.mulf %48, %625 : vector<8x128xf32>
    %627 = arith.addf %623, %626 : vector<8x128xf32>
    %c142 = arith.constant 142 : index
    %628 = memref.load %arg1[%c142] : memref<305xf32, #tpu.memory_space<smem>>
    %629 = vector.broadcast %628 : f32 to vector<8x128xf32>
    %630 = arith.mulf %56, %629 : vector<8x128xf32>
    %631 = arith.addf %627, %630 : vector<8x128xf32>
    %c143 = arith.constant 143 : index
    %632 = memref.load %arg1[%c143] : memref<305xf32, #tpu.memory_space<smem>>
    %633 = vector.broadcast %632 : f32 to vector<8x128xf32>
    %634 = arith.mulf %64, %633 : vector<8x128xf32>
    %635 = arith.addf %631, %634 : vector<8x128xf32>
    %c159 = arith.constant 159 : index
    %636 = memref.load %arg1[%c159] : memref<305xf32, #tpu.memory_space<smem>>
    %637 = vector.broadcast %636 : f32 to vector<8x128xf32>
    %638 = arith.addf %635, %637 : vector<8x128xf32>
    %cst_24 = arith.constant 0.000000e+00 : f32
    %639 = vector.broadcast %cst_24 : f32 to vector<8x128xf32>
    %640 = arith.maximumf %638, %639 : vector<8x128xf32>
    %c160 = arith.constant 160 : index
    %641 = memref.load %arg1[%c160] : memref<305xf32, #tpu.memory_space<smem>>
    %642 = vector.broadcast %641 : f32 to vector<8x128xf32>
    %643 = arith.mulf %100, %642 : vector<8x128xf32>
    %c161 = arith.constant 161 : index
    %644 = memref.load %arg1[%c161] : memref<305xf32, #tpu.memory_space<smem>>
    %645 = vector.broadcast %644 : f32 to vector<8x128xf32>
    %646 = arith.mulf %136, %645 : vector<8x128xf32>
    %647 = arith.addf %643, %646 : vector<8x128xf32>
    %c162 = arith.constant 162 : index
    %648 = memref.load %arg1[%c162] : memref<305xf32, #tpu.memory_space<smem>>
    %649 = vector.broadcast %648 : f32 to vector<8x128xf32>
    %650 = arith.mulf %172, %649 : vector<8x128xf32>
    %651 = arith.addf %647, %650 : vector<8x128xf32>
    %c163 = arith.constant 163 : index
    %652 = memref.load %arg1[%c163] : memref<305xf32, #tpu.memory_space<smem>>
    %653 = vector.broadcast %652 : f32 to vector<8x128xf32>
    %654 = arith.mulf %208, %653 : vector<8x128xf32>
    %655 = arith.addf %651, %654 : vector<8x128xf32>
    %c164 = arith.constant 164 : index
    %656 = memref.load %arg1[%c164] : memref<305xf32, #tpu.memory_space<smem>>
    %657 = vector.broadcast %656 : f32 to vector<8x128xf32>
    %658 = arith.mulf %244, %657 : vector<8x128xf32>
    %659 = arith.addf %655, %658 : vector<8x128xf32>
    %c165 = arith.constant 165 : index
    %660 = memref.load %arg1[%c165] : memref<305xf32, #tpu.memory_space<smem>>
    %661 = vector.broadcast %660 : f32 to vector<8x128xf32>
    %662 = arith.mulf %280, %661 : vector<8x128xf32>
    %663 = arith.addf %659, %662 : vector<8x128xf32>
    %c166 = arith.constant 166 : index
    %664 = memref.load %arg1[%c166] : memref<305xf32, #tpu.memory_space<smem>>
    %665 = vector.broadcast %664 : f32 to vector<8x128xf32>
    %666 = arith.mulf %316, %665 : vector<8x128xf32>
    %667 = arith.addf %663, %666 : vector<8x128xf32>
    %c167 = arith.constant 167 : index
    %668 = memref.load %arg1[%c167] : memref<305xf32, #tpu.memory_space<smem>>
    %669 = vector.broadcast %668 : f32 to vector<8x128xf32>
    %670 = arith.mulf %352, %669 : vector<8x128xf32>
    %671 = arith.addf %667, %670 : vector<8x128xf32>
    %c168 = arith.constant 168 : index
    %672 = memref.load %arg1[%c168] : memref<305xf32, #tpu.memory_space<smem>>
    %673 = vector.broadcast %672 : f32 to vector<8x128xf32>
    %674 = arith.mulf %388, %673 : vector<8x128xf32>
    %675 = arith.addf %671, %674 : vector<8x128xf32>
    %c169 = arith.constant 169 : index
    %676 = memref.load %arg1[%c169] : memref<305xf32, #tpu.memory_space<smem>>
    %677 = vector.broadcast %676 : f32 to vector<8x128xf32>
    %678 = arith.mulf %424, %677 : vector<8x128xf32>
    %679 = arith.addf %675, %678 : vector<8x128xf32>
    %c170 = arith.constant 170 : index
    %680 = memref.load %arg1[%c170] : memref<305xf32, #tpu.memory_space<smem>>
    %681 = vector.broadcast %680 : f32 to vector<8x128xf32>
    %682 = arith.mulf %460, %681 : vector<8x128xf32>
    %683 = arith.addf %679, %682 : vector<8x128xf32>
    %c171 = arith.constant 171 : index
    %684 = memref.load %arg1[%c171] : memref<305xf32, #tpu.memory_space<smem>>
    %685 = vector.broadcast %684 : f32 to vector<8x128xf32>
    %686 = arith.mulf %496, %685 : vector<8x128xf32>
    %687 = arith.addf %683, %686 : vector<8x128xf32>
    %c172 = arith.constant 172 : index
    %688 = memref.load %arg1[%c172] : memref<305xf32, #tpu.memory_space<smem>>
    %689 = vector.broadcast %688 : f32 to vector<8x128xf32>
    %690 = arith.mulf %532, %689 : vector<8x128xf32>
    %691 = arith.addf %687, %690 : vector<8x128xf32>
    %c173 = arith.constant 173 : index
    %692 = memref.load %arg1[%c173] : memref<305xf32, #tpu.memory_space<smem>>
    %693 = vector.broadcast %692 : f32 to vector<8x128xf32>
    %694 = arith.mulf %568, %693 : vector<8x128xf32>
    %695 = arith.addf %691, %694 : vector<8x128xf32>
    %c174 = arith.constant 174 : index
    %696 = memref.load %arg1[%c174] : memref<305xf32, #tpu.memory_space<smem>>
    %697 = vector.broadcast %696 : f32 to vector<8x128xf32>
    %698 = arith.mulf %604, %697 : vector<8x128xf32>
    %699 = arith.addf %695, %698 : vector<8x128xf32>
    %c175 = arith.constant 175 : index
    %700 = memref.load %arg1[%c175] : memref<305xf32, #tpu.memory_space<smem>>
    %701 = vector.broadcast %700 : f32 to vector<8x128xf32>
    %702 = arith.mulf %640, %701 : vector<8x128xf32>
    %703 = arith.addf %699, %702 : vector<8x128xf32>
    %c288 = arith.constant 288 : index
    %704 = memref.load %arg1[%c288] : memref<305xf32, #tpu.memory_space<smem>>
    %705 = vector.broadcast %704 : f32 to vector<8x128xf32>
    %706 = arith.addf %703, %705 : vector<8x128xf32>
    %cst_25 = arith.constant 0.000000e+00 : f32
    %707 = vector.broadcast %cst_25 : f32 to vector<8x128xf32>
    %708 = arith.maximumf %706, %707 : vector<8x128xf32>
    %c176 = arith.constant 176 : index
    %709 = memref.load %arg1[%c176] : memref<305xf32, #tpu.memory_space<smem>>
    %710 = vector.broadcast %709 : f32 to vector<8x128xf32>
    %711 = arith.mulf %100, %710 : vector<8x128xf32>
    %c177 = arith.constant 177 : index
    %712 = memref.load %arg1[%c177] : memref<305xf32, #tpu.memory_space<smem>>
    %713 = vector.broadcast %712 : f32 to vector<8x128xf32>
    %714 = arith.mulf %136, %713 : vector<8x128xf32>
    %715 = arith.addf %711, %714 : vector<8x128xf32>
    %c178 = arith.constant 178 : index
    %716 = memref.load %arg1[%c178] : memref<305xf32, #tpu.memory_space<smem>>
    %717 = vector.broadcast %716 : f32 to vector<8x128xf32>
    %718 = arith.mulf %172, %717 : vector<8x128xf32>
    %719 = arith.addf %715, %718 : vector<8x128xf32>
    %c179 = arith.constant 179 : index
    %720 = memref.load %arg1[%c179] : memref<305xf32, #tpu.memory_space<smem>>
    %721 = vector.broadcast %720 : f32 to vector<8x128xf32>
    %722 = arith.mulf %208, %721 : vector<8x128xf32>
    %723 = arith.addf %719, %722 : vector<8x128xf32>
    %c180 = arith.constant 180 : index
    %724 = memref.load %arg1[%c180] : memref<305xf32, #tpu.memory_space<smem>>
    %725 = vector.broadcast %724 : f32 to vector<8x128xf32>
    %726 = arith.mulf %244, %725 : vector<8x128xf32>
    %727 = arith.addf %723, %726 : vector<8x128xf32>
    %c181 = arith.constant 181 : index
    %728 = memref.load %arg1[%c181] : memref<305xf32, #tpu.memory_space<smem>>
    %729 = vector.broadcast %728 : f32 to vector<8x128xf32>
    %730 = arith.mulf %280, %729 : vector<8x128xf32>
    %731 = arith.addf %727, %730 : vector<8x128xf32>
    %c182 = arith.constant 182 : index
    %732 = memref.load %arg1[%c182] : memref<305xf32, #tpu.memory_space<smem>>
    %733 = vector.broadcast %732 : f32 to vector<8x128xf32>
    %734 = arith.mulf %316, %733 : vector<8x128xf32>
    %735 = arith.addf %731, %734 : vector<8x128xf32>
    %c183 = arith.constant 183 : index
    %736 = memref.load %arg1[%c183] : memref<305xf32, #tpu.memory_space<smem>>
    %737 = vector.broadcast %736 : f32 to vector<8x128xf32>
    %738 = arith.mulf %352, %737 : vector<8x128xf32>
    %739 = arith.addf %735, %738 : vector<8x128xf32>
    %c184 = arith.constant 184 : index
    %740 = memref.load %arg1[%c184] : memref<305xf32, #tpu.memory_space<smem>>
    %741 = vector.broadcast %740 : f32 to vector<8x128xf32>
    %742 = arith.mulf %388, %741 : vector<8x128xf32>
    %743 = arith.addf %739, %742 : vector<8x128xf32>
    %c185 = arith.constant 185 : index
    %744 = memref.load %arg1[%c185] : memref<305xf32, #tpu.memory_space<smem>>
    %745 = vector.broadcast %744 : f32 to vector<8x128xf32>
    %746 = arith.mulf %424, %745 : vector<8x128xf32>
    %747 = arith.addf %743, %746 : vector<8x128xf32>
    %c186 = arith.constant 186 : index
    %748 = memref.load %arg1[%c186] : memref<305xf32, #tpu.memory_space<smem>>
    %749 = vector.broadcast %748 : f32 to vector<8x128xf32>
    %750 = arith.mulf %460, %749 : vector<8x128xf32>
    %751 = arith.addf %747, %750 : vector<8x128xf32>
    %c187 = arith.constant 187 : index
    %752 = memref.load %arg1[%c187] : memref<305xf32, #tpu.memory_space<smem>>
    %753 = vector.broadcast %752 : f32 to vector<8x128xf32>
    %754 = arith.mulf %496, %753 : vector<8x128xf32>
    %755 = arith.addf %751, %754 : vector<8x128xf32>
    %c188 = arith.constant 188 : index
    %756 = memref.load %arg1[%c188] : memref<305xf32, #tpu.memory_space<smem>>
    %757 = vector.broadcast %756 : f32 to vector<8x128xf32>
    %758 = arith.mulf %532, %757 : vector<8x128xf32>
    %759 = arith.addf %755, %758 : vector<8x128xf32>
    %c189 = arith.constant 189 : index
    %760 = memref.load %arg1[%c189] : memref<305xf32, #tpu.memory_space<smem>>
    %761 = vector.broadcast %760 : f32 to vector<8x128xf32>
    %762 = arith.mulf %568, %761 : vector<8x128xf32>
    %763 = arith.addf %759, %762 : vector<8x128xf32>
    %c190 = arith.constant 190 : index
    %764 = memref.load %arg1[%c190] : memref<305xf32, #tpu.memory_space<smem>>
    %765 = vector.broadcast %764 : f32 to vector<8x128xf32>
    %766 = arith.mulf %604, %765 : vector<8x128xf32>
    %767 = arith.addf %763, %766 : vector<8x128xf32>
    %c191 = arith.constant 191 : index
    %768 = memref.load %arg1[%c191] : memref<305xf32, #tpu.memory_space<smem>>
    %769 = vector.broadcast %768 : f32 to vector<8x128xf32>
    %770 = arith.mulf %640, %769 : vector<8x128xf32>
    %771 = arith.addf %767, %770 : vector<8x128xf32>
    %c289 = arith.constant 289 : index
    %772 = memref.load %arg1[%c289] : memref<305xf32, #tpu.memory_space<smem>>
    %773 = vector.broadcast %772 : f32 to vector<8x128xf32>
    %774 = arith.addf %771, %773 : vector<8x128xf32>
    %cst_26 = arith.constant 0.000000e+00 : f32
    %775 = vector.broadcast %cst_26 : f32 to vector<8x128xf32>
    %776 = arith.maximumf %774, %775 : vector<8x128xf32>
    %c192 = arith.constant 192 : index
    %777 = memref.load %arg1[%c192] : memref<305xf32, #tpu.memory_space<smem>>
    %778 = vector.broadcast %777 : f32 to vector<8x128xf32>
    %779 = arith.mulf %100, %778 : vector<8x128xf32>
    %c193 = arith.constant 193 : index
    %780 = memref.load %arg1[%c193] : memref<305xf32, #tpu.memory_space<smem>>
    %781 = vector.broadcast %780 : f32 to vector<8x128xf32>
    %782 = arith.mulf %136, %781 : vector<8x128xf32>
    %783 = arith.addf %779, %782 : vector<8x128xf32>
    %c194 = arith.constant 194 : index
    %784 = memref.load %arg1[%c194] : memref<305xf32, #tpu.memory_space<smem>>
    %785 = vector.broadcast %784 : f32 to vector<8x128xf32>
    %786 = arith.mulf %172, %785 : vector<8x128xf32>
    %787 = arith.addf %783, %786 : vector<8x128xf32>
    %c195 = arith.constant 195 : index
    %788 = memref.load %arg1[%c195] : memref<305xf32, #tpu.memory_space<smem>>
    %789 = vector.broadcast %788 : f32 to vector<8x128xf32>
    %790 = arith.mulf %208, %789 : vector<8x128xf32>
    %791 = arith.addf %787, %790 : vector<8x128xf32>
    %c196 = arith.constant 196 : index
    %792 = memref.load %arg1[%c196] : memref<305xf32, #tpu.memory_space<smem>>
    %793 = vector.broadcast %792 : f32 to vector<8x128xf32>
    %794 = arith.mulf %244, %793 : vector<8x128xf32>
    %795 = arith.addf %791, %794 : vector<8x128xf32>
    %c197 = arith.constant 197 : index
    %796 = memref.load %arg1[%c197] : memref<305xf32, #tpu.memory_space<smem>>
    %797 = vector.broadcast %796 : f32 to vector<8x128xf32>
    %798 = arith.mulf %280, %797 : vector<8x128xf32>
    %799 = arith.addf %795, %798 : vector<8x128xf32>
    %c198 = arith.constant 198 : index
    %800 = memref.load %arg1[%c198] : memref<305xf32, #tpu.memory_space<smem>>
    %801 = vector.broadcast %800 : f32 to vector<8x128xf32>
    %802 = arith.mulf %316, %801 : vector<8x128xf32>
    %803 = arith.addf %799, %802 : vector<8x128xf32>
    %c199 = arith.constant 199 : index
    %804 = memref.load %arg1[%c199] : memref<305xf32, #tpu.memory_space<smem>>
    %805 = vector.broadcast %804 : f32 to vector<8x128xf32>
    %806 = arith.mulf %352, %805 : vector<8x128xf32>
    %807 = arith.addf %803, %806 : vector<8x128xf32>
    %c200 = arith.constant 200 : index
    %808 = memref.load %arg1[%c200] : memref<305xf32, #tpu.memory_space<smem>>
    %809 = vector.broadcast %808 : f32 to vector<8x128xf32>
    %810 = arith.mulf %388, %809 : vector<8x128xf32>
    %811 = arith.addf %807, %810 : vector<8x128xf32>
    %c201 = arith.constant 201 : index
    %812 = memref.load %arg1[%c201] : memref<305xf32, #tpu.memory_space<smem>>
    %813 = vector.broadcast %812 : f32 to vector<8x128xf32>
    %814 = arith.mulf %424, %813 : vector<8x128xf32>
    %815 = arith.addf %811, %814 : vector<8x128xf32>
    %c202 = arith.constant 202 : index
    %816 = memref.load %arg1[%c202] : memref<305xf32, #tpu.memory_space<smem>>
    %817 = vector.broadcast %816 : f32 to vector<8x128xf32>
    %818 = arith.mulf %460, %817 : vector<8x128xf32>
    %819 = arith.addf %815, %818 : vector<8x128xf32>
    %c203 = arith.constant 203 : index
    %820 = memref.load %arg1[%c203] : memref<305xf32, #tpu.memory_space<smem>>
    %821 = vector.broadcast %820 : f32 to vector<8x128xf32>
    %822 = arith.mulf %496, %821 : vector<8x128xf32>
    %823 = arith.addf %819, %822 : vector<8x128xf32>
    %c204 = arith.constant 204 : index
    %824 = memref.load %arg1[%c204] : memref<305xf32, #tpu.memory_space<smem>>
    %825 = vector.broadcast %824 : f32 to vector<8x128xf32>
    %826 = arith.mulf %532, %825 : vector<8x128xf32>
    %827 = arith.addf %823, %826 : vector<8x128xf32>
    %c205 = arith.constant 205 : index
    %828 = memref.load %arg1[%c205] : memref<305xf32, #tpu.memory_space<smem>>
    %829 = vector.broadcast %828 : f32 to vector<8x128xf32>
    %830 = arith.mulf %568, %829 : vector<8x128xf32>
    %831 = arith.addf %827, %830 : vector<8x128xf32>
    %c206 = arith.constant 206 : index
    %832 = memref.load %arg1[%c206] : memref<305xf32, #tpu.memory_space<smem>>
    %833 = vector.broadcast %832 : f32 to vector<8x128xf32>
    %834 = arith.mulf %604, %833 : vector<8x128xf32>
    %835 = arith.addf %831, %834 : vector<8x128xf32>
    %c207 = arith.constant 207 : index
    %836 = memref.load %arg1[%c207] : memref<305xf32, #tpu.memory_space<smem>>
    %837 = vector.broadcast %836 : f32 to vector<8x128xf32>
    %838 = arith.mulf %640, %837 : vector<8x128xf32>
    %839 = arith.addf %835, %838 : vector<8x128xf32>
    %c290 = arith.constant 290 : index
    %840 = memref.load %arg1[%c290] : memref<305xf32, #tpu.memory_space<smem>>
    %841 = vector.broadcast %840 : f32 to vector<8x128xf32>
    %842 = arith.addf %839, %841 : vector<8x128xf32>
    %cst_27 = arith.constant 0.000000e+00 : f32
    %843 = vector.broadcast %cst_27 : f32 to vector<8x128xf32>
    %844 = arith.maximumf %842, %843 : vector<8x128xf32>
    %c208 = arith.constant 208 : index
    %845 = memref.load %arg1[%c208] : memref<305xf32, #tpu.memory_space<smem>>
    %846 = vector.broadcast %845 : f32 to vector<8x128xf32>
    %847 = arith.mulf %100, %846 : vector<8x128xf32>
    %c209 = arith.constant 209 : index
    %848 = memref.load %arg1[%c209] : memref<305xf32, #tpu.memory_space<smem>>
    %849 = vector.broadcast %848 : f32 to vector<8x128xf32>
    %850 = arith.mulf %136, %849 : vector<8x128xf32>
    %851 = arith.addf %847, %850 : vector<8x128xf32>
    %c210 = arith.constant 210 : index
    %852 = memref.load %arg1[%c210] : memref<305xf32, #tpu.memory_space<smem>>
    %853 = vector.broadcast %852 : f32 to vector<8x128xf32>
    %854 = arith.mulf %172, %853 : vector<8x128xf32>
    %855 = arith.addf %851, %854 : vector<8x128xf32>
    %c211 = arith.constant 211 : index
    %856 = memref.load %arg1[%c211] : memref<305xf32, #tpu.memory_space<smem>>
    %857 = vector.broadcast %856 : f32 to vector<8x128xf32>
    %858 = arith.mulf %208, %857 : vector<8x128xf32>
    %859 = arith.addf %855, %858 : vector<8x128xf32>
    %c212 = arith.constant 212 : index
    %860 = memref.load %arg1[%c212] : memref<305xf32, #tpu.memory_space<smem>>
    %861 = vector.broadcast %860 : f32 to vector<8x128xf32>
    %862 = arith.mulf %244, %861 : vector<8x128xf32>
    %863 = arith.addf %859, %862 : vector<8x128xf32>
    %c213 = arith.constant 213 : index
    %864 = memref.load %arg1[%c213] : memref<305xf32, #tpu.memory_space<smem>>
    %865 = vector.broadcast %864 : f32 to vector<8x128xf32>
    %866 = arith.mulf %280, %865 : vector<8x128xf32>
    %867 = arith.addf %863, %866 : vector<8x128xf32>
    %c214 = arith.constant 214 : index
    %868 = memref.load %arg1[%c214] : memref<305xf32, #tpu.memory_space<smem>>
    %869 = vector.broadcast %868 : f32 to vector<8x128xf32>
    %870 = arith.mulf %316, %869 : vector<8x128xf32>
    %871 = arith.addf %867, %870 : vector<8x128xf32>
    %c215 = arith.constant 215 : index
    %872 = memref.load %arg1[%c215] : memref<305xf32, #tpu.memory_space<smem>>
    %873 = vector.broadcast %872 : f32 to vector<8x128xf32>
    %874 = arith.mulf %352, %873 : vector<8x128xf32>
    %875 = arith.addf %871, %874 : vector<8x128xf32>
    %c216 = arith.constant 216 : index
    %876 = memref.load %arg1[%c216] : memref<305xf32, #tpu.memory_space<smem>>
    %877 = vector.broadcast %876 : f32 to vector<8x128xf32>
    %878 = arith.mulf %388, %877 : vector<8x128xf32>
    %879 = arith.addf %875, %878 : vector<8x128xf32>
    %c217 = arith.constant 217 : index
    %880 = memref.load %arg1[%c217] : memref<305xf32, #tpu.memory_space<smem>>
    %881 = vector.broadcast %880 : f32 to vector<8x128xf32>
    %882 = arith.mulf %424, %881 : vector<8x128xf32>
    %883 = arith.addf %879, %882 : vector<8x128xf32>
    %c218 = arith.constant 218 : index
    %884 = memref.load %arg1[%c218] : memref<305xf32, #tpu.memory_space<smem>>
    %885 = vector.broadcast %884 : f32 to vector<8x128xf32>
    %886 = arith.mulf %460, %885 : vector<8x128xf32>
    %887 = arith.addf %883, %886 : vector<8x128xf32>
    %c219 = arith.constant 219 : index
    %888 = memref.load %arg1[%c219] : memref<305xf32, #tpu.memory_space<smem>>
    %889 = vector.broadcast %888 : f32 to vector<8x128xf32>
    %890 = arith.mulf %496, %889 : vector<8x128xf32>
    %891 = arith.addf %887, %890 : vector<8x128xf32>
    %c220 = arith.constant 220 : index
    %892 = memref.load %arg1[%c220] : memref<305xf32, #tpu.memory_space<smem>>
    %893 = vector.broadcast %892 : f32 to vector<8x128xf32>
    %894 = arith.mulf %532, %893 : vector<8x128xf32>
    %895 = arith.addf %891, %894 : vector<8x128xf32>
    %c221 = arith.constant 221 : index
    %896 = memref.load %arg1[%c221] : memref<305xf32, #tpu.memory_space<smem>>
    %897 = vector.broadcast %896 : f32 to vector<8x128xf32>
    %898 = arith.mulf %568, %897 : vector<8x128xf32>
    %899 = arith.addf %895, %898 : vector<8x128xf32>
    %c222 = arith.constant 222 : index
    %900 = memref.load %arg1[%c222] : memref<305xf32, #tpu.memory_space<smem>>
    %901 = vector.broadcast %900 : f32 to vector<8x128xf32>
    %902 = arith.mulf %604, %901 : vector<8x128xf32>
    %903 = arith.addf %899, %902 : vector<8x128xf32>
    %c223 = arith.constant 223 : index
    %904 = memref.load %arg1[%c223] : memref<305xf32, #tpu.memory_space<smem>>
    %905 = vector.broadcast %904 : f32 to vector<8x128xf32>
    %906 = arith.mulf %640, %905 : vector<8x128xf32>
    %907 = arith.addf %903, %906 : vector<8x128xf32>
    %c291 = arith.constant 291 : index
    %908 = memref.load %arg1[%c291] : memref<305xf32, #tpu.memory_space<smem>>
    %909 = vector.broadcast %908 : f32 to vector<8x128xf32>
    %910 = arith.addf %907, %909 : vector<8x128xf32>
    %cst_28 = arith.constant 0.000000e+00 : f32
    %911 = vector.broadcast %cst_28 : f32 to vector<8x128xf32>
    %912 = arith.maximumf %910, %911 : vector<8x128xf32>
    %c224 = arith.constant 224 : index
    %913 = memref.load %arg1[%c224] : memref<305xf32, #tpu.memory_space<smem>>
    %914 = vector.broadcast %913 : f32 to vector<8x128xf32>
    %915 = arith.mulf %100, %914 : vector<8x128xf32>
    %c225 = arith.constant 225 : index
    %916 = memref.load %arg1[%c225] : memref<305xf32, #tpu.memory_space<smem>>
    %917 = vector.broadcast %916 : f32 to vector<8x128xf32>
    %918 = arith.mulf %136, %917 : vector<8x128xf32>
    %919 = arith.addf %915, %918 : vector<8x128xf32>
    %c226 = arith.constant 226 : index
    %920 = memref.load %arg1[%c226] : memref<305xf32, #tpu.memory_space<smem>>
    %921 = vector.broadcast %920 : f32 to vector<8x128xf32>
    %922 = arith.mulf %172, %921 : vector<8x128xf32>
    %923 = arith.addf %919, %922 : vector<8x128xf32>
    %c227 = arith.constant 227 : index
    %924 = memref.load %arg1[%c227] : memref<305xf32, #tpu.memory_space<smem>>
    %925 = vector.broadcast %924 : f32 to vector<8x128xf32>
    %926 = arith.mulf %208, %925 : vector<8x128xf32>
    %927 = arith.addf %923, %926 : vector<8x128xf32>
    %c228 = arith.constant 228 : index
    %928 = memref.load %arg1[%c228] : memref<305xf32, #tpu.memory_space<smem>>
    %929 = vector.broadcast %928 : f32 to vector<8x128xf32>
    %930 = arith.mulf %244, %929 : vector<8x128xf32>
    %931 = arith.addf %927, %930 : vector<8x128xf32>
    %c229 = arith.constant 229 : index
    %932 = memref.load %arg1[%c229] : memref<305xf32, #tpu.memory_space<smem>>
    %933 = vector.broadcast %932 : f32 to vector<8x128xf32>
    %934 = arith.mulf %280, %933 : vector<8x128xf32>
    %935 = arith.addf %931, %934 : vector<8x128xf32>
    %c230 = arith.constant 230 : index
    %936 = memref.load %arg1[%c230] : memref<305xf32, #tpu.memory_space<smem>>
    %937 = vector.broadcast %936 : f32 to vector<8x128xf32>
    %938 = arith.mulf %316, %937 : vector<8x128xf32>
    %939 = arith.addf %935, %938 : vector<8x128xf32>
    %c231 = arith.constant 231 : index
    %940 = memref.load %arg1[%c231] : memref<305xf32, #tpu.memory_space<smem>>
    %941 = vector.broadcast %940 : f32 to vector<8x128xf32>
    %942 = arith.mulf %352, %941 : vector<8x128xf32>
    %943 = arith.addf %939, %942 : vector<8x128xf32>
    %c232 = arith.constant 232 : index
    %944 = memref.load %arg1[%c232] : memref<305xf32, #tpu.memory_space<smem>>
    %945 = vector.broadcast %944 : f32 to vector<8x128xf32>
    %946 = arith.mulf %388, %945 : vector<8x128xf32>
    %947 = arith.addf %943, %946 : vector<8x128xf32>
    %c233 = arith.constant 233 : index
    %948 = memref.load %arg1[%c233] : memref<305xf32, #tpu.memory_space<smem>>
    %949 = vector.broadcast %948 : f32 to vector<8x128xf32>
    %950 = arith.mulf %424, %949 : vector<8x128xf32>
    %951 = arith.addf %947, %950 : vector<8x128xf32>
    %c234 = arith.constant 234 : index
    %952 = memref.load %arg1[%c234] : memref<305xf32, #tpu.memory_space<smem>>
    %953 = vector.broadcast %952 : f32 to vector<8x128xf32>
    %954 = arith.mulf %460, %953 : vector<8x128xf32>
    %955 = arith.addf %951, %954 : vector<8x128xf32>
    %c235 = arith.constant 235 : index
    %956 = memref.load %arg1[%c235] : memref<305xf32, #tpu.memory_space<smem>>
    %957 = vector.broadcast %956 : f32 to vector<8x128xf32>
    %958 = arith.mulf %496, %957 : vector<8x128xf32>
    %959 = arith.addf %955, %958 : vector<8x128xf32>
    %c236 = arith.constant 236 : index
    %960 = memref.load %arg1[%c236] : memref<305xf32, #tpu.memory_space<smem>>
    %961 = vector.broadcast %960 : f32 to vector<8x128xf32>
    %962 = arith.mulf %532, %961 : vector<8x128xf32>
    %963 = arith.addf %959, %962 : vector<8x128xf32>
    %c237 = arith.constant 237 : index
    %964 = memref.load %arg1[%c237] : memref<305xf32, #tpu.memory_space<smem>>
    %965 = vector.broadcast %964 : f32 to vector<8x128xf32>
    %966 = arith.mulf %568, %965 : vector<8x128xf32>
    %967 = arith.addf %963, %966 : vector<8x128xf32>
    %c238 = arith.constant 238 : index
    %968 = memref.load %arg1[%c238] : memref<305xf32, #tpu.memory_space<smem>>
    %969 = vector.broadcast %968 : f32 to vector<8x128xf32>
    %970 = arith.mulf %604, %969 : vector<8x128xf32>
    %971 = arith.addf %967, %970 : vector<8x128xf32>
    %c239 = arith.constant 239 : index
    %972 = memref.load %arg1[%c239] : memref<305xf32, #tpu.memory_space<smem>>
    %973 = vector.broadcast %972 : f32 to vector<8x128xf32>
    %974 = arith.mulf %640, %973 : vector<8x128xf32>
    %975 = arith.addf %971, %974 : vector<8x128xf32>
    %c292 = arith.constant 292 : index
    %976 = memref.load %arg1[%c292] : memref<305xf32, #tpu.memory_space<smem>>
    %977 = vector.broadcast %976 : f32 to vector<8x128xf32>
    %978 = arith.addf %975, %977 : vector<8x128xf32>
    %cst_29 = arith.constant 0.000000e+00 : f32
    %979 = vector.broadcast %cst_29 : f32 to vector<8x128xf32>
    %980 = arith.maximumf %978, %979 : vector<8x128xf32>
    %c240 = arith.constant 240 : index
    %981 = memref.load %arg1[%c240] : memref<305xf32, #tpu.memory_space<smem>>
    %982 = vector.broadcast %981 : f32 to vector<8x128xf32>
    %983 = arith.mulf %100, %982 : vector<8x128xf32>
    %c241 = arith.constant 241 : index
    %984 = memref.load %arg1[%c241] : memref<305xf32, #tpu.memory_space<smem>>
    %985 = vector.broadcast %984 : f32 to vector<8x128xf32>
    %986 = arith.mulf %136, %985 : vector<8x128xf32>
    %987 = arith.addf %983, %986 : vector<8x128xf32>
    %c242 = arith.constant 242 : index
    %988 = memref.load %arg1[%c242] : memref<305xf32, #tpu.memory_space<smem>>
    %989 = vector.broadcast %988 : f32 to vector<8x128xf32>
    %990 = arith.mulf %172, %989 : vector<8x128xf32>
    %991 = arith.addf %987, %990 : vector<8x128xf32>
    %c243 = arith.constant 243 : index
    %992 = memref.load %arg1[%c243] : memref<305xf32, #tpu.memory_space<smem>>
    %993 = vector.broadcast %992 : f32 to vector<8x128xf32>
    %994 = arith.mulf %208, %993 : vector<8x128xf32>
    %995 = arith.addf %991, %994 : vector<8x128xf32>
    %c244 = arith.constant 244 : index
    %996 = memref.load %arg1[%c244] : memref<305xf32, #tpu.memory_space<smem>>
    %997 = vector.broadcast %996 : f32 to vector<8x128xf32>
    %998 = arith.mulf %244, %997 : vector<8x128xf32>
    %999 = arith.addf %995, %998 : vector<8x128xf32>
    %c245 = arith.constant 245 : index
    %1000 = memref.load %arg1[%c245] : memref<305xf32, #tpu.memory_space<smem>>
    %1001 = vector.broadcast %1000 : f32 to vector<8x128xf32>
    %1002 = arith.mulf %280, %1001 : vector<8x128xf32>
    %1003 = arith.addf %999, %1002 : vector<8x128xf32>
    %c246 = arith.constant 246 : index
    %1004 = memref.load %arg1[%c246] : memref<305xf32, #tpu.memory_space<smem>>
    %1005 = vector.broadcast %1004 : f32 to vector<8x128xf32>
    %1006 = arith.mulf %316, %1005 : vector<8x128xf32>
    %1007 = arith.addf %1003, %1006 : vector<8x128xf32>
    %c247 = arith.constant 247 : index
    %1008 = memref.load %arg1[%c247] : memref<305xf32, #tpu.memory_space<smem>>
    %1009 = vector.broadcast %1008 : f32 to vector<8x128xf32>
    %1010 = arith.mulf %352, %1009 : vector<8x128xf32>
    %1011 = arith.addf %1007, %1010 : vector<8x128xf32>
    %c248 = arith.constant 248 : index
    %1012 = memref.load %arg1[%c248] : memref<305xf32, #tpu.memory_space<smem>>
    %1013 = vector.broadcast %1012 : f32 to vector<8x128xf32>
    %1014 = arith.mulf %388, %1013 : vector<8x128xf32>
    %1015 = arith.addf %1011, %1014 : vector<8x128xf32>
    %c249 = arith.constant 249 : index
    %1016 = memref.load %arg1[%c249] : memref<305xf32, #tpu.memory_space<smem>>
    %1017 = vector.broadcast %1016 : f32 to vector<8x128xf32>
    %1018 = arith.mulf %424, %1017 : vector<8x128xf32>
    %1019 = arith.addf %1015, %1018 : vector<8x128xf32>
    %c250 = arith.constant 250 : index
    %1020 = memref.load %arg1[%c250] : memref<305xf32, #tpu.memory_space<smem>>
    %1021 = vector.broadcast %1020 : f32 to vector<8x128xf32>
    %1022 = arith.mulf %460, %1021 : vector<8x128xf32>
    %1023 = arith.addf %1019, %1022 : vector<8x128xf32>
    %c251 = arith.constant 251 : index
    %1024 = memref.load %arg1[%c251] : memref<305xf32, #tpu.memory_space<smem>>
    %1025 = vector.broadcast %1024 : f32 to vector<8x128xf32>
    %1026 = arith.mulf %496, %1025 : vector<8x128xf32>
    %1027 = arith.addf %1023, %1026 : vector<8x128xf32>
    %c252 = arith.constant 252 : index
    %1028 = memref.load %arg1[%c252] : memref<305xf32, #tpu.memory_space<smem>>
    %1029 = vector.broadcast %1028 : f32 to vector<8x128xf32>
    %1030 = arith.mulf %532, %1029 : vector<8x128xf32>
    %1031 = arith.addf %1027, %1030 : vector<8x128xf32>
    %c253 = arith.constant 253 : index
    %1032 = memref.load %arg1[%c253] : memref<305xf32, #tpu.memory_space<smem>>
    %1033 = vector.broadcast %1032 : f32 to vector<8x128xf32>
    %1034 = arith.mulf %568, %1033 : vector<8x128xf32>
    %1035 = arith.addf %1031, %1034 : vector<8x128xf32>
    %c254 = arith.constant 254 : index
    %1036 = memref.load %arg1[%c254] : memref<305xf32, #tpu.memory_space<smem>>
    %1037 = vector.broadcast %1036 : f32 to vector<8x128xf32>
    %1038 = arith.mulf %604, %1037 : vector<8x128xf32>
    %1039 = arith.addf %1035, %1038 : vector<8x128xf32>
    %c255 = arith.constant 255 : index
    %1040 = memref.load %arg1[%c255] : memref<305xf32, #tpu.memory_space<smem>>
    %1041 = vector.broadcast %1040 : f32 to vector<8x128xf32>
    %1042 = arith.mulf %640, %1041 : vector<8x128xf32>
    %1043 = arith.addf %1039, %1042 : vector<8x128xf32>
    %c293 = arith.constant 293 : index
    %1044 = memref.load %arg1[%c293] : memref<305xf32, #tpu.memory_space<smem>>
    %1045 = vector.broadcast %1044 : f32 to vector<8x128xf32>
    %1046 = arith.addf %1043, %1045 : vector<8x128xf32>
    %cst_30 = arith.constant 0.000000e+00 : f32
    %1047 = vector.broadcast %cst_30 : f32 to vector<8x128xf32>
    %1048 = arith.maximumf %1046, %1047 : vector<8x128xf32>
    %c256 = arith.constant 256 : index
    %1049 = memref.load %arg1[%c256] : memref<305xf32, #tpu.memory_space<smem>>
    %1050 = vector.broadcast %1049 : f32 to vector<8x128xf32>
    %1051 = arith.mulf %100, %1050 : vector<8x128xf32>
    %c257 = arith.constant 257 : index
    %1052 = memref.load %arg1[%c257] : memref<305xf32, #tpu.memory_space<smem>>
    %1053 = vector.broadcast %1052 : f32 to vector<8x128xf32>
    %1054 = arith.mulf %136, %1053 : vector<8x128xf32>
    %1055 = arith.addf %1051, %1054 : vector<8x128xf32>
    %c258 = arith.constant 258 : index
    %1056 = memref.load %arg1[%c258] : memref<305xf32, #tpu.memory_space<smem>>
    %1057 = vector.broadcast %1056 : f32 to vector<8x128xf32>
    %1058 = arith.mulf %172, %1057 : vector<8x128xf32>
    %1059 = arith.addf %1055, %1058 : vector<8x128xf32>
    %c259 = arith.constant 259 : index
    %1060 = memref.load %arg1[%c259] : memref<305xf32, #tpu.memory_space<smem>>
    %1061 = vector.broadcast %1060 : f32 to vector<8x128xf32>
    %1062 = arith.mulf %208, %1061 : vector<8x128xf32>
    %1063 = arith.addf %1059, %1062 : vector<8x128xf32>
    %c260 = arith.constant 260 : index
    %1064 = memref.load %arg1[%c260] : memref<305xf32, #tpu.memory_space<smem>>
    %1065 = vector.broadcast %1064 : f32 to vector<8x128xf32>
    %1066 = arith.mulf %244, %1065 : vector<8x128xf32>
    %1067 = arith.addf %1063, %1066 : vector<8x128xf32>
    %c261 = arith.constant 261 : index
    %1068 = memref.load %arg1[%c261] : memref<305xf32, #tpu.memory_space<smem>>
    %1069 = vector.broadcast %1068 : f32 to vector<8x128xf32>
    %1070 = arith.mulf %280, %1069 : vector<8x128xf32>
    %1071 = arith.addf %1067, %1070 : vector<8x128xf32>
    %c262 = arith.constant 262 : index
    %1072 = memref.load %arg1[%c262] : memref<305xf32, #tpu.memory_space<smem>>
    %1073 = vector.broadcast %1072 : f32 to vector<8x128xf32>
    %1074 = arith.mulf %316, %1073 : vector<8x128xf32>
    %1075 = arith.addf %1071, %1074 : vector<8x128xf32>
    %c263 = arith.constant 263 : index
    %1076 = memref.load %arg1[%c263] : memref<305xf32, #tpu.memory_space<smem>>
    %1077 = vector.broadcast %1076 : f32 to vector<8x128xf32>
    %1078 = arith.mulf %352, %1077 : vector<8x128xf32>
    %1079 = arith.addf %1075, %1078 : vector<8x128xf32>
    %c264 = arith.constant 264 : index
    %1080 = memref.load %arg1[%c264] : memref<305xf32, #tpu.memory_space<smem>>
    %1081 = vector.broadcast %1080 : f32 to vector<8x128xf32>
    %1082 = arith.mulf %388, %1081 : vector<8x128xf32>
    %1083 = arith.addf %1079, %1082 : vector<8x128xf32>
    %c265 = arith.constant 265 : index
    %1084 = memref.load %arg1[%c265] : memref<305xf32, #tpu.memory_space<smem>>
    %1085 = vector.broadcast %1084 : f32 to vector<8x128xf32>
    %1086 = arith.mulf %424, %1085 : vector<8x128xf32>
    %1087 = arith.addf %1083, %1086 : vector<8x128xf32>
    %c266 = arith.constant 266 : index
    %1088 = memref.load %arg1[%c266] : memref<305xf32, #tpu.memory_space<smem>>
    %1089 = vector.broadcast %1088 : f32 to vector<8x128xf32>
    %1090 = arith.mulf %460, %1089 : vector<8x128xf32>
    %1091 = arith.addf %1087, %1090 : vector<8x128xf32>
    %c267 = arith.constant 267 : index
    %1092 = memref.load %arg1[%c267] : memref<305xf32, #tpu.memory_space<smem>>
    %1093 = vector.broadcast %1092 : f32 to vector<8x128xf32>
    %1094 = arith.mulf %496, %1093 : vector<8x128xf32>
    %1095 = arith.addf %1091, %1094 : vector<8x128xf32>
    %c268 = arith.constant 268 : index
    %1096 = memref.load %arg1[%c268] : memref<305xf32, #tpu.memory_space<smem>>
    %1097 = vector.broadcast %1096 : f32 to vector<8x128xf32>
    %1098 = arith.mulf %532, %1097 : vector<8x128xf32>
    %1099 = arith.addf %1095, %1098 : vector<8x128xf32>
    %c269 = arith.constant 269 : index
    %1100 = memref.load %arg1[%c269] : memref<305xf32, #tpu.memory_space<smem>>
    %1101 = vector.broadcast %1100 : f32 to vector<8x128xf32>
    %1102 = arith.mulf %568, %1101 : vector<8x128xf32>
    %1103 = arith.addf %1099, %1102 : vector<8x128xf32>
    %c270 = arith.constant 270 : index
    %1104 = memref.load %arg1[%c270] : memref<305xf32, #tpu.memory_space<smem>>
    %1105 = vector.broadcast %1104 : f32 to vector<8x128xf32>
    %1106 = arith.mulf %604, %1105 : vector<8x128xf32>
    %1107 = arith.addf %1103, %1106 : vector<8x128xf32>
    %c271 = arith.constant 271 : index
    %1108 = memref.load %arg1[%c271] : memref<305xf32, #tpu.memory_space<smem>>
    %1109 = vector.broadcast %1108 : f32 to vector<8x128xf32>
    %1110 = arith.mulf %640, %1109 : vector<8x128xf32>
    %1111 = arith.addf %1107, %1110 : vector<8x128xf32>
    %c294 = arith.constant 294 : index
    %1112 = memref.load %arg1[%c294] : memref<305xf32, #tpu.memory_space<smem>>
    %1113 = vector.broadcast %1112 : f32 to vector<8x128xf32>
    %1114 = arith.addf %1111, %1113 : vector<8x128xf32>
    %cst_31 = arith.constant 0.000000e+00 : f32
    %1115 = vector.broadcast %cst_31 : f32 to vector<8x128xf32>
    %1116 = arith.maximumf %1114, %1115 : vector<8x128xf32>
    %c272 = arith.constant 272 : index
    %1117 = memref.load %arg1[%c272] : memref<305xf32, #tpu.memory_space<smem>>
    %1118 = vector.broadcast %1117 : f32 to vector<8x128xf32>
    %1119 = arith.mulf %100, %1118 : vector<8x128xf32>
    %c273 = arith.constant 273 : index
    %1120 = memref.load %arg1[%c273] : memref<305xf32, #tpu.memory_space<smem>>
    %1121 = vector.broadcast %1120 : f32 to vector<8x128xf32>
    %1122 = arith.mulf %136, %1121 : vector<8x128xf32>
    %1123 = arith.addf %1119, %1122 : vector<8x128xf32>
    %c274 = arith.constant 274 : index
    %1124 = memref.load %arg1[%c274] : memref<305xf32, #tpu.memory_space<smem>>
    %1125 = vector.broadcast %1124 : f32 to vector<8x128xf32>
    %1126 = arith.mulf %172, %1125 : vector<8x128xf32>
    %1127 = arith.addf %1123, %1126 : vector<8x128xf32>
    %c275 = arith.constant 275 : index
    %1128 = memref.load %arg1[%c275] : memref<305xf32, #tpu.memory_space<smem>>
    %1129 = vector.broadcast %1128 : f32 to vector<8x128xf32>
    %1130 = arith.mulf %208, %1129 : vector<8x128xf32>
    %1131 = arith.addf %1127, %1130 : vector<8x128xf32>
    %c276 = arith.constant 276 : index
    %1132 = memref.load %arg1[%c276] : memref<305xf32, #tpu.memory_space<smem>>
    %1133 = vector.broadcast %1132 : f32 to vector<8x128xf32>
    %1134 = arith.mulf %244, %1133 : vector<8x128xf32>
    %1135 = arith.addf %1131, %1134 : vector<8x128xf32>
    %c277 = arith.constant 277 : index
    %1136 = memref.load %arg1[%c277] : memref<305xf32, #tpu.memory_space<smem>>
    %1137 = vector.broadcast %1136 : f32 to vector<8x128xf32>
    %1138 = arith.mulf %280, %1137 : vector<8x128xf32>
    %1139 = arith.addf %1135, %1138 : vector<8x128xf32>
    %c278 = arith.constant 278 : index
    %1140 = memref.load %arg1[%c278] : memref<305xf32, #tpu.memory_space<smem>>
    %1141 = vector.broadcast %1140 : f32 to vector<8x128xf32>
    %1142 = arith.mulf %316, %1141 : vector<8x128xf32>
    %1143 = arith.addf %1139, %1142 : vector<8x128xf32>
    %c279 = arith.constant 279 : index
    %1144 = memref.load %arg1[%c279] : memref<305xf32, #tpu.memory_space<smem>>
    %1145 = vector.broadcast %1144 : f32 to vector<8x128xf32>
    %1146 = arith.mulf %352, %1145 : vector<8x128xf32>
    %1147 = arith.addf %1143, %1146 : vector<8x128xf32>
    %c280 = arith.constant 280 : index
    %1148 = memref.load %arg1[%c280] : memref<305xf32, #tpu.memory_space<smem>>
    %1149 = vector.broadcast %1148 : f32 to vector<8x128xf32>
    %1150 = arith.mulf %388, %1149 : vector<8x128xf32>
    %1151 = arith.addf %1147, %1150 : vector<8x128xf32>
    %c281 = arith.constant 281 : index
    %1152 = memref.load %arg1[%c281] : memref<305xf32, #tpu.memory_space<smem>>
    %1153 = vector.broadcast %1152 : f32 to vector<8x128xf32>
    %1154 = arith.mulf %424, %1153 : vector<8x128xf32>
    %1155 = arith.addf %1151, %1154 : vector<8x128xf32>
    %c282 = arith.constant 282 : index
    %1156 = memref.load %arg1[%c282] : memref<305xf32, #tpu.memory_space<smem>>
    %1157 = vector.broadcast %1156 : f32 to vector<8x128xf32>
    %1158 = arith.mulf %460, %1157 : vector<8x128xf32>
    %1159 = arith.addf %1155, %1158 : vector<8x128xf32>
    %c283 = arith.constant 283 : index
    %1160 = memref.load %arg1[%c283] : memref<305xf32, #tpu.memory_space<smem>>
    %1161 = vector.broadcast %1160 : f32 to vector<8x128xf32>
    %1162 = arith.mulf %496, %1161 : vector<8x128xf32>
    %1163 = arith.addf %1159, %1162 : vector<8x128xf32>
    %c284 = arith.constant 284 : index
    %1164 = memref.load %arg1[%c284] : memref<305xf32, #tpu.memory_space<smem>>
    %1165 = vector.broadcast %1164 : f32 to vector<8x128xf32>
    %1166 = arith.mulf %532, %1165 : vector<8x128xf32>
    %1167 = arith.addf %1163, %1166 : vector<8x128xf32>
    %c285 = arith.constant 285 : index
    %1168 = memref.load %arg1[%c285] : memref<305xf32, #tpu.memory_space<smem>>
    %1169 = vector.broadcast %1168 : f32 to vector<8x128xf32>
    %1170 = arith.mulf %568, %1169 : vector<8x128xf32>
    %1171 = arith.addf %1167, %1170 : vector<8x128xf32>
    %c286 = arith.constant 286 : index
    %1172 = memref.load %arg1[%c286] : memref<305xf32, #tpu.memory_space<smem>>
    %1173 = vector.broadcast %1172 : f32 to vector<8x128xf32>
    %1174 = arith.mulf %604, %1173 : vector<8x128xf32>
    %1175 = arith.addf %1171, %1174 : vector<8x128xf32>
    %c287 = arith.constant 287 : index
    %1176 = memref.load %arg1[%c287] : memref<305xf32, #tpu.memory_space<smem>>
    %1177 = vector.broadcast %1176 : f32 to vector<8x128xf32>
    %1178 = arith.mulf %640, %1177 : vector<8x128xf32>
    %1179 = arith.addf %1175, %1178 : vector<8x128xf32>
    %c295 = arith.constant 295 : index
    %1180 = memref.load %arg1[%c295] : memref<305xf32, #tpu.memory_space<smem>>
    %1181 = vector.broadcast %1180 : f32 to vector<8x128xf32>
    %1182 = arith.addf %1179, %1181 : vector<8x128xf32>
    %cst_32 = arith.constant 0.000000e+00 : f32
    %1183 = vector.broadcast %cst_32 : f32 to vector<8x128xf32>
    %1184 = arith.maximumf %1182, %1183 : vector<8x128xf32>
    %c296 = arith.constant 296 : index
    %1185 = memref.load %arg1[%c296] : memref<305xf32, #tpu.memory_space<smem>>
    %1186 = vector.broadcast %1185 : f32 to vector<8x128xf32>
    %1187 = arith.mulf %708, %1186 : vector<8x128xf32>
    %c297 = arith.constant 297 : index
    %1188 = memref.load %arg1[%c297] : memref<305xf32, #tpu.memory_space<smem>>
    %1189 = vector.broadcast %1188 : f32 to vector<8x128xf32>
    %1190 = arith.mulf %776, %1189 : vector<8x128xf32>
    %1191 = arith.addf %1187, %1190 : vector<8x128xf32>
    %c298 = arith.constant 298 : index
    %1192 = memref.load %arg1[%c298] : memref<305xf32, #tpu.memory_space<smem>>
    %1193 = vector.broadcast %1192 : f32 to vector<8x128xf32>
    %1194 = arith.mulf %844, %1193 : vector<8x128xf32>
    %1195 = arith.addf %1191, %1194 : vector<8x128xf32>
    %c299 = arith.constant 299 : index
    %1196 = memref.load %arg1[%c299] : memref<305xf32, #tpu.memory_space<smem>>
    %1197 = vector.broadcast %1196 : f32 to vector<8x128xf32>
    %1198 = arith.mulf %912, %1197 : vector<8x128xf32>
    %1199 = arith.addf %1195, %1198 : vector<8x128xf32>
    %c300 = arith.constant 300 : index
    %1200 = memref.load %arg1[%c300] : memref<305xf32, #tpu.memory_space<smem>>
    %1201 = vector.broadcast %1200 : f32 to vector<8x128xf32>
    %1202 = arith.mulf %980, %1201 : vector<8x128xf32>
    %1203 = arith.addf %1199, %1202 : vector<8x128xf32>
    %c301 = arith.constant 301 : index
    %1204 = memref.load %arg1[%c301] : memref<305xf32, #tpu.memory_space<smem>>
    %1205 = vector.broadcast %1204 : f32 to vector<8x128xf32>
    %1206 = arith.mulf %1048, %1205 : vector<8x128xf32>
    %1207 = arith.addf %1203, %1206 : vector<8x128xf32>
    %c302 = arith.constant 302 : index
    %1208 = memref.load %arg1[%c302] : memref<305xf32, #tpu.memory_space<smem>>
    %1209 = vector.broadcast %1208 : f32 to vector<8x128xf32>
    %1210 = arith.mulf %1116, %1209 : vector<8x128xf32>
    %1211 = arith.addf %1207, %1210 : vector<8x128xf32>
    %c303 = arith.constant 303 : index
    %1212 = memref.load %arg1[%c303] : memref<305xf32, #tpu.memory_space<smem>>
    %1213 = vector.broadcast %1212 : f32 to vector<8x128xf32>
    %1214 = arith.mulf %1184, %1213 : vector<8x128xf32>
    %1215 = arith.addf %1211, %1214 : vector<8x128xf32>
    %c304 = arith.constant 304 : index
    %1216 = memref.load %arg1[%c304] : memref<305xf32, #tpu.memory_space<smem>>
    %1217 = vector.broadcast %1216 : f32 to vector<8x128xf32>
    %1218 = arith.addf %1215, %1217 : vector<8x128xf32>
    %1219 = math.tanh %1218 : vector<8x128xf32>
    %cst_33 = arith.constant 6.28318548 : f32
    %1220 = vector.broadcast %cst_33 : f32 to vector<8x128xf32>
    %1221 = arith.mulf %1220, %1219 : vector<8x128xf32>
    %c0_34 = arith.constant 0 : index
    %c0_35 = arith.constant 0 : index
    %1222 = vector.load %arg3[%c0_34, %c0_35] : memref<8x128xf32, #tpu.memory_space<vmem>>, vector<8x128xf32>
    tpu.vector_store %arg3[%c0_34, %c0_35], %1221 {strides = array<i32>} : memref<8x128xf32, #tpu.memory_space<vmem>>, vector<8x128xf32>,
    return
  }
  func.func @transform_0(%arg0: i32) -> i32 {
    %c0_i32 = arith.constant 0 : i32
    %c0_i32_0 = arith.constant 0 : i32
    return %c0_i32 : i32
  }
  func.func @transform_1(%arg0: i32) -> (i32, i32) {
    %c0_i32 = arith.constant 0 : i32
    %c0_i32_0 = arith.constant 0 : i32
    return %arg0, %c0_i32 : i32, i32
  }
  func.func @transform_2(%arg0: i32) -> (i32, i32) {
    %c0_i32 = arith.constant 0 : i32
    %c0_i32_0 = arith.constant 0 : i32
    return %arg0, %c0_i32 : i32, i32
  }
}

</mosaic_0001>

<bundles_post_ra>
// kernel: tpu_custom_call.1
= control target key start
LH: loop header
LB: loop body
LE: loop exit
PB: predicated region body
PF: predicated region fallthrough
CT: control target
= control target key end

     0   :  { %s3397_s0 = inlined_call_operand.hbm [shape: f32[305], index: 0, kind: input, shape index: {}]   ;;  %s3398_s1 = inlined_call_operand.hbm [shape: f32[16,128], index: 1, kind: input, shape index: {}]   ;;  %s3399_s2 = inlined_call_operand.hbm [shape: f32[16,128], index: 2, kind: output, shape index: {}]  }
   0x1   :  { %3424 = sst [smem:[#allocation82_spill]] %s3397_s0 }
   0x2   :  { %3425 = sst [smem:[#allocation83_spill]] %s3398_s1 }
   0x3   :  { %3426 = sst [smem:[#allocation84_spill]] %s3399_s2 }
   0x4   :  { %7 = vsyncpa [#allocation5], 0 }
   0x5   :  { %8 = vsyncpa [#allocation3], 0 }
   0x6   :  { %10 = vsyncpa [#allocation3 + $0x1], 0 }
   0x7   :  { %11 = vsyncpa [#allocation4], 0 }
   0x8   :  { %13 = vsyncpa [#allocation4 + $0x1], 0  ;;  %s1961_s9 = smov 0   ;;  %s1963_s10 = smov 0  }
   0x9   :  { %s1965_s11 = smov 0   ;;  %s1967_s12 = smov 0  }
   0xa LB: > { %3427 = sst [smem:[#allocation11_spill]] %s1929_s9  ;;  %s1982_s13 = sadd.s32 4294967295, %s1941_s12   ;;  %s1941_s12 = sphi %s1967_s12, %s3697_s12   ;;  %s1937_s11 = sphi %s1965_s11, %s3700_s11   ;;  %s1933_s10 = sphi %s1963_s10, %s3699_s10   ;;  %s1929_s9 = sphi %s1961_s9, %s3698_s9  }
   0xb   : > { %3428 = sst [smem:[#allocation12_spill]] %s1933_s10  ;;  %s1457_s14 = sadd.s32 4294967294, %s1941_s12  }
   0xc   : > { %3429 = sst [smem:[#allocation13_spill]] %s1937_s11  ;;  %p60_p0 = scmp.ne.s32.totalorder %s1933_s10, %s1929_s9 }
   0xd   : > { %3430 = sst [smem:[#allocation14_spill]] %s1941_s12  ;;  %p3400_p1 = scmp.eq.s32.totalorder %s1982_s13, 0 }
   0xe   : > { %3431 = sst [smem:[#allocation15_spill]] %s1982_s13  ;;  %p84_p2 = scmp.eq.s32.totalorder %s1982_s13, 1 }
   0xf   : > { %p90_p3 = scmp.eq.s32.totalorder %s1457_s14, 1  ;;  %p1991_p4 = por %p3400_p1, %p60_p0 }
  0x10   : > { %p1458_p5 = scmp.ge.s32.totalorder %s1941_s12, 1  ;;  %p97_p7 = scmp.lt.s32.totalorder %s1941_s12, 3 }
  0x11   : > { %s3432_s15 = scalar_select %p1991_p4, 1, 0 }
  0x12   : > { %p1996_p6 = por %p90_p3, %p60_p0  ;;  %p2001_p8 = pnand %p1458_p5, %p97_p7 }
  0x13   : > { %s2007_s18 = sadd.s32 1, %s1941_s12   ;;  %s47_s20 = sadd.s32 1, %s1937_s11 }
  0x14   : > { %s3433_s16 = scalar_select %p1996_p6, 1, 0 }
  0x15   : > { %s3435_s17 = scalar_select %p2001_p8, 1, 0 }
  0x16   : > { %3434 = sst [smem:[#allocation16_spill]] %s3433_s16  ;;  %p1783_p10 = pneg %p2001_p8 }
  0x17   : > { %3436 = sst [smem:[#allocation17_spill]] %s2007_s18  ;;  %s44_s19 = ssub.s32 %s1941_s12, %s2007_s18 }
  0x18   : > { %p1784_p11 = pnand %p1783_p10, %p3400_p1  ;;  %p45_p12 = scmp.eq.s32.totalorder %s44_s19, 0 }
  0x19   : > { %p54_p13 = scmp.ne.s32.totalorder %s1937_s11, %s1933_s10  ;;  %p55_p0 = scmp.eq.s32.totalorder %s1941_s12, 0 }
  0x1a   : > { %p1796_p3 = scmp.lt.s32.totalorder %s1941_s12, 2  ;;  %s1943_s21 = smov [#allocation2]  }
  0x1b   : > { %s3437_s0 = sld [smem:[#allocation82_spill]]  ;;  %p56_p5 = por %p55_p0, %p54_p13 }
  0x1c   : > { %s2024_s24 = scalar_select %p45_p12, %s1937_s11, %s47_s20  }
  0x1d   : > { %p2028_p7 = por %p84_p2, %p54_p13  ;;  %s119_s26 = sand.u32 1, %s1937_s11  }
  0x1e   : > { %3438 = sst [smem:[#allocation18_spill]] %s2024_s24  ;;  %s1462_s27 = sshll.u32 %s1941_s12, 7 }
  0x1f   : > { %s3439_s25 = scalar_select %p2028_p7, 1, 0 }
  0x20   : > { %s1461_s28 = sshll.u32 %s119_s26, 3  ;;  %s3441_s1 = sld [smem:[#allocation83_spill]] }
  0x21   : > { %1786 = dma.hbm_to_smem (!%p1784_p11), %s3437_s0, 48, %s1943_s21, [#allocation5]  }
  0x22   : > { %3440 = sst [smem:[#allocation19_spill]] %s3439_s25  ;;  %s123_s4 = scalar_lea.vmem [#allocation6], %s1461_s28 }
  0x23   : > { %s130_s5 = sshll.u32 %s123_s4, 4  ;;  %p2039_p10 = pnand %p1796_p3, %p56_p5  ;;  %s131_s5 = int_to_ptr.vmem [resolvable:$true] %s130_s5 }
  0x24   : > { %s120_s7 = scalar_lea.sflag [#allocation3], %s119_s26 }
  0x25   : > { %p1847_p11 = pneg %p2039_p10 }
  0x26   : > { %s2037_s3 = scalar_lea.hbm %s3441_s1, %s1462_s27  ;;  %s1850_s20 = scalar_lea.hbm %s3441_s1, 256 }
  0x27   : > { %s1845_s8 = scalar_lea.hbm %s2037_s3, 128  ;;  %p1851_p0 = scmp.lt.s32.totalorder %s2037_s3, %s3441_s1 }
  0x28   : > { %p1846_p2 = scmp.ne.s32.totalorder %s2037_s3, %s1845_s8  ;;  %p1852_p3 = scmp.lt.s32.totalorder %s1850_s20, %s1845_s8 }
  0x2a   : > { %p1848_p12 = pnand %p1847_p11, %p1846_p2  ;;  %p1853_p5 = por %p1852_p3, %p1851_p0 }
  0x2c   : > { %p1849_p13 = pneg %p1848_p12 }
  0x2e   : > { %p1854_p9 = pnand %p1853_p5, %p1849_p13 }
  0x30   : > { %1857 = shalt.err (!%p1854_p9)
}
  0x31   : > { %s1858_s23 = scalar_lea.vmem %s131_s5, 128  ;;  %s1944_s26 = smov [#allocation6]  }
  0x32   : > { %p1859_p1 = scmp.ne.s32.totalorder %s131_s5, %s1858_s23  ;;  %s1863_s27 = sshll.u32 %s1944_s26, 4  ;;  %s1864_s27 = int_to_ptr.vmem [resolvable:$false] %s1863_s27 }
  0x33   : > { %s1865_s28 = scalar_lea.vmem %s1864_s27, 256  ;;  %p1866_p2 = scmp.lt.s32.totalorder %s131_s5, %s1864_s27 }
  0x34   : > { %p1861_p6 = pnand %p1859_p1, %p1847_p11  ;;  %p1867_p12 = scmp.lt.s32.totalorder %s1865_s28, %s1858_s23 }
  0x36   : > { %p1862_p7 = pneg %p1861_p6  ;;  %p1868_p4 = por %p1867_p12, %p1866_p2 }
  0x38   : > { %p1869_p8 = pnand %p1868_p4, %p1862_p7 }
  0x3a   : > { %1872 = shalt.err (!%p1869_p8)
}
  0x3b   : > { %1790 = dma.hbm_to_vmem [thread:$0]  (!%p2039_p10), %s2037_s3, 128, %s131_s5, %s120_s7  }
  0x3c   : > { %p3443_p13 = scmp.ne.s32.totalorder %s3435_s17, 0 }
  0x3e   : > { %139 = sbr.rel (%p3443_p13) target bundleno = 670 (0x29e), region = 28 }
  0x43   : > { %p3444_p9 = scmp.eq.s32.totalorder %s1982_s13, 0 }
  0x45   : > { %1916 = dma.done.wait (%p3444_p9), [#allocation5], 48   ;;  %p3445_p1 = pmov %p3444_p9 }
  0x46   : > { %s2064_s29 = sand.u32 1, %s1933_s10   ;;  %p3447_p4 = scmp.ne.s32.totalorder %s3432_s15, 0 }
  0x47   : > { %1918 = vsyncadd (%p3445_p1), [#allocation5], 4294967248  ;;  %3446 = sst [smem:[#allocation20_spill]] %s2064_s29  ;;  %s3404_s30 = sshll.u32 %s2064_s29, 3 }
  0x48   : > { %s146_s4 = scalar_lea.sflag [#allocation3], %s2064_s29  ;;  %s2070_s3 = scalar_lea.vmem [#allocation6], %s3404_s30 }
  0x49   : > { %1920 = dma.done.wait (%p3447_p4), %s146_s4, 128  }
  0x4a   : > { %1922 = vsyncadd (%p3447_p4), %s146_s4, 4294967168 }
  0x4b   : > { %154 = sfence }
  0x4c   : > { %s2076_s17 = sld [smem:[#allocation2]]  ;;  %v2235_v0 = vld [vmem:[%s2070_s3] sm:$0xff] }
  0x4d   : > { %s2078_s5 = sld [smem:[#allocation2 + $0x8]] }
  0x4e   : > { %s2080_s6 = sld [smem:[#allocation2 + $0x1]] }
  0x4f   : > { %s2082_s7 = sld [smem:[#allocation2 + $0x9]] }
  0x50   : > { %s2084_s8 = sld [smem:[#allocation2 + $0x2]] }
  0x51   : > { %s2086_s14 = sld [smem:[#allocation2 + $0xa]] }
  0x52   : > { %s2088_s19 = sld [smem:[#allocation2 + $0x3]]  ;;  %v173_v1 = vstv %s2076_s17 }
  0x53   : > { %s2090_s20 = sld [smem:[#allocation2 + $0xb]]  ;;  %v174_v3 = vmul.f32 %v173_v1, %v2235_v0  ;;  %v176_v4 = vstv %s2078_s5 }
  0x54   : > { %s2092_s21 = sld [smem:[#allocation2 + $0x4]]  ;;  %v180_v2 = vstv %s2080_s6 }
  0x55   : > { %s2094_s15 = sld [smem:[#allocation2 + $0xc]]  ;;  %v181_v5 = vmul.f32 %v180_v2, %v2235_v0  ;;  %v183_v6 = vstv %s2082_s7  ;;  %v177_v8 = vadd.f32 %v176_v4, %v174_v3 }
  0x56   : > { %s2096_s22 = sld [smem:[#allocation2 + $0x5]]  ;;  %v187_v7 = vstv %s2084_s8 }
  0x57   : > { %s2098_s23 = sld [smem:[#allocation2 + $0xd]]  ;;  %v184_v9 = vadd.f32 %v183_v6, %v181_v5  ;;  %v188_v10 = vmul.f32 %v187_v7, %v2235_v0  ;;  %v190_v12 = vstv %s2086_s14  ;;  %v2270_v14 = vmax.f32 %v177_v8, 0.0 }
  0x58   : > { %s2100_s26 = sld [smem:[#allocation2 + $0x6]]  ;;  %v194_v11 = vstv %s2088_s19 }
  0x59   : > { %s2102_s27 = sld [smem:[#allocation2 + $0xe]]  ;;  %v195_v15 = vmul.f32 %v194_v11, %v2235_v0  ;;  %v2276_v17 = vmax.f32 %v184_v9, 0.0  ;;  %v191_v18 = vadd.f32 %v190_v12, %v188_v10  ;;  %v197_v19 = vstv %s2090_s20 }
  0x5a   : > { %s2104_s28 = sld [smem:[#allocation2 + $0x7]]  ;;  %v201_v13 = vstv %s2092_s21 }
  0x5b   : > { %s2106_s4 = sld [smem:[#allocation2 + $0xf]]  ;;  %v202_v20 = vmul.f32 %v201_v13, %v2235_v0  ;;  %v204_v21 = vstv %s2094_s15  ;;  %v198_v28 = vadd.f32 %v197_v19, %v195_v15  ;;  %v2296_v30 = vmax.f32 %v191_v18, 0.0 }
  0x5c   : > { %s2108_s30 = sld [smem:[#allocation2 + $0x10]]  ;;  %v208_v16 = vstv %s2096_s22 }
  0x5d   : > { %s2110_s0 = sld [smem:[#allocation2 + $0x11]]  ;;  %v209_v24 = vmul.f32 %v208_v16, %v2235_v0  ;;  %v211_v29 = vstv %s2098_s23  ;;  %v205_v31 = vadd.f32 %v204_v21, %v202_v20  ;;  %v2312_v41 = vmax.f32 %v198_v28, 0.0 }
  0x5e   : > { %s2112_s1 = sld [smem:[#allocation2 + $0x12]]  ;;  %v215_v25 = vstv %s2100_s26 }
  0x5f   : > { %s2114_s24 = sld [smem:[#allocation2 + $0x13]]  ;;  %v216_v34 = vmul.f32 %v215_v25, %v2235_v0  ;;  %v212_v38 = vadd.f32 %v211_v29, %v209_v24  ;;  %v218_v39 = vstv %s2102_s27  ;;  %v2323_v48 = vmax.f32 %v205_v31, 0.0 }
  0x60   : > { %3448 = sst [smem:[#allocation21_spill]] %s2104_s28 }
  0x61   : > { %3449 = sst [smem:[#allocation22_spill]] %s2106_s4  ;;  %v219_v49 = vadd.f32 %v218_v39, %v216_v34  ;;  %v2328_v52 = vmax.f32 %v212_v38, 0.0 }
  0x62   : > { %s2116_s11 = sld [smem:[#allocation2 + $0x14]]  ;;  %v229_v22 = vstv %s2108_s30 }
  0x63   : > { %s2118_s10 = sld [smem:[#allocation2 + $0x15]]  ;;  %v232_v23 = vstv %s2110_s0  ;;  %v230_v32 = vmul.f32 %v229_v22, %v2270_v14  ;;  %v2346_v1 = vmax.f32 %v219_v49, 0.0 }
  0x64   : > { %s2120_s18 = sld [smem:[#allocation2 + $0x16]]  ;;  %v233_v33 = vmul.f32 %v232_v23, %v2276_v17  ;;  %v236_v35 = vstv %s2112_s1 }
  0x65   : > { %3450 = sst [smem:[#allocation23_spill]] %s2114_s24  ;;  %v237_v46 = vmul.f32 %v236_v35, %v2296_v30 }
  0x66   : > { %s2122_s12 = sld [smem:[#allocation2 + $0x17]]  ;;  %v234_v45 = vadd.f32 %v233_v33, %v230_v32 }
  0x67   : > { %s2124_s16 = sld [smem:[#allocation2 + $0x90]] }
  0x68   : > { %3451 = sst [smem:[#allocation24_spill]] %s2116_s11  ;;  %v238_v60 = vadd.f32 %v237_v46, %v234_v45 }
  0x69   : > { %3452 = sst [smem:[#allocation25_spill]] %s2118_s10 }
  0x6a   : > { %3453 = sst [smem:[#allocation26_spill]] %s2120_s18 }
  0x6b   : > { %s2126_s9 = sld [smem:[#allocation2 + $0x18]] }
  0x6c   : > { %3454 = sst [smem:[#allocation27_spill]] %s2122_s12 }
  0x6d   : > { %3455 = sst [smem:[#allocation28_spill]] %s2124_s16 }
  0x6e   : > { %s2128_s2 = sld [smem:[#allocation2 + $0x19]] }
  0x6f   : > { %s2130_s25 = sld [smem:[#allocation2 + $0x1a]] }
  0x70   : > { %s2132_s29 = sld [smem:[#allocation2 + $0x1b]] }
  0x71   : > { %s2134_s13 = sld [smem:[#allocation2 + $0x1c]]  ;;  %v264_v26 = vstv %s2126_s9 }
  0x72   : > { %s2136_s4 = sld [smem:[#allocation2 + $0x1d]]  ;;  %v265_v36 = vmul.f32 %v264_v26, %v2270_v14 }
  0x73   : > { %s2138_s11 = sld [smem:[#allocation2 + $0x1e]] }
  0x74   : > { %s2140_s10 = sld [smem:[#allocation2 + $0x1f]]  ;;  %v267_v27 = vstv %s2128_s2 }
  0x75   : > { %3456 = sst [smem:[#allocation29_spill]] %s2130_s25  ;;  %v268_v37 = vmul.f32 %v267_v27, %v2276_v17 }
  0x76   : > { %3457 = sst [smem:[#allocation30_spill]] %s2132_s29 }
  0x77   : > { %3458 = sst [smem:[#allocation31_spill]] %s2134_s13  ;;  %v269_v50 = vadd.f32 %v268_v37, %v265_v36 }
  0x78   : > { %3459 = sst [smem:[#allocation32_spill]] %s2136_s4 }
  0x79   : > { %3460 = sst [smem:[#allocation33_spill]] %s2138_s11 }
  0x7a   : > { %3461 = sst [smem:[#allocation34_spill]] %s2140_s10 }
  0x7b   : > { %s2142_s18 = sld [smem:[#allocation2 + $0x91]] }
  0x7c   : > { %s2144_s12 = sld [smem:[#allocation2 + $0x20]] }
  0x7d   : > { %s2146_s16 = sld [smem:[#allocation2 + $0x21]] }
  0x7e   : > { %s2148_s24 = sld [smem:[#allocation2 + $0x22]] }
  0x7f   : > { %s2150_s28 = sld [smem:[#allocation2 + $0x23]] }
  0x80   : > { %s2152_s25 = sld [smem:[#allocation2 + $0x24]] }
  0x81   : > { %3462 = sst [smem:[#allocation35_spill]] %s2142_s18 }
  0x82   : > { %3463 = sst [smem:[#allocation36_spill]] %s2144_s12 }
  0x83   : > { %3464 = sst [smem:[#allocation37_spill]] %s2146_s16 }
  0x84   : > { %3465 = sst [smem:[#allocation38_spill]] %s2148_s24 }
  0x85   : > { %3466 = sst [smem:[#allocation39_spill]] %s2150_s28 }
  0x86   : > { %3467 = sst [smem:[#allocation40_spill]] %s2152_s25 }
  0x87   : > { %s2154_s29 = sld [smem:[#allocation2 + $0x25]] }
  0x88   : > { %s2156_s13 = sld [smem:[#allocation2 + $0x26]] }
  0x89   : > { %s2158_s4 = sld [smem:[#allocation2 + $0x27]] }
  0x8a   : > { %s2160_s11 = sld [smem:[#allocation2 + $0x92]] }
  0x8b   : > { %s2162_s10 = sld [smem:[#allocation2 + $0x28]] }
  0x8c   : > { %s2164_s18 = sld [smem:[#allocation2 + $0x29]] }
  0x8d   : > { %3468 = sst [smem:[#allocation41_spill]] %s2154_s29 }
  0x8e   : > { %3469 = sst [smem:[#allocation42_spill]] %s2156_s13 }
  0x8f   : > { %3470 = sst [smem:[#allocation43_spill]] %s2158_s4 }
  0x90   : > { %3471 = sst [smem:[#allocation44_spill]] %s2160_s11 }
  0x91   : > { %3472 = sst [smem:[#allocation45_spill]] %s2162_s10 }
  0x92   : > { %3473 = sst [smem:[#allocation46_spill]] %s2164_s18 }
  0x93   : > { %s2166_s12 = sld [smem:[#allocation2 + $0x2a]] }
  0x94   : > { %s2168_s16 = sld [smem:[#allocation2 + $0x2b]] }
  0x95   : > { %s2170_s24 = sld [smem:[#allocation2 + $0x2c]] }
  0x96   : > { %s2172_s28 = sld [smem:[#allocation2 + $0x2d]] }
  0x97   : > { %s2174_s25 = sld [smem:[#allocation2 + $0x2e]] }
  0x98   : > { %s2176_s29 = sld [smem:[#allocation2 + $0x2f]] }
  0x99   : > { %3474 = sst [smem:[#allocation47_spill]] %s2166_s12 }
  0x9a   : > { %3475 = sst [smem:[#allocation48_spill]] %s2168_s16 }
  0x9b   : > { %3476 = sst [smem:[#allocation49_spill]] %s2170_s24 }
  0x9c   : > { %3477 = sst [smem:[#allocation50_spill]] %s2172_s28 }
  0x9d   : > { %3478 = sst [smem:[#allocation51_spill]] %s2174_s25 }
  0x9e   : > { %3479 = sst [smem:[#allocation52_spill]] %s2176_s29 }
  0x9f   : > { %s2178_s13 = sld [smem:[#allocation2 + $0x93]] }
  0xa0   : > { %s2180_s4 = sld [smem:[#allocation2 + $0x30]] }
  0xa1   : > { %s2182_s11 = sld [smem:[#allocation2 + $0x31]] }
  0xa2   : > { %s2184_s10 = sld [smem:[#allocation2 + $0x32]] }
  0xa3   : > { %s2186_s18 = sld [smem:[#allocation2 + $0x33]] }
  0xa4   : > { %s2188_s12 = sld [smem:[#allocation2 + $0x34]] }
  0xa5   : > { %3480 = sst [smem:[#allocation53_spill]] %s2178_s13 }
  0xa6   : > { %3481 = sst [smem:[#allocation54_spill]] %s2180_s4 }
  0xa7   : > { %s2190_s16 = sld [smem:[#allocation2 + $0x35]]  ;;  %v372_v7 = vstv %s2182_s11 }
  0xa8   : > { %3482 = sst [smem:[#allocation55_spill]] %s2184_s10  ;;  %v373_v21 = vmul.f32 %v372_v7, %v2276_v17 }
  0xa9   : > { %3483 = sst [smem:[#allocation56_spill]] %s2186_s18 }
  0xaa   : > { %3484 = sst [smem:[#allocation57_spill]] %s2188_s12 }
  0xab   : > { %s2192_s24 = sld [smem:[#allocation2 + $0x36]] }
  0xac   : > { %s2194_s28 = sld [smem:[#allocation2 + $0x37]] }
  0xad   : > { %3485 = sst [smem:[#allocation58_spill]] %s2190_s16 }
  0xae   : > { %s2196_s25 = sld [smem:[#allocation2 + $0x94]] }
  0xaf   : > { %s2198_s29 = sld [smem:[#allocation2 + $0x38]] }
  0xb0   : > { %s2200_s13 = sld [smem:[#allocation2 + $0x39]] }
  0xb1   : > { %3486 = sst [smem:[#allocation59_spill]] %s2192_s24 }
  0xb2   : > { %3487 = sst [smem:[#allocation60_spill]] %s2194_s28 }
  0xb3   : > { %s2202_s4 = sld [smem:[#allocation2 + $0x3a]] }
  0xb4   : > { %3488 = sst [smem:[#allocation61_spill]] %s2196_s25 }
  0xb5   : > { %3489 = sst [smem:[#allocation62_spill]] %s2198_s29 }
  0xb6   : > { %3490 = sst [smem:[#allocation63_spill]] %s2200_s13 }
  0xb7   : > { %s2204_s10 = sld [smem:[#allocation2 + $0x3b]] }
  0xb8   : > { %s2206_s18 = sld [smem:[#allocation2 + $0x3c]] }
  0xb9   : > { %3491 = sst [smem:[#allocation64_spill]] %s2202_s4 }
  0xba   : > { %s2208_s12 = sld [smem:[#allocation2 + $0x3d]] }
  0xbb   : > { %s2210_s24 = sld [smem:[#allocation2 + $0x3e]] }
  0xbc   : > { %s2212_s28 = sld [smem:[#allocation2 + $0x3f]] }
  0xbd   : > { %3492 = sst [smem:[#allocation65_spill]] %s2204_s10 }
  0xbe   : > { %s2214_s25 = sld [smem:[#allocation2 + $0x95]] }
  0xbf   : > { %s2216_s16 = sld [smem:[#allocation2 + $0x40]] }
  0xc0   : > { %3493 = sst [smem:[#allocation66_spill]] %s2208_s12 }
  0xc1   : > { %3494 = sst [smem:[#allocation67_spill]] %s2210_s24 }
  0xc2   : > { %3495 = sst [smem:[#allocation68_spill]] %s2212_s28 }
  0xc3   : > { %s2218_s13 = sld [smem:[#allocation2 + $0x41]] }
  0xc4   : > { %3496 = sst [smem:[#allocation69_spill]] %s2214_s25 }
  0xc5   : > { %s2220_s4 = sld [smem:[#allocation2 + $0x42]] }
  0xc6   : > { %s2222_s10 = sld [smem:[#allocation2 + $0x43]] }
  0xc7   : > { %s2224_s29 = sld [smem:[#allocation2 + $0x44]] }
  0xc8   : > { %s2226_s12 = sld [smem:[#allocation2 + $0x45]] }
  0xc9   : > { %3497 = sst [smem:[#allocation70_spill]] %s2218_s13 }
  0xca   : > { %s2228_s24 = sld [smem:[#allocation2 + $0x46]] }
  0xcb   : > { %s2230_s28 = sld [smem:[#allocation2 + $0x47]] }
  0xcc   : > { %3498 = sst [smem:[#allocation71_spill]] %s2222_s10 }
  0xcd   : > { %3499 = sst [smem:[#allocation72_spill]] %s2224_s29 }
  0xce   : > { %s2232_s25 = sld [smem:[#allocation2 + $0x96]] }
  0xcf   : > { %s2238_s13 = sld [smem:[#allocation2 + $0x48]] }
  0xd0   : > { %3500 = sst [smem:[#allocation73_spill]] %s2228_s24 }
  0xd1   : > { %3501 = sst [smem:[#allocation74_spill]] %s2230_s28 }
  0xd2   : > { %s2241_s10 = sld [smem:[#allocation2 + $0x49]] }
  0xd3   : > { %s2243_s29 = sld [smem:[#allocation2 + $0x4a]] }
  0xd4   : > { %3502 = sst [smem:[#allocation75_spill]] %s2232_s25 }
  0xd5   : > { %s2246_s24 = sld [smem:[#allocation2 + $0x4b]] }
  0xd6   : > { %s2250_s3 = sld [smem:[#allocation2 + $0x4c]] }
  0xd7   : > { %s2254_s17 = sld [smem:[#allocation2 + $0x4d]] }
  0xd8   : > { %s2256_s6 = sld [smem:[#allocation2 + $0x4e]] }
  0xd9   : > { %s2258_s25 = sld [smem:[#allocation2 + $0x4f]] }
  0xda   : > { %s2262_s5 = sld [smem:[#allocation2 + $0x97]] }
  0xdb   : > { %s2266_s7 = sld [smem:[#allocation2 + $0x50]] }
  0xdc   : > { %s2268_s8 = sld [smem:[#allocation2 + $0x51]] }
  0xdd   : > { %3503 = sst [smem:[#allocation76_spill]] %s2254_s17 }
  0xde   : > { %3504 = sst [smem:[#allocation77_spill]] %s2256_s6 }
  0xdf   : > { %3505 = sst [smem:[#allocation78_spill]] %s2258_s25 }
  0xe0   : > { %3506 = sst [smem:[#allocation79_spill]] %s2262_s5 }
  0xe1   : > { %s2274_s25 = sld [smem:[#allocation2 + $0x52]] }
  0xe2   : > { %s2280_s14 = sld [smem:[#allocation2 + $0x53]] }
  0xe3   : > { %s2285_s19 = sld [smem:[#allocation2 + $0x54]] }
  0xe4   : > { %s2291_s21 = sld [smem:[#allocation2 + $0x55]] }
  0xe5   : > { %s3509_s22 = sld [smem:[#allocation29_spill]] }
  0xe6   : > { %s2294_s20 = sld [smem:[#allocation2 + $0x56]] }
  0xe7   : > { %s3511_s5 = sld [smem:[#allocation36_spill]] }
  0xe8   : > { %s3512_s0 = sld [smem:[#allocation37_spill]] }
  0xe9   : > { %3507 = sst [smem:[#allocation80_spill]] %s2285_s19 }
  0xea   : > { %3508 = sst [smem:[#allocation81_spill]] %s2291_s21 }
  0xeb   : > { %s3513_s30 = sld [smem:[#allocation21_spill]]  ;;  %v271_v40 = vstv %s3509_s22 }
  0xec   : > { %3510 = sst [smem:[#allocation29_spill]] %s2294_s20  ;;  %v272_v51 = vmul.f32 %v271_v40, %v2296_v30 }
  0xed   : > { %s2300_s9 = sld [smem:[#allocation2 + $0x57]]  ;;  %v299_v42 = vstv %s3511_s5 }
  0xee   : > { %s3515_s2 = sld [smem:[#allocation23_spill]]  ;;  %v302_v43 = vstv %s3512_s0  ;;  %v300_v54 = vmul.f32 %v299_v42, %v2270_v14  ;;  %v273_v2 = vadd.f32 %v272_v51, %v269_v50 }
  0xef   : > { %s2306_s15 = sld [smem:[#allocation2 + $0x98]]  ;;  %v303_v55 = vmul.f32 %v302_v43, %v2276_v17 }
  0xf0   : > { %s2310_s23 = sld [smem:[#allocation2 + $0x58]] }
  0xf1   : > { %s3517_s26 = sld [smem:[#allocation30_spill]]  ;;  %v222_v44 = vstv %s3513_s30  ;;  %v304_v4 = vadd.f32 %v303_v55, %v300_v54 }
  0xf2   : > { %s3518_s1 = sld [smem:[#allocation22_spill]]  ;;  %v223_v56 = vmul.f32 %v222_v44, %v2235_v0 }
  0xf3   : > { %3514 = sst [smem:[#allocation36_spill]] %s2300_s9 }
  0xf4   : > { %s2316_s9 = sld [smem:[#allocation2 + $0x59]]  ;;  %v240_v47 = vstv %s3515_s2 }
  0xf5   : > { %3516 = sst [smem:[#allocation37_spill]] %s2306_s15  ;;  %v241_v58 = vmul.f32 %v240_v47, %v2312_v41 }
  0xf6   : > { %s3519_s20 = sld [smem:[#allocation38_spill]] }
  0xf7   : > { %s2321_s15 = sld [smem:[#allocation2 + $0x5a]]  ;;  %v275_v53 = vstv %s3517_s26  ;;  %v242_v12 = vadd.f32 %v241_v58, %v238_v60 }
  0xf8   : > { %s3520_s27 = sld [smem:[#allocation24_spill]]  ;;  %v225_v57 = vstv %s3518_s1  ;;  %v276_v0 = vmul.f32 %v275_v53, %v2312_v41 }
  0xf9   : > { %s3521_s22 = sld [smem:[#allocation45_spill]]  ;;  %v226_v22 = vadd.f32 %v225_v57, %v223_v56 }
  0xfa   : > { %s3522_s5 = sld [smem:[#allocation46_spill]]  ;;  %v277_v18 = vadd.f32 %v276_v0, %v273_v2 }
  0xfb   : > { %s2326_s0 = sld [smem:[#allocation2 + $0x5b]]  ;;  %v2391_v39 = vmax.f32 %v226_v22, 0.0 }
  0xfc   : > { %s3523_s30 = sld [smem:[#allocation31_spill]]  ;;  %v306_v59 = vstv %s3519_s20 }
  0xfd   : > { %s2333_s2 = sld [smem:[#allocation2 + $0x5c]]  ;;  %v307_v5 = vmul.f32 %v306_v59, %v2296_v30 }
  0xfe   : > { %s3525_s6 = sld [smem:[#allocation54_spill]]  ;;  %v244_v61 = vstv %s3520_s27 }
  0xff   : > { %s2339_s21 = sld [smem:[#allocation2 + $0x5d]]  ;;  %v334_v62 = vstv %s3521_s22  ;;  %v245_v8 = vmul.f32 %v244_v61, %v2323_v48  ;;  %v308_v23 = vadd.f32 %v307_v5, %v304_v4 }
 0x100   : > { %s3527_s17 = sld [smem:[#allocation39_spill]]  ;;  %v337_v63 = vstv %s3522_s5  ;;  %v335_v10 = vmul.f32 %v334_v62, %v2270_v14 }
 0x101   : > { %s2344_s26 = sld [smem:[#allocation2 + $0x5e]]  ;;  %v338_v11 = vmul.f32 %v337_v63, %v2276_v17  ;;  %v246_v31 = vadd.f32 %v245_v8, %v242_v12 }
 0x102   : > { %s3529_s28 = sld [smem:[#allocation25_spill]]  ;;  %v279_v3 = vstv %s3523_s30 }
 0x103   : > { %3524 = sst [smem:[#allocation21_spill]] %s2333_s2  ;;  %v280_v15 = vmul.f32 %v279_v3, %v2323_v48  ;;  %v339_v28 = vadd.f32 %v338_v11, %v335_v10 }
 0x104   : > { %s3530_s1 = sld [smem:[#allocation47_spill]]  ;;  %v369_v6 = vstv %s3525_s6 }
 0x105   : > { %3526 = sst [smem:[#allocation23_spill]] %s2339_s21  ;;  %v370_v20 = vmul.f32 %v369_v6, %v2270_v14  ;;  %v281_v35 = vadd.f32 %v280_v15, %v277_v18 }
 0x106   : > { %s2350_s2 = sld [smem:[#allocation2 + $0x5f]]  ;;  %v310_v9 = vstv %s3527_s17 }
 0x107   : > { %3528 = sst [smem:[#allocation30_spill]] %s2344_s26  ;;  %v311_v24 = vmul.f32 %v310_v9, %v2312_v41  ;;  %v374_v37 = vadd.f32 %v373_v21, %v370_v20 }
 0x108   : > { %s3532_s20 = sld [smem:[#allocation32_spill]]  ;;  %v248_v13 = vstv %s3529_s28 }
 0x109   : > { %s2355_s27 = sld [smem:[#allocation2 + $0x99]]  ;;  %v249_v26 = vmul.f32 %v248_v13, %v2328_v52  ;;  %v312_v40 = vadd.f32 %v311_v24, %v308_v23 }
 0x10a   : > { %s3534_s22 = sld [smem:[#allocation55_spill]]  ;;  %v341_v16 = vstv %s3530_s1 }
 0x10b   : > { %s2361_s5 = sld [smem:[#allocation2 + $0x60]]  ;;  %v342_v29 = vmul.f32 %v341_v16, %v2296_v30  ;;  %v250_v49 = vadd.f32 %v249_v26, %v246_v31 }
 0x10c   : > { %3531 = sst [smem:[#allocation22_spill]] %s2350_s2 }
 0x10d   : > { %s3535_s30 = sld [smem:[#allocation40_spill]]  ;;  %v343_v46 = vadd.f32 %v342_v29, %v339_v28 }
 0x10e   : > { %s2366_s6 = sld [smem:[#allocation2 + $0x61]]  ;;  %v283_v19 = vstv %s3532_s20 }
 0x10f   : > { %3533 = sst [smem:[#allocation38_spill]] %s2355_s27  ;;  %v284_v33 = vmul.f32 %v283_v19, %v2328_v52 }
 0x110   : > { %s3536_s11 = sld [smem:[#allocation26_spill]]  ;;  %v376_v25 = vstv %s3534_s22 }
 0x111   : > { %s3537_s17 = sld [smem:[#allocation48_spill]]  ;;  %v377_v38 = vmul.f32 %v376_v25, %v2296_v30  ;;  %v285_v54 = vadd.f32 %v284_v33, %v281_v35 }
 0x112   : > { %s2371_s27 = sld [smem:[#allocation2 + $0x62]] }
 0x113   : > { %s3538_s2 = sld [smem:[#allocation33_spill]]  ;;  %v314_v27 = vstv %s3535_s30  ;;  %v378_v56 = vadd.f32 %v377_v38, %v374_v37 }
 0x114   : > { %s2375_s28 = sld [smem:[#allocation2 + $0x63]]  ;;  %v315_v42 = vmul.f32 %v314_v27, %v2323_v48 }
 0x115   : > { %s3540_s1 = sld [smem:[#allocation56_spill]] }
 0x116   : > { %s2380_s20 = sld [smem:[#allocation2 + $0x64]]  ;;  %v252_v32 = vstv %s3536_s11  ;;  %v316_v58 = vadd.f32 %v315_v42, %v312_v40 }
 0x117   : > { %s3542_s26 = sld [smem:[#allocation41_spill]]  ;;  %v345_v34 = vstv %s3537_s17  ;;  %v253_v44 = vmul.f32 %v252_v32, %v2346_v1 }
 0x118   : > { %s2385_s21 = sld [smem:[#allocation2 + $0x65]]  ;;  %v346_v47 = vmul.f32 %v345_v34, %v2312_v41 }
 0x119   : > { %s3544_s22 = sld [smem:[#allocation27_spill]]  ;;  %v287_v36 = vstv %s3538_s2  ;;  %v254_v3 = vadd.f32 %v253_v44, %v250_v49 }
 0x11a   : > { %3539 = sst [smem:[#allocation24_spill]] %s2375_s28  ;;  %v288_v51 = vmul.f32 %v287_v36, %v2346_v1  ;;  %v347_v62 = vadd.f32 %v346_v47, %v343_v46 }
 0x11b   : > { %s3545_s30 = sld [smem:[#allocation49_spill]]  ;;  %v380_v43 = vstv %s3540_s1 }
 0x11c   : > { %3541 = sst [smem:[#allocation45_spill]] %s2380_s20  ;;  %v381_v57 = vmul.f32 %v380_v43, %v2312_v41  ;;  %v289_v7 = vadd.f32 %v288_v51, %v285_v54  ;;  %v419_v51 = vstv %s2206_s18 }
 0x11d   : > { %s2389_s28 = sld [smem:[#allocation2 + $0x66]]  ;;  %v318_v45 = vstv %s3542_s26 }
 0x11e   : > { %3543 = sst [smem:[#allocation46_spill]] %s2385_s21  ;;  %v319_v59 = vmul.f32 %v318_v45, %v2328_v52  ;;  %v382_v9 = vadd.f32 %v381_v57, %v378_v56 }
 0x11f   : > { %s3547_s20 = sld [smem:[#allocation34_spill]]  ;;  %v256_v50 = vstv %s3544_s22 }
 0x120   : > { %s2395_s11 = sld [smem:[#allocation2 + $0x67]]  ;;  %v257_v4 = vmul.f32 %v256_v50, %v2391_v39  ;;  %v320_v16 = vadd.f32 %v319_v59, %v316_v58  ;;  %v420_v58 = vmul.f32 %v419_v51, %v2323_v48 }
 0x121   : > { %s3549_s17 = sld [smem:[#allocation42_spill]]  ;;  %v349_v53 = vstv %s3545_s30 }
 0x122   : > { %s3550_s2 = sld [smem:[#allocation57_spill]]  ;;  %v350_v63 = vmul.f32 %v349_v53, %v2323_v48  ;;  %v258_v21 = vadd.f32 %v257_v4, %v254_v3  ;;  %v439_v4 = vstv %s2216_s16 }
 0x123   : > { %3546 = sst [smem:[#allocation31_spill]] %s2389_s28 }
 0x124   : > { %s2400_s21 = sld [smem:[#allocation2 + $0x9a]]  ;;  %v351_v18 = vadd.f32 %v350_v63, %v347_v62 }
 0x125   : > { %s3552_s28 = sld [smem:[#allocation62_spill]]  ;;  %v291_v55 = vstv %s3547_s20 }
 0x126   : > { %3548 = sst [smem:[#allocation54_spill]] %s2395_s11  ;;  %v292_v5 = vmul.f32 %v291_v55, %v2391_v39 }
 0x127   : > { %s3553_s19 = sld [smem:[#allocation63_spill]]  ;;  %v322_v60 = vstv %s3549_s17 }
 0x128   : > { %s2405_s1 = sld [smem:[#allocation2 + $0x68]]  ;;  %v384_v61 = vstv %s3550_s2  ;;  %v323_v8 = vmul.f32 %v322_v60, %v2346_v1  ;;  %v293_v24 = vadd.f32 %v292_v5, %v289_v7 }
 0x129   : > { %s3554_s26 = sld [smem:[#allocation50_spill]]  ;;  %v385_v10 = vmul.f32 %v384_v61, %v2323_v48 }
 0x12a   : > { %3551 = sst [smem:[#allocation39_spill]] %s2400_s21  ;;  %v324_v33 = vadd.f32 %v323_v8, %v320_v16  ;;  %v440_v16 = vmul.f32 %v439_v4, %v2270_v14 }
 0x12b   : > { %s2409_s11 = sld [smem:[#allocation2 + $0x69]]  ;;  %v404_v2 = vstv %s3552_s28  ;;  %v386_v26 = vadd.f32 %v385_v10, %v382_v9  ;;  %v474_v9 = vstv %s2238_s13 }
 0x12c   : > { %s2414_s22 = sld [smem:[#allocation2 + $0x6a]]  ;;  %v405_v13 = vmul.f32 %v404_v2, %v2270_v14 }
 0x12d   : > { %s3557_s21 = sld [smem:[#allocation43_spill]]  ;;  %v407_v0 = vstv %s3553_s19 }
 0x12e   : > { %s3558_s30 = sld [smem:[#allocation58_spill]]  ;;  %v408_v15 = vmul.f32 %v407_v0, %v2276_v17 }
 0x12f   : > { %s2419_s20 = sld [smem:[#allocation2 + $0x6b]]  ;;  %v353_v6 = vstv %s3554_s26 }
 0x130   : > { %s2424_s17 = sld [smem:[#allocation2 + $0x6c]]  ;;  %v354_v19 = vmul.f32 %v353_v6, %v2328_v52  ;;  %v409_v31 = vadd.f32 %v408_v15, %v405_v13  ;;  %v512_v13 = vstv %s2268_s8 }
 0x131   : > { %3555 = sst [smem:[#allocation25_spill]] %s2409_s11 }
 0x132   : > { %3556 = sst [smem:[#allocation47_spill]] %s2414_s22  ;;  %v355_v34 = vadd.f32 %v354_v19, %v351_v18  ;;  %v446_v19 = vstv %s2220_s4 }
 0x133   : > { %s3560_s11 = sld [smem:[#allocation64_spill]]  ;;  %v326_v11 = vstv %s3557_s21 }
 0x134   : > { %s3562_s2 = sld [smem:[#allocation28_spill]]  ;;  %v388_v12 = vstv %s3558_s30  ;;  %v327_v28 = vmul.f32 %v326_v11, %v2391_v39  ;;  %v477_v11 = vstv %s2241_s10 }
 0x135   : > { %3559 = sst [smem:[#allocation32_spill]] %s2419_s20  ;;  %v389_v27 = vmul.f32 %v388_v12, %v2328_v52  ;;  %v509_v12 = vstv %s2266_s7 }
 0x136   : > { %3561 = sst [smem:[#allocation55_spill]] %s2424_s17  ;;  %v328_v47 = vadd.f32 %v327_v28, %v324_v33 }
 0x137   : > { %s3563_s22 = sld [smem:[#allocation51_spill]]  ;;  %v390_v40 = vadd.f32 %v389_v27, %v386_v26  ;;  %v510_v26 = vmul.f32 %v509_v12, %v2270_v14  ;;  %v513_v27 = vmul.f32 %v512_v13, %v2276_v17 }
 0x138   : > { %s2428_s19 = sld [smem:[#allocation2 + $0x6d]] }
 0x139   : > { %s3565_s28 = sld [smem:[#allocation35_spill]]  ;;  %v411_v20 = vstv %s3560_s11 }
 0x13a   : > { %s2434_s26 = sld [smem:[#allocation2 + $0x6e]]  ;;  %v260_v22 = vstv %s3562_s2  ;;  %v412_v32 = vmul.f32 %v411_v20, %v2296_v30 }
 0x13b   : > { %s3567_s17 = sld [smem:[#allocation59_spill]]  ;;  %v261_v38 = vadd.f32 %v260_v22, %v258_v21  ;;  %v475_v21 = vmul.f32 %v474_v9, %v2270_v14  ;;  %v544_v22 = vstv %s2310_s23 }
 0x13c   : > { %s2438_s20 = sld [smem:[#allocation2 + $0x6f]]  ;;  %v413_v45 = vadd.f32 %v412_v32, %v409_v31  ;;  %v516_v32 = vstv %s2274_s25  ;;  %v545_v33 = vmul.f32 %v544_v22, %v2270_v14 }
 0x13d   : > { %v357_v23 = vstv %s3563_s22  ;;  %s2442_s21 = sld [smem:[#allocation2 + $0x9b]]  ;;  %v2474_v54 = vmax.f32 %v261_v38, 0.0 }
 0x13e   : > { %3564 = sst [smem:[#allocation40_spill]] %s2428_s19  ;;  %v358_v35 = vmul.f32 %v357_v23, %v2346_v1  ;;  %v547_v23 = vstv %s2316_s9 }
 0x13f   : > { %s3569_s19 = sld [smem:[#allocation65_spill]]  ;;  %v295_v25 = vstv %s3565_s28 }
 0x140   : > { %3566 = sst [smem:[#allocation26_spill]] %s2434_s26  ;;  %v296_v43 = vadd.f32 %v295_v25, %v293_v24  ;;  %v359_v49 = vadd.f32 %v358_v35, %v355_v34  ;;  %v478_v24 = vmul.f32 %v477_v11, %v2276_v17  ;;  %v481_v25 = vstv %s2243_s29 }
 0x141   : > { %s3571_s30 = sld [smem:[#allocation52_spill]]  ;;  %v392_v29 = vstv %s3567_s17  ;;  %v548_v34 = vmul.f32 %v547_v23, %v2276_v17  ;;  %v579_v35 = vstv %s2361_s5 }
 0x142   : > { %3568 = sst [smem:[#allocation48_spill]] %s2438_s20  ;;  %v393_v42 = vmul.f32 %v392_v29, %v2346_v1  ;;  %v2484_v61 = vmax.f32 %v296_v43, 0.0  ;;  %v447_v29 = vmul.f32 %v446_v19, %v2296_v30  ;;  %v479_v43 = vadd.f32 %v478_v24, %v475_v21 }
 0x143   : > { %3570 = sst [smem:[#allocation33_spill]] %s2442_s21 }
 0x144   : > { %s2446_s26 = sld [smem:[#allocation2 + $0x70]]  ;;  %v394_v55 = vadd.f32 %v393_v42, %v390_v40  ;;  %v482_v40 = vmul.f32 %v481_v25, %v2296_v30  ;;  %v551_v42 = vstv %s2321_s15 }
 0x145   : > { %s3573_s11 = sld [smem:[#allocation60_spill]]  ;;  %v415_v36 = vstv %s3569_s19 }
 0x146   : > { %s2451_s2 = sld [smem:[#allocation2 + $0x71]]  ;;  %v416_v46 = vmul.f32 %v415_v36, %v2312_v41  ;;  %v582_v36 = vstv %s2366_s6  ;;  %v483_v4 = vadd.f32 %v482_v40, %v479_v43 }
 0x147   : > { %s2455_s22 = sld [smem:[#allocation2 + $0x72]]  ;;  %v361_v37 = vstv %s3571_s30  ;;  %v583_v51 = vmul.f32 %v582_v36, %v2276_v17 }
 0x148   : > { %s3576_s28 = sld [smem:[#allocation44_spill]]  ;;  %v362_v50 = vmul.f32 %v361_v37, %v2391_v39  ;;  %v417_v57 = vadd.f32 %v416_v46, %v413_v45  ;;  %v514_v45 = vadd.f32 %v513_v27, %v510_v26  ;;  %v517_v46 = vmul.f32 %v516_v32, %v2296_v30 }
 0x149   : > { %s2458_s21 = sld [smem:[#allocation2 + $0x73]] }
 0x14a   : > { %3572 = sst [smem:[#allocation56_spill]] %s2446_s26  ;;  %v2488_v63 = vadd.f32 %v362_v50, %v359_v49  ;;  %v421_v10 = vadd.f32 %v420_v58, %v417_v57  ;;  %v520_v49 = vstv %s2280_s14  ;;  %v580_v50 = vmul.f32 %v579_v35, %v2270_v14 }
 0x14b   : > { %s2461_s17 = sld [smem:[#allocation2 + $0x74]]  ;;  %v396_v44 = vstv %s3573_s11  ;;  %v586_v57 = vstv %s2371_s27  ;;  %v521_v9 = vmul.f32 %v520_v49, %v2312_v41 }
 0x14c   : > { %3574 = sst [smem:[#allocation41_spill]] %s2451_s2  ;;  %v397_v56 = vmul.f32 %v396_v44, %v2391_v39  ;;  %v485_v44 = vstv %s2246_s24  ;;  %v584_v12 = vadd.f32 %v583_v51, %v580_v50  ;;  %v587_v13 = vmul.f32 %v586_v57, %v2296_v30 }
 0x14d   : > { %3575 = sst [smem:[#allocation27_spill]] %s2455_s22 }
 0x14e   : > { %s3579_s20 = sld [smem:[#allocation66_spill]]  ;;  %v330_v53 = vstv %s3576_s28  ;;  %v2499_v6 = vadd.f32 %v397_v56, %v394_v55  ;;  %v549_v55 = vadd.f32 %v548_v34, %v545_v33  ;;  %v552_v56 = vmul.f32 %v551_v42, %v2296_v30 }
 0x14f   : > { %3577 = sst [smem:[#allocation49_spill]] %s2458_s21  ;;  %v2486_v62 = vadd.f32 %v330_v53, %v328_v47  ;;  %v458_v53 = vstv %s2226_s12  ;;  %v588_v33 = vadd.f32 %v587_v13, %v584_v12 }
 0x150   : > { %s3580_s19 = sld [smem:[#allocation67_spill]] }
 0x151   : > { %3578 = sst [smem:[#allocation34_spill]] %s2461_s17 }
 0x152   : > { %s2465_s2 = sld [smem:[#allocation2 + $0x75]] }
 0x153   : > { %s3582_s30 = sld [smem:[#allocation53_spill]] }
 0x154   : > { %s2469_s21 = sld [smem:[#allocation2 + $0x76]]  ;;  %v423_v59 = vstv %s3579_s20 }
 0x155   : > { %s3583_s22 = sld [smem:[#allocation61_spill]]  ;;  %v424_v7 = vmul.f32 %v423_v59, %v2328_v52 }
 0x156   : > { %s2472_s17 = sld [smem:[#allocation2 + $0x77]]  ;;  %v427_v60 = vstv %s3580_s19 }
 0x157   : > { %s3584_s11 = sld [smem:[#allocation68_spill]]  ;;  %v2503_v8 = vmul.f32 %v427_v60, %v2346_v1  ;;  %v2533_v28 = vadd.f32 %v424_v7, %v421_v10  ;;  %v486_v60 = vmul.f32 %v485_v44, %v2312_v41  ;;  %v518_v7 = vadd.f32 %v517_v46, %v514_v45 }
 0x158   : > { %3581 = sst [smem:[#allocation42_spill]] %s2465_s2  ;;  %v459_v10 = vmul.f32 %v458_v53, %v2328_v52 }
 0x159   : > { %s3585_s26 = sld [smem:[#allocation70_spill]]  ;;  %v365_v2 = vstv %s3582_s30  ;;  %v487_v25 = vadd.f32 %v486_v60, %v483_v4  ;;  %v522_v27 = vadd.f32 %v521_v9, %v518_v7 }
 0x15a   : > { %s2477_s2 = sld [smem:[#allocation2 + $0x9c]] }
 0x15b   : > { %s2482_s18 = sld [smem:[#allocation2 + $0x78]]  ;;  %v400_v0 = vstv %s3583_s22 }
 0x15c   : > { %s2491_s28 = sld [smem:[#allocation2 + $0x79]] }
 0x15d   : > { %v431_v3 = vstv %s3584_s11  ;;  %s2497_s20 = sld [smem:[#allocation2 + $0x7a]] }
 0x15e   : > { %s3587_s19 = sld [smem:[#allocation71_spill]]  ;;  %v2514_v15 = vmul.f32 %v431_v3, %v2391_v39  ;;  %v555_v3 = vstv %s2326_s0 }
 0x15f   : > { %v442_v5 = vstv %s3585_s26  ;;  %s2511_s16 = sld [smem:[#allocation2 + $0x7c]] }
 0x160   : > { %3586 = sst [smem:[#allocation57_spill]] %s2477_s2  ;;  %v443_v18 = vmul.f32 %v442_v5, %v2276_v17  ;;  %v489_v5 = vstv %s2250_s3 }
 0x161   : > { %s2506_s2 = sld [smem:[#allocation2 + $0x7b]]  ;;  %v490_v24 = vmul.f32 %v489_v5, %v2323_v48 }
 0x162   : > { %s3588_s26 = sld [smem:[#allocation72_spill]]  ;;  %v444_v37 = vadd.f32 %v443_v18, %v440_v16  ;;  %v553_v16 = vadd.f32 %v552_v56, %v549_v55  ;;  %v556_v18 = vmul.f32 %v555_v3, %v2312_v41 }
 0x163   : > { %s2519_s13 = sld [smem:[#allocation2 + $0x7d]]  ;;  %v491_v45 = vadd.f32 %v490_v24, %v487_v25  ;;  %v429_v25 = vadd.f32 %v2503_v8, %v2533_v28 }
 0x164   : > { %v450_v20 = vstv %s3587_s19  ;;  %s2525_s10 = sld [smem:[#allocation2 + $0x7e]]  ;;  %v448_v58 = vadd.f32 %v447_v29, %v444_v37  ;;  %v557_v35 = vadd.f32 %v556_v18, %v553_v16  ;;  %v614_v37 = vstv %s2405_s1 }
 0x165   : > { %s2531_s4 = sld [smem:[#allocation2 + $0x7f]]  ;;  %v451_v38 = vmul.f32 %v450_v20, %v2312_v41  ;;  %v615_v53 = vmul.f32 %v614_v37, %v2270_v14 }
 0x166   : > { %s2538_s7 = sld [smem:[#allocation2 + $0x9d]] }
 0x167   : > { %s2544_s29 = sld [smem:[#allocation2 + $0x80]]  ;;  %v452_v21 = vadd.f32 %v451_v38, %v448_v58 }
 0x168   : > { %v454_v31 = vstv %s3588_s26  ;;  %s2549_s25 = sld [smem:[#allocation2 + $0x81]] }
 0x169   : > { %3589 = sst [smem:[#allocation62_spill]] %s2519_s13  ;;  %v455_v47 = vmul.f32 %v454_v31, %v2323_v48 }
 0x16a   : > { %3590 = sst [smem:[#allocation63_spill]] %s2525_s10 }
 0x16b   : > { %3591 = sst [smem:[#allocation50_spill]] %s2531_s4  ;;  %v456_v40 = vadd.f32 %v455_v47, %v452_v21 }
 0x16c   : > { %3592 = sst [smem:[#allocation43_spill]] %s2538_s7 }
 0x16d   : > { %s3593_s8 = sld [smem:[#allocation73_spill]]  ;;  %v460_v60 = vadd.f32 %v459_v10, %v456_v40  ;;  %v366_v40 = vadd.f32 %v365_v2, %v2488_v63 }
 0x16e   : > { %s2553_s9 = sld [smem:[#allocation2 + $0x82]] }
 0x16f   : > { %s2559_s15 = sld [smem:[#allocation2 + $0x83]] }
 0x170   : > { %s3594_s23 = sld [smem:[#allocation80_spill]] }
 0x171   : > { %s2564_s24 = sld [smem:[#allocation2 + $0x84]] }
 0x172   : > { %s3596_s5 = sld [smem:[#allocation21_spill]] }
 0x173   : > { %v462_v59 = vstv %s3593_s8  ;;  %s3597_s14 = sld [smem:[#allocation24_spill]] }
 0x174   : > { %s2569_s6 = sld [smem:[#allocation2 + $0x85]]  ;;  %v463_v22 = vmul.f32 %v462_v59, %v2346_v1 }
 0x175   : > { %s3599_s11 = sld [smem:[#allocation74_spill]] }
 0x176   : > { %s2573_s12 = sld [smem:[#allocation2 + $0x86]]  ;;  %v524_v11 = vstv %s3594_s23 }
 0x177   : > { %3595 = sst [smem:[#allocation58_spill]] %s2564_s24  ;;  %v525_v29 = vmul.f32 %v524_v11, %v2323_v48 }
 0x178   : > { %s3601_s27 = sld [smem:[#allocation76_spill]]  ;;  %v559_v19 = vstv %s3596_s5 }
 0x179   : > { %s2578_s19 = sld [smem:[#allocation2 + $0x87]]  ;;  %v590_v20 = vstv %s3597_s14  ;;  %v560_v32 = vmul.f32 %v559_v19, %v2323_v48  ;;  %v526_v46 = vadd.f32 %v525_v29, %v522_v27 }
 0x17a   : > { %3598 = sst [smem:[#allocation64_spill]] %s2569_s6  ;;  %v591_v34 = vmul.f32 %v590_v20, %v2312_v41 }
 0x17b   : > { %s3603_s0 = sld [smem:[#allocation81_spill]]  ;;  %v466_v23 = vstv %s3599_s11  ;;  %v561_v56 = vadd.f32 %v560_v32, %v557_v35 }
 0x17c   : > { %3600 = sst [smem:[#allocation28_spill]] %s2573_s12  ;;  %v592_v51 = vadd.f32 %v591_v34, %v588_v33  ;;  %v467_v27 = vmul.f32 %v466_v23, %v2391_v39 }
 0x17d   : > { %s2583_s3 = sld [smem:[#allocation2 + $0x9e]] }
 0x17e   : > { %s3605_s26 = sld [smem:[#allocation45_spill]]  ;;  %v493_v26 = vstv %s3601_s27 }
 0x17f   : > { %3602 = sst [smem:[#allocation51_spill]] %s2578_s19  ;;  %v494_v42 = vmul.f32 %v493_v26, %v2328_v52  ;;  %v464_v26 = vadd.f32 %v463_v22, %v460_v60 }
 0x180   : > { %s3606_s8 = sld [smem:[#allocation25_spill]] }
 0x181   : > { %s2588_s23 = sld [smem:[#allocation2 + $0x88]]  ;;  %v528_v31 = vstv %s3603_s0  ;;  %v495_v7 = vadd.f32 %v494_v42, %v491_v45  ;;  %v401_v42 = vadd.f32 %v400_v0, %v2499_v6  ;;  %v468_v45 = vadd.f32 %v467_v27, %v464_v26 }
 0x182   : > { %s3607_s7 = sld [smem:[#allocation77_spill]]  ;;  %v529_v49 = vmul.f32 %v528_v31, %v2328_v52  ;;  %v2679_v6 = vmax.f32 %v2486_v62, 0.0 }
 0x183   : > { %3604 = sst [smem:[#allocation35_spill]] %s2583_s3 }
 0x184   : > { %s3608_s5 = sld [smem:[#allocation23_spill]]  ;;  %v594_v36 = vstv %s3605_s26  ;;  %v530_v9 = vadd.f32 %v529_v49, %v526_v46 }
 0x185   : > { %s2592_s14 = sld [smem:[#allocation2 + $0x89]]  ;;  %v595_v47 = vmul.f32 %v594_v36, %v2323_v48 }
 0x186   : > { %s3609_s11 = sld [smem:[#allocation29_spill]]  ;;  %v617_v38 = vstv %s3606_s8 }
 0x187   : > { %s2597_s3 = sld [smem:[#allocation2 + $0x8a]]  ;;  %v618_v55 = vmul.f32 %v617_v38, %v2276_v17  ;;  %v596_v13 = vadd.f32 %v595_v47, %v592_v51 }
 0x188   : > { %s2602_s27 = sld [smem:[#allocation2 + $0x8b]]  ;;  %v497_v43 = vstv %s3607_s7 }
 0x189   : > { %s3611_s19 = sld [smem:[#allocation46_spill]]  ;;  %v498_v3 = vmul.f32 %v497_v43, %v2346_v1  ;;  %v619_v10 = vadd.f32 %v618_v55, %v615_v53  ;;  %v433_v43 = vadd.f32 %v2514_v15, %v429_v25  ;;  %v2684_v55 = vmax.f32 %v366_v40, 0.0 }
 0x18a   : > { %s3612_s0 = sld [smem:[#allocation47_spill]]  ;;  %v563_v44 = vstv %s3608_s5 }
 0x18b   : > { %s2607_s12 = sld [smem:[#allocation2 + $0x8c]]  ;;  %v564_v57 = vmul.f32 %v563_v44, %v2328_v52  ;;  %v499_v31 = vadd.f32 %v498_v3, %v495_v7 }
 0x18c   : > { %s3614_s4 = sld [smem:[#allocation78_spill]]  ;;  %v532_v50 = vstv %s3609_s11 }
 0x18d   : > { %s3615_s6 = sld [smem:[#allocation30_spill]]  ;;  %v533_v11 = vmul.f32 %v532_v50, %v2346_v1  ;;  %v565_v19 = vadd.f32 %v564_v57, %v561_v56 }
 0x18e   : > { %3610 = sst [smem:[#allocation59_spill]] %s2602_s27 }
 0x18f   : > { %s2611_s1 = sld [smem:[#allocation2 + $0x8d]]  ;;  %v598_v58 = vstv %s3611_s19  ;;  %v534_v33 = vadd.f32 %v533_v11, %v530_v9 }
 0x190   : > { %s3617_s7 = sld [smem:[#allocation36_spill]]  ;;  %v621_v59 = vstv %s3612_s0  ;;  %v599_v16 = vmul.f32 %v598_v58, %v2328_v52 }
 0x191   : > { %3613 = sst [smem:[#allocation65_spill]] %s2607_s12  ;;  %v622_v18 = vmul.f32 %v621_v59, %v2296_v30 }
 0x192   : > { %s2616_s26 = sld [smem:[#allocation2 + $0x8e]]  ;;  %v501_v4 = vstv %s3614_s4  ;;  %v600_v8 = vadd.f32 %v599_v16, %v596_v13 }
 0x193   : > { %s2621_s8 = sld [smem:[#allocation2 + $0x8f]]  ;;  %v567_v5 = vstv %s3615_s6  ;;  %v502_v32 = vmul.f32 %v501_v4, %v2391_v39  ;;  %v623_v22 = vadd.f32 %v622_v18, %v619_v10  ;;  %v2694_v4 = vmax.f32 %v401_v42, 0.0 }
 0x194   : > { %s3620_s5 = sld [smem:[#allocation31_spill]]  ;;  %v568_v20 = vmul.f32 %v567_v5, %v2346_v1 }
 0x195   : > { %3616 = sst [smem:[#allocation52_spill]] %s2611_s1  ;;  %v503_v49 = vadd.f32 %v502_v32, %v499_v31 }
 0x196   : > { %s3621_s11 = sld [smem:[#allocation32_spill]]  ;;  %v536_v12 = vstv %s3617_s7  ;;  %v569_v35 = vadd.f32 %v568_v20, %v565_v19 }
 0x197   : > { %s2626_s1 = sld [smem:[#allocation2 + $0x9f]]  ;;  %v537_v34 = vmul.f32 %v536_v12, %v2391_v39 }
 0x198   : > { %3618 = sst [smem:[#allocation60_spill]] %s2616_s26 }
 0x199   : > { %3619 = sst [smem:[#allocation44_spill]] %s2621_s8  ;;  %v538_v15 = vadd.f32 %v537_v34, %v534_v33 }
 0x19a   : > { %s3623_s26 = sld [smem:[#allocation22_spill]]  ;;  %v602_v21 = vstv %s3620_s5 }
 0x19b   : > { %s2630_s10 = sld [smem:[#allocation2 + $0xa0]]  ;;  %v603_v28 = vmul.f32 %v602_v21, %v2346_v1 }
 0x19c   : > { %s2634_s19 = sld [smem:[#allocation2 + $0xa1]]  ;;  %v625_v24 = vstv %s3621_s11 }
 0x19d   : > { %3622 = sst [smem:[#allocation66_spill]] %s2626_s1  ;;  %v626_v23 = vmul.f32 %v625_v24, %v2312_v41  ;;  %v604_v51 = vadd.f32 %v603_v28, %v600_v8 }
 0x19e   : > { %s2639_s4 = sld [smem:[#allocation2 + $0xa2]] }
 0x19f   : > { %s3624_s6 = sld [smem:[#allocation54_spill]]  ;;  %v627_v2 = vadd.f32 %v626_v23, %v623_v22 }
 0x1a0   : > { %s3625_s0 = sld [smem:[#allocation55_spill]]  ;;  %v571_v29 = vstv %s3623_s26 }
 0x1a1   : > { %s2645_s7 = sld [smem:[#allocation2 + $0xa3]]  ;;  %v572_v36 = vmul.f32 %v571_v29, %v2391_v39  ;;  %v789_v19 = vstv %s2630_s10 }
 0x1a2   : > { %s3626_s5 = sld [smem:[#allocation69_spill]]  ;;  %v792_v20 = vstv %s2634_s19  ;;  %v790_v8 = vmul.f32 %v789_v19, %v2474_v54  ;;  %v695_v19 = vstv %s2506_s2 }
 0x1a3   : > { %s2649_s11 = sld [smem:[#allocation2 + $0xa4]]  ;;  %v573_v47 = vadd.f32 %v572_v36, %v569_v35  ;;  %v793_v28 = vmul.f32 %v792_v20, %v2484_v61 }
 0x1a4   : > { %s3627_s1 = sld [smem:[#allocation75_spill]]  ;;  %v796_v36 = vstv %s2639_s4 }
 0x1a5   : > { %s3628_s26 = sld [smem:[#allocation79_spill]]  ;;  %v606_v37 = vstv %s3624_s6 }
 0x1a6   : > { %s2653_s8 = sld [smem:[#allocation2 + $0xa5]]  ;;  %v629_v38 = vstv %s3625_s0  ;;  %v607_v63 = vmul.f32 %v606_v37, %v2391_v39 }
 0x1a7   : > { %s2658_s12 = sld [smem:[#allocation2 + $0xa6]]  ;;  %v630_v0 = vmul.f32 %v629_v38, %v2323_v48 }
 0x1a8   : > { %s3630_s24 = sld [smem:[#allocation40_spill]]  ;;  %v435_v44 = vstv %s3626_s5  ;;  %v608_v5 = vadd.f32 %v607_v63, %v604_v51  ;;  %v794_v51 = vadd.f32 %v793_v28, %v790_v8  ;;  %v797_v63 = vmul.f32 %v796_v36, %v2679_v6 }
 0x1a9   : > { %s2668_s13 = sld [smem:[#allocation2 + $0xa7]]  ;;  %v436_v56 = vadd.f32 %v435_v44, %v433_v43  ;;  %v631_v7 = vadd.f32 %v630_v0, %v627_v2  ;;  %v696_v36 = vmul.f32 %v695_v19, %v2312_v41 }
 0x1aa   : > { %v470_v46 = vstv %s3627_s1  ;;  %s3631_s27 = sld [smem:[#allocation37_spill]] }
 0x1ab   : > { %s3632_s6 = sld [smem:[#allocation38_spill]]  ;;  %v505_v50 = vstv %s3628_s26  ;;  %v471_v59 = vadd.f32 %v470_v46, %v468_v45  ;;  %v2709_v21 = vmax.f32 %v436_v56, 0.0  ;;  %v684_v45 = vstv %s2482_s18 }
 0x1ac   : > { %s2672_s0 = sld [smem:[#allocation2 + $0xa8]]  ;;  %v506_v60 = vadd.f32 %v505_v50, %v503_v49  ;;  %v687_v46 = vstv %s2491_s28  ;;  %v672_v50 = vstv %s2469_s21  ;;  %v685_v56 = vmul.f32 %v684_v45, %v2270_v14 }
 0x1ad   : > { %3629 = sst [smem:[#allocation67_spill]] %s2658_s12  ;;  %v2711_v24 = vmax.f32 %v471_v59, 0.0 }
 0x1ae   : > { %s3634_s30 = sld [smem:[#allocation56_spill]]  ;;  %v633_v53 = vstv %s3630_s24  ;;  %v2713_v25 = vmax.f32 %v506_v60, 0.0  ;;  %v2768_v60 = vmul.f32 %v672_v50, %v2346_v1 }
 0x1af   : > { %s3635_s22 = sld [smem:[#allocation41_spill]]  ;;  %v634_v9 = vmul.f32 %v633_v53, %v2328_v52  ;;  %v676_v53 = vstv %s2472_s17 }
 0x1b0   : > { %s2676_s12 = sld [smem:[#allocation2 + $0xa9]]  ;;  %v540_v57 = vstv %s3631_s27 }
 0x1b1   : > { %s2682_s1 = sld [smem:[#allocation2 + $0xaa]]  ;;  %v575_v58 = vstv %s3632_s6  ;;  %v541_v11 = vadd.f32 %v540_v57, %v538_v15  ;;  %v635_v29 = vadd.f32 %v634_v9, %v631_v7  ;;  %v688_v57 = vmul.f32 %v687_v46, %v2276_v17 }
 0x1b2   : > { %3633 = sst [smem:[#allocation53_spill]] %s2672_s0  ;;  %v576_v12 = vadd.f32 %v575_v58, %v573_v47  ;;  %v800_v47 = vstv %s2645_s7  ;;  %v691_v58 = vstv %s2497_s20  ;;  %v757_v7 = vstv %s2592_s14 }
 0x1b3   : > { %s3637_s5 = sld [smem:[#allocation39_spill]]  ;;  %v2722_v33 = vmax.f32 %v541_v11, 0.0  ;;  %v798_v9 = vadd.f32 %v797_v63, %v794_v51  ;;  %v801_v11 = vmul.f32 %v800_v47, %v2684_v55 }
 0x1b4   : > { %s3638_s26 = sld [smem:[#allocation26_spill]]  ;;  %v649_v3 = vstv %s3634_s30  ;;  %v2724_v34 = vmax.f32 %v576_v12, 0.0 }
 0x1b5   : > { %s2688_s0 = sld [smem:[#allocation2 + $0xab]]  ;;  %v652_v62 = vstv %s3635_s22  ;;  %v650_v10 = vmul.f32 %v649_v3, %v2270_v14  ;;  %v719_v3 = vstv %s2544_s29  ;;  %v802_v8 = vadd.f32 %v801_v11, %v798_v9 }
 0x1b6   : > { %3636 = sst [smem:[#allocation61_spill]] %s2676_s12  ;;  %v653_v18 = vmul.f32 %v652_v62, %v2276_v17  ;;  %v722_v62 = vstv %s2549_s25  ;;  %v720_v20 = vmul.f32 %v719_v3, %v2270_v14 }
 0x1b7   : > { %s2692_s12 = sld [smem:[#allocation2 + $0xac]] }
 0x1b8   : > { %s3640_s24 = sld [smem:[#allocation27_spill]]  ;;  %v654_v22 = vadd.f32 %v653_v18, %v650_v10  ;;  %v804_v10 = vstv %s2649_s11  ;;  %v689_v18 = vadd.f32 %v688_v57, %v685_v56 }
 0x1b9   : > { %s2697_s27 = sld [smem:[#allocation2 + $0xad]]  ;;  %v610_v13 = vstv %s3637_s5  ;;  %v805_v28 = vmul.f32 %v804_v10, %v2694_v4 }
 0x1ba   : > { %s3641_s6 = sld [smem:[#allocation48_spill]]  ;;  %v637_v16 = vstv %s3638_s26  ;;  %v611_v27 = vadd.f32 %v610_v13, %v608_v5  ;;  %v754_v5 = vstv %s2588_s23  ;;  %v2780_v13 = vmul.f32 %v676_v53, %v2391_v39 }
 0x1bb   : > { %3639 = sst [smem:[#allocation68_spill]] %s2688_s0  ;;  %v638_v31 = vmul.f32 %v637_v16, %v2346_v1  ;;  %v692_v16 = vmul.f32 %v691_v58, %v2296_v30  ;;  %v806_v63 = vadd.f32 %v805_v28, %v802_v8 }
 0x1bc   : > { %s2701_s0 = sld [smem:[#allocation2 + $0xae]]  ;;  %v2741_v43 = vmax.f32 %v611_v27, 0.0  ;;  %v726_v27 = vstv %s2553_s9 }
 0x1bd   : > { %s2707_s30 = sld [smem:[#allocation2 + $0xaf]]  ;;  %v639_v44 = vadd.f32 %v638_v31, %v635_v29  ;;  %v755_v29 = vmul.f32 %v754_v5, %v2270_v14  ;;  %v758_v31 = vmul.f32 %v757_v7, %v2276_v17  ;;  %v808_v14 = vstv %s2653_s8 }
 0x1be   : > { %s3644_s22 = sld [smem:[#allocation49_spill]]  ;;  %v656_v26 = vstv %s3640_s24 }
 0x1bf   : > { %s2716_s5 = sld [smem:[#allocation2 + $0x120]]  ;;  %v657_v23 = vmul.f32 %v656_v26, %v2296_v30  ;;  %v723_v26 = vmul.f32 %v722_v62, %v2276_v17  ;;  %v693_v17 = vadd.f32 %v692_v16, %v689_v18  ;;  %v759_v51 = vadd.f32 %v758_v31, %v755_v29 }
 0x1c0   : > { %s3646_s26 = sld [smem:[#allocation33_spill]]  ;;  %v641_v32 = vstv %s3641_s6 }
 0x1c1   : > { %s3648_s10 = sld [smem:[#allocation42_spill]]  ;;  %v642_v37 = vmul.f32 %v641_v32, %v2391_v39  ;;  %v658_v2 = vadd.f32 %v657_v23, %v654_v22  ;;  %v761_v32 = vstv %s2597_s3  ;;  %v697_v58 = vadd.f32 %v696_v36, %v693_v17 }
 0x1c2   : > { %3642 = sst [smem:[#allocation70_spill]] %s2701_s0  ;;  %v762_v45 = vmul.f32 %v761_v32, %v2296_v30 }
 0x1c3   : > { %3643 = sst [smem:[#allocation71_spill]] %s2707_s30  ;;  %v2765_v59 = vadd.f32 %v642_v37, %v639_v44  ;;  %v699_v37 = vstv %s2511_s16  ;;  %v730_v44 = vstv %s2559_s15 }
 0x1c4   : > { %s3647_s0 = sld [smem:[#allocation34_spill]]  ;;  %v660_v35 = vstv %s3644_s22  ;;  %v700_v56 = vmul.f32 %v699_v37, %v2323_v48  ;;  %v731_v62 = vmul.f32 %v730_v44, %v2312_v41 }
 0x1c5   : > { %3645 = sst [smem:[#allocation72_spill]] %s2716_s5  ;;  %v661_v49 = vmul.f32 %v660_v35, %v2312_v41 }
 0x1c6   : > { %s2720_s19 = sld [smem:[#allocation2 + $0xb0]]  ;;  %v645_v38 = vstv %s3646_s26 }
 0x1c7   : > { %s2728_s24 = sld [smem:[#allocation2 + $0xb1]]  ;;  %v668_v42 = vstv %s3648_s10  ;;  %v662_v12 = vadd.f32 %v661_v49, %v658_v2  ;;  %v809_v2 = vmul.f32 %v808_v14, %v2709_v21 }
 0x1c8   : > { %s2733_s6 = sld [smem:[#allocation2 + $0xb2]]  ;;  %v2754_v15 = vmul.f32 %v668_v42, %v2328_v52  ;;  %v727_v42 = vmul.f32 %v726_v27, %v2296_v30  ;;  %v701_v27 = vadd.f32 %v700_v56, %v697_v58 }
 0x1c9   : > { %s2739_s5 = sld [smem:[#allocation2 + $0xb3]]  ;;  %v810_v16 = vadd.f32 %v809_v2, %v806_v63 }
 0x1ca   : > { %v664_v40 = vstv %s3647_s0  ;;  %s2745_s30 = sld [smem:[#allocation2 + $0xb4]] }
 0x1cb   : > { %s2750_s4 = sld [smem:[#allocation2 + $0xb5]]  ;;  %v665_v0 = vmul.f32 %v664_v40, %v2323_v48  ;;  %v724_v40 = vadd.f32 %v723_v26, %v720_v20  ;;  %v816_v26 = vstv %s2668_s13 }
 0x1cc   : > { %s2757_s18 = sld [smem:[#allocation2 + $0xb6]]  ;;  %v856_v22 = vstv %s2720_s19  ;;  %v817_v37 = vmul.f32 %v816_v26, %v2713_v25 }
 0x1cd   : > { %s2763_s21 = sld [smem:[#allocation2 + $0xb7]]  ;;  %v859_v23 = vstv %s2728_s24  ;;  %v857_v49 = vmul.f32 %v856_v22, %v2474_v54  ;;  %v666_v53 = vadd.f32 %v665_v0, %v662_v12  ;;  %v728_v3 = vadd.f32 %v727_v42, %v724_v40 }
 0x1ce   : > { %s2772_s28 = sld [smem:[#allocation2 + $0xb8]]  ;;  %v860_v50 = vmul.f32 %v859_v23, %v2484_v61  ;;  %v863_v47 = vstv %s2733_s6  ;;  %v763_v12 = vadd.f32 %v762_v45, %v759_v51 }
 0x1cf   : > { %s2777_s17 = sld [smem:[#allocation2 + $0xb9]]  ;;  %v864_v11 = vmul.f32 %v863_v47, %v2679_v6  ;;  %v867_v18 = vstv %s2739_s5  ;;  %v670_v19 = vadd.f32 %v2754_v15, %v666_v53  ;;  %v732_v29 = vadd.f32 %v731_v62, %v728_v3 }
 0x1d0   : > { %s2784_s20 = sld [smem:[#allocation2 + $0xba]]  ;;  %v861_v0 = vadd.f32 %v860_v50, %v857_v49  ;;  %v868_v22 = vmul.f32 %v867_v18, %v2684_v55  ;;  %v871_v14 = vstv %s2745_s30  ;;  %v828_v18 = vstv %s2682_s1 }
 0x1d1   : > { %s3649_s29 = sld [smem:[#allocation57_spill]]  ;;  %v674_v17 = vadd.f32 %v2768_v60, %v670_v19  ;;  %v872_v63 = vmul.f32 %v871_v14, %v2694_v4  ;;  %v875_v56 = vstv %s2750_s4 }
 0x1d2   : > { %s2789_s25 = sld [smem:[#allocation2 + $0xbb]]  ;;  %v865_v15 = vadd.f32 %v864_v11, %v861_v0 }
 0x1d3   : > { %s2795_s23 = sld [smem:[#allocation2 + $0xbc]] }
 0x1d4   : > { %s3650_s2 = sld [smem:[#allocation59_spill]]  ;;  %v869_v60 = vadd.f32 %v868_v22, %v865_v15  ;;  %v883_v15 = vstv %s2763_s21 }
 0x1d5   : > { %s2800_s14 = sld [smem:[#allocation2 + $0xbd]] }
 0x1d6   : > { %s2806_s9 = sld [smem:[#allocation2 + $0xbe]] }
 0x1d7   : > { %v680_v35 = vstv %s3649_s29  ;;  %s3651_s3 = sld [smem:[#allocation62_spill]] }
 0x1d8   : > { %s3652_s7 = sld [smem:[#allocation67_spill]] }
 0x1d9   : > { %s2810_s11 = sld [smem:[#allocation2 + $0xbf]] }
 0x1da   : > { %v765_v46 = vstv %s3650_s2  ;;  %s3654_s16 = sld [smem:[#allocation58_spill]] }
 0x1db   : > { %s2816_s8 = sld [smem:[#allocation2 + $0x121]]  ;;  %v766_v7 = vmul.f32 %v765_v46, %v2312_v41 }
 0x1dc   : > { %s3656_s0 = sld [smem:[#allocation65_spill]] }
 0x1dd   : > { %s2820_s22 = sld [smem:[#allocation2 + $0xc0]]  ;;  %v703_v30 = vstv %s3651_s3  ;;  %v767_v23 = vadd.f32 %v766_v7, %v763_v12 }
 0x1de   : > { %v812_v57 = vstv %s3652_s7  ;;  %s2825_s15 = sld [smem:[#allocation2 + $0xc1]]  ;;  %v704_v20 = vmul.f32 %v703_v30, %v2328_v52  ;;  %v646_v30 = vadd.f32 %v645_v38, %v2765_v59  ;;  %v873_v59 = vadd.f32 %v872_v63, %v869_v60 }
 0x1df   : > { %3653 = sst [smem:[#allocation73_spill]] %s2810_s11  ;;  %v813_v10 = vmul.f32 %v812_v57, %v2711_v24 }
 0x1e0   : > { %s3657_s10 = sld [smem:[#allocation63_spill]]  ;;  %v734_v5 = vstv %s3654_s16  ;;  %v705_v44 = vadd.f32 %v704_v20, %v701_v27 }
 0x1e1   : > { %3655 = sst [smem:[#allocation80_spill]] %s2816_s8  ;;  %v735_v31 = vmul.f32 %v734_v5, %v2323_v48  ;;  %v814_v36 = vadd.f32 %v813_v10, %v810_v16  ;;  %v879_v16 = vstv %s2757_s18  ;;  %v2899_v10 = vmax.f32 %v646_v30, 0.0 }
 0x1e2   : > { %s2829_s19 = sld [smem:[#allocation2 + $0xc2]]  ;;  %v769_v9 = vstv %s3656_s0 }
 0x1e3   : > { %s3658_s24 = sld [smem:[#allocation64_spill]]  ;;  %v770_v8 = vmul.f32 %v769_v9, %v2323_v48  ;;  %v736_v45 = vadd.f32 %v735_v31, %v732_v29  ;;  %v818_v47 = vadd.f32 %v817_v37, %v814_v36  ;;  %v880_v31 = vmul.f32 %v879_v16, %v2711_v24 }
 0x1e4   : > { %s2834_s6 = sld [smem:[#allocation2 + $0xc3]]  ;;  %v926_v36 = vstv %s2825_s15 }
 0x1e5   : > { %s3659_s2 = sld [smem:[#allocation52_spill]]  ;;  %v771_v2 = vadd.f32 %v770_v8, %v767_v23  ;;  %v923_v23 = vstv %s2820_s22 }
 0x1e6   : > { %s2838_s3 = sld [smem:[#allocation2 + $0xc4]]  ;;  %v707_v41 = vstv %s3657_s10 }
 0x1e7   : > { %s2844_s7 = sld [smem:[#allocation2 + $0xc5]]  ;;  %v708_v40 = vmul.f32 %v707_v41, %v2346_v1 }
 0x1e8   : > { %s3660_s16 = sld [smem:[#allocation50_spill]] }
 0x1e9   : > { %s3661_s0 = sld [smem:[#allocation53_spill]]  ;;  %v738_v32 = vstv %s3658_s24  ;;  %v709_v3 = vadd.f32 %v708_v40, %v705_v44  ;;  %v884_v40 = vmul.f32 %v883_v15, %v2713_v25 }
 0x1ea   : > { %s2848_s8 = sld [smem:[#allocation2 + $0xc6]]  ;;  %v739_v46 = vmul.f32 %v738_v32, %v2328_v52 }
 0x1eb   : > { %v773_v28 = vstv %s3659_s2  ;;  %s3662_s5 = sld [smem:[#allocation28_spill]] }
 0x1ec   : > { %s2853_s10 = sld [smem:[#allocation2 + $0xc7]]  ;;  %v774_v50 = vmul.f32 %v773_v28, %v2328_v52  ;;  %v678_v52 = vadd.f32 %v2780_v13, %v674_v17  ;;  %v740_v62 = vadd.f32 %v739_v46, %v736_v45  ;;  %v876_v13 = vmul.f32 %v875_v56, %v2709_v21 }
 0x1ed   : > { %s3664_s13 = sld [smem:[#allocation60_spill]]  ;;  %v829_v28 = vmul.f32 %v828_v18, %v2741_v43  ;;  %v887_v45 = vstv %s2772_s28 }
 0x1ee   : > { %s2857_s11 = sld [smem:[#allocation2 + $0xc8]]  ;;  %v711_v48 = vstv %s3660_s16  ;;  %v775_v0 = vadd.f32 %v774_v50, %v771_v2  ;;  %v681_v26 = vadd.f32 %v680_v35, %v678_v52  ;;  %v877_v29 = vadd.f32 %v876_v13, %v873_v59 }
 0x1ef   : > { %v820_v42 = vstv %s3661_s0  ;;  %s2863_s24 = sld [smem:[#allocation2 + $0xc9]]  ;;  %v712_v57 = vmul.f32 %v711_v48, %v2391_v39  ;;  %v924_v50 = vmul.f32 %v923_v23, %v2474_v54  ;;  %v930_v2 = vstv %s2829_s19 }
 0x1f0   : > { %s3666_s2 = sld [smem:[#allocation61_spill]]  ;;  %v821_v53 = vmul.f32 %v820_v42, %v2722_v33  ;;  %v2925_v37 = vmax.f32 %v681_v26, 0.0  ;;  %v881_v17 = vadd.f32 %v880_v31, %v877_v29  ;;  %v899_v29 = vstv %s2789_s25 }
 0x1f1   : > { %v742_v49 = vstv %s3662_s5  ;;  %s3667_s30 = sld [smem:[#allocation51_spill]]  ;;  %v938_v31 = vstv %s2838_s3 }
 0x1f2   : > { %3663 = sst [smem:[#allocation21_spill]] %s2853_s10  ;;  %v743_v5 = vmul.f32 %v742_v49, %v2346_v1  ;;  %v822_v11 = vadd.f32 %v821_v53, %v818_v47  ;;  %v836_v49 = vstv %s2692_s12  ;;  %v885_v47 = vadd.f32 %v884_v40, %v881_v17 }
 0x1f3   : > { %s2867_s10 = sld [smem:[#allocation2 + $0xca]]  ;;  %v777_v51 = vstv %s3664_s13  ;;  %v888_v53 = vmul.f32 %v887_v45, %v2722_v33  ;;  %v939_v17 = vmul.f32 %v938_v31, %v2694_v4  ;;  %v942_v40 = vstv %s2844_s7 }
 0x1f4   : > { %s2872_s16 = sld [smem:[#allocation2 + $0xcb]]  ;;  %v778_v9 = vmul.f32 %v777_v51, %v2346_v1  ;;  %v713_v1 = vadd.f32 %v712_v57, %v709_v3  ;;  %v744_v20 = vadd.f32 %v743_v5, %v740_v62  ;;  %v927_v51 = vmul.f32 %v926_v36, %v2484_v61 }
 0x1f5   : > { %3665 = sst [smem:[#allocation24_spill]] %s2863_s24  ;;  %v891_v3 = vstv %s2777_s17  ;;  %v840_v62 = vstv %s2697_s27  ;;  %v900_v36 = vmul.f32 %v899_v29, %v2899_v10 }
 0x1f6   : > { %s3668_s0 = sld [smem:[#allocation44_spill]]  ;;  %v824_v58 = vstv %s3666_s2  ;;  %v779_v32 = vadd.f32 %v778_v9, %v775_v0  ;;  %v928_v5 = vadd.f32 %v927_v51, %v924_v50  ;;  %v934_v9 = vstv %s2834_s6 }
 0x1f7   : > { %s2876_s24 = sld [smem:[#allocation2 + $0xcc]]  ;;  %v746_v7 = vstv %s3667_s30  ;;  %v825_v12 = vmul.f32 %v824_v58, %v2724_v34  ;;  %v837_v58 = vmul.f32 %v836_v49, %v2925_v37  ;;  %v889_v0 = vadd.f32 %v888_v53, %v885_v47 }
 0x1f8   : > { %s2884_s5 = sld [smem:[#allocation2 + $0xcd]]  ;;  %v747_v41 = vmul.f32 %v746_v7, %v2391_v39  ;;  %v931_v7 = vmul.f32 %v930_v2, %v2679_v6  ;;  %v903_v49 = vstv %s2795_s23  ;;  %v946_v2 = vstv %s2848_s8 }
 0x1f9   : > { %s3669_s4 = sld [smem:[#allocation43_spill]]  ;;  %v826_v8 = vadd.f32 %v825_v12, %v822_v11  ;;  %v892_v11 = vmul.f32 %v891_v3, %v2724_v34 }
 0x1fa   : > { %s2888_s13 = sld [smem:[#allocation2 + $0xce]]  ;;  %v932_v26 = vadd.f32 %v931_v7, %v928_v5 }
 0x1fb   : > { %s2893_s26 = sld [smem:[#allocation2 + $0xcf]]  ;;  %v830_v42 = vadd.f32 %v829_v28, %v826_v8  ;;  %v893_v28 = vadd.f32 %v892_v11, %v889_v0  ;;  %v911_v11 = vstv %s2806_s9 }
 0x1fc   : > { %v781_v38 = vstv %s3668_s0  ;;  %s2897_s2 = sld [smem:[#allocation2 + $0x122]] }
 0x1fd   : > { %s2902_s30 = sld [smem:[#allocation2 + $0xd0]]  ;;  %v782_v27 = vmul.f32 %v781_v38, %v2391_v39  ;;  %v748_v39 = vadd.f32 %v747_v41, %v744_v20 }
 0x1fe   : > { %s3673_s0 = sld [smem:[#allocation68_spill]] }
 0x1ff   : > { %v715_v19 = vstv %s3669_s4  ;;  %s3674_s18 = sld [smem:[#allocation35_spill]]  ;;  %v783_v48 = vadd.f32 %v782_v27, %v779_v32  ;;  %v935_v27 = vmul.f32 %v934_v9, %v2684_v55  ;;  %v904_v9 = vmul.f32 %v903_v49, %v2925_v37 }
 0x200   : > { %3670 = sst [smem:[#allocation74_spill]] %s2888_s13  ;;  %v716_v35 = vadd.f32 %v715_v19, %v713_v1  ;;  %v895_v19 = vstv %s2784_s20  ;;  %v962_v49 = vstv %s2867_s10 }
 0x201   : > { %3671 = sst [smem:[#allocation76_spill]] %s2893_s26  ;;  %v896_v15 = vmul.f32 %v895_v19, %v2741_v43  ;;  %v947_v19 = vmul.f32 %v946_v2, %v2711_v24 }
 0x202   : > { %3672 = sst [smem:[#allocation81_spill]] %s2897_s2  ;;  %v2941_v60 = vmax.f32 %v716_v35, 0.0 }
 0x203   : > { %s2906_s26 = sld [smem:[#allocation2 + $0xd1]]  ;;  %v990_v56 = vstv %s2902_s30 }
 0x204   : > { %s2912_s1 = sld [smem:[#allocation2 + $0xd2]]  ;;  %v832_v22 = vstv %s3673_s0  ;;  %v991_v38 = vmul.f32 %v990_v56, %v2474_v54  ;;  %v841_v1 = vmul.f32 %v840_v62, %v2941_v60 }
 0x205   : > { %s2916_s4 = sld [smem:[#allocation2 + $0xd3]]  ;;  %v750_v14 = vstv %s3674_s18  ;;  %v833_v44 = vmul.f32 %v832_v22, %v2899_v10 }
 0x206   : > { %s2919_s29 = sld [smem:[#allocation2 + $0xd4]]  ;;  %v751_v63 = vadd.f32 %v750_v14, %v748_v39  ;;  %v936_v14 = vadd.f32 %v935_v27, %v932_v26 }
 0x207   : > { %s3675_s2 = sld [smem:[#allocation66_spill]]  ;;  %v834_v57 = vadd.f32 %v833_v44, %v830_v42 }
 0x208   : > { %s2923_s13 = sld [smem:[#allocation2 + $0xd5]]  ;;  %v2964_v13 = vmax.f32 %v751_v63, 0.0  ;;  %v943_v63 = vmul.f32 %v942_v40, %v2709_v21  ;;  %v940_v56 = vadd.f32 %v939_v17, %v936_v14  ;;  %v954_v17 = vstv %s2857_s11 }
 0x209   : > { %s2929_s21 = sld [smem:[#allocation2 + $0xd6]]  ;;  %v993_v30 = vstv %s2906_s26  ;;  %v838_v18 = vadd.f32 %v837_v58, %v834_v57  ;;  %v955_v2 = vmul.f32 %v954_v17, %v2722_v33 }
 0x20a   : > { %s2933_s22 = sld [smem:[#allocation2 + $0xd7]]  ;;  %v994_v59 = vmul.f32 %v993_v30, %v2484_v61  ;;  %v997_v12 = vstv %s2912_s1 }
 0x20b   : > { %s2939_s15 = sld [smem:[#allocation2 + $0xd8]]  ;;  %v998_v8 = vmul.f32 %v997_v12, %v2679_v6  ;;  %v1001_v22 = vstv %s2916_s4  ;;  %v842_v35 = vadd.f32 %v841_v1, %v838_v18  ;;  %v944_v1 = vadd.f32 %v943_v63, %v940_v56 }
 0x20c   : > { %s2944_s0 = sld [smem:[#allocation2 + $0xd9]]  ;;  %v995_v32 = vadd.f32 %v994_v59, %v991_v38  ;;  %v1002_v42 = vmul.f32 %v1001_v22, %v2684_v55  ;;  %v1005_v44 = vstv %s2919_s29  ;;  %v907_v38 = vstv %s2800_s14 }
 0x20d   : > { %v785_v46 = vstv %s3675_s2  ;;  %s2949_s12 = sld [smem:[#allocation2 + $0xda]]  ;;  %v1006_v30 = vmul.f32 %v1005_v44, %v2694_v4  ;;  %v912_v22 = vmul.f32 %v911_v11, %v2964_v13  ;;  %v948_v14 = vadd.f32 %v947_v19, %v944_v1 }
 0x20e   : > { %v786_v52 = vadd.f32 %v785_v46, %v783_v48  ;;  %s2953_s28 = sld [smem:[#allocation2 + $0xdb]]  ;;  %v999_v48 = vadd.f32 %v998_v8, %v995_v32  ;;  %v897_v46 = vadd.f32 %v896_v15, %v893_v28  ;;  %v1009_v59 = vstv %s2923_s13 }
 0x20f   : > { %s3676_s19 = sld [smem:[#allocation70_spill]]  ;;  %v1010_v29 = vmul.f32 %v1009_v59, %v2709_v21  ;;  %v908_v8 = vmul.f32 %v907_v38, %v2941_v60  ;;  %v1013_v15 = vstv %s2929_s21 }
 0x210   : > { %s2957_s2 = sld [smem:[#allocation2 + $0xdc]]  ;;  %v2970_v16 = vmax.f32 %v786_v52, 0.0  ;;  %v1003_v58 = vadd.f32 %v1002_v42, %v999_v48  ;;  %v901_v0 = vadd.f32 %v900_v36, %v897_v46 }
 0x211   : > { %s3677_s30 = sld [smem:[#allocation71_spill]]  ;;  %v1021_v38 = vstv %s2939_s15 }
 0x212   : > { %s2962_s26 = sld [smem:[#allocation2 + $0xdd]]  ;;  %v1007_v27 = vadd.f32 %v1006_v30, %v1003_v58  ;;  %v3080_v58 = vmul.f32 %v962_v49, %v2741_v43 }
 0x213   : > { %s2968_s27 = sld [smem:[#allocation2 + $0xde]] }
 0x214   : > { %s2974_s17 = sld [smem:[#allocation2 + $0xe0]]  ;;  %v1011_v44 = vadd.f32 %v1010_v29, %v1007_v27  ;;  %v1022_v27 = vmul.f32 %v1021_v38, %v2722_v33 }
 0x215   : > { %v844_v20 = vstv %s3676_s19  ;;  %s2979_s6 = sld [smem:[#allocation2 + $0xe1]] }
 0x216   : > { %s2984_s18 = sld [smem:[#allocation2 + $0xe2]]  ;;  %v845_v39 = vmul.f32 %v844_v20, %v2964_v13 }
 0x217   : > { %v848_v41 = vstv %s3677_s30  ;;  %s2988_s20 = sld [smem:[#allocation2 + $0xe3]] }
 0x218   : > { %v849_v23 = vmul.f32 %v848_v41, %v2970_v16  ;;  %s2992_s25 = sld [smem:[#allocation2 + $0xe4]]  ;;  %v846_v7 = vadd.f32 %v845_v39, %v842_v35 }
 0x219   : > { %s2997_s3 = sld [smem:[#allocation2 + $0xe5]] }
 0x21a   : > { %s3001_s1 = sld [smem:[#allocation2 + $0xdf]]  ;;  %v1057_v45 = vstv %s2974_s17  ;;  %v850_v32 = vadd.f32 %v849_v23, %v846_v7  ;;  %v905_v23 = vadd.f32 %v904_v9, %v901_v0  ;;  %v970_v7 = vstv %s2876_s24 }
 0x21b   : > { %s3005_s4 = sld [smem:[#allocation2 + $0x123]]  ;;  %v1058_v50 = vmul.f32 %v1057_v45, %v2474_v54  ;;  %v1060_v51 = vstv %s2979_s6  ;;  %v1014_v45 = vmul.f32 %v1013_v15, %v2711_v24  ;;  %v974_v9 = vstv %s2884_s5 }
 0x21c   : > { %v1061_v47 = vmul.f32 %v1060_v51, %v2484_v61  ;;  %v1064_v53 = vstv %s2984_s18  ;;  %s3013_s7 = sld [smem:[#allocation2 + $0xe6]]  ;;  %v1017_v51 = vstv %s2933_s22  ;;  %v909_v56 = vadd.f32 %v908_v8, %v905_v23 }
 0x21d   : > { %v1065_v52 = vmul.f32 %v1064_v53, %v2679_v6  ;;  %v1068_v57 = vstv %s2988_s20  ;;  %s3018_s23 = sld [smem:[#allocation2 + $0xe7]] }
 0x21e   : > { %v1062_v3 = vadd.f32 %v1061_v47, %v1058_v50  ;;  %s3678_s8 = sld [smem:[#allocation21_spill]]  ;;  %v1069_v62 = vmul.f32 %v1068_v57, %v2684_v55  ;;  %v1072_v5 = vstv %s2992_s25  ;;  %v966_v50 = vstv %s2872_s16 }
 0x21f   : > { %s3022_s29 = sld [smem:[#allocation2 + $0xe8]]  ;;  %v1073_v18 = vmul.f32 %v1072_v5, %v2694_v4  ;;  %v1076_v41 = vstv %s2997_s3  ;;  %v1018_v5 = vmul.f32 %v1017_v51, %v2713_v25  ;;  %v1029_v51 = vstv %s2949_s12 }
 0x220   : > { %s3679_s19 = sld [smem:[#allocation72_spill]]  ;;  %v1066_v12 = vadd.f32 %v1065_v52, %v1062_v3  ;;  %v1077_v36 = vmul.f32 %v1076_v41, %v2709_v21  ;;  %v3083_v3 = vmul.f32 %v966_v50, %v2899_v10 }
 0x221   : > { %s3027_s30 = sld [smem:[#allocation2 + $0xe9]] }
 0x222   : > { %s3680_s17 = sld [smem:[#allocation73_spill]]  ;;  %v1070_v31 = vadd.f32 %v1069_v62, %v1066_v12  ;;  %v1080_v40 = vstv %s3013_s7  ;;  %v1015_v62 = vadd.f32 %v1014_v45, %v1011_v44 }
 0x223   : > { %s3031_s6 = sld [smem:[#allocation2 + $0xea]]  ;;  %v1081_v53 = vmul.f32 %v1080_v40, %v2711_v24  ;;  %v1084_v57 = vstv %s3018_s23 }
 0x224   : > { %v950_v20 = vstv %s3678_s8  ;;  %s3036_s18 = sld [smem:[#allocation2 + $0xeb]]  ;;  %v1074_v39 = vadd.f32 %v1073_v18, %v1070_v31  ;;  %v1085_v11 = vmul.f32 %v1084_v57, %v2713_v25 }
 0x225   : > { %s3040_s14 = sld [smem:[#allocation2 + $0xec]]  ;;  %v951_v35 = vmul.f32 %v950_v20, %v2713_v25  ;;  %v1088_v19 = vstv %s3022_s29 }
 0x226   : > { %v852_v26 = vstv %s3679_s19  ;;  %s3681_s9 = sld [smem:[#allocation24_spill]]  ;;  %v1078_v47 = vadd.f32 %v1077_v36, %v1074_v39  ;;  %v1089_v36 = vmul.f32 %v1088_v19, %v2722_v33  ;;  %v1037_v19 = vstv %s2957_s2 }
 0x227   : > { %s3045_s13 = sld [smem:[#allocation2 + $0xed]]  ;;  %v3069_v63 = vadd.f32 %v852_v26, %v850_v32  ;;  %v952_v30 = vadd.f32 %v951_v35, %v948_v14  ;;  %v1019_v26 = vadd.f32 %v1018_v5, %v1015_v62  ;;  %v1025_v32 = vstv %s2944_s0 }
 0x228   : > { %v915_v28 = vstv %s3680_s17  ;;  %s3682_s20 = sld [smem:[#allocation80_spill]]  ;;  %v1082_v0 = vadd.f32 %v1081_v53, %v1078_v47  ;;  %v913_v35 = vadd.f32 %v912_v22, %v909_v56  ;;  %v3119_v14 = vmul.f32 %v970_v7, %v2925_v37 }
 0x229   : > { %s3050_s25 = sld [smem:[#allocation2 + $0xee]]  ;;  %v3057_v48 = vmul.f32 %v915_v28, %v2970_v16  ;;  %v956_v1 = vadd.f32 %v955_v2, %v952_v30  ;;  %v1092_v17 = vstv %s3027_s30  ;;  %v3126_v22 = vmul.f32 %v974_v9, %v2941_v60 }
 0x22a   : > { %s3054_s21 = sld [smem:[#allocation2 + $0xf0]]  ;;  %v1086_v39 = vadd.f32 %v1085_v11, %v1082_v0  ;;  %v1023_v44 = vadd.f32 %v1022_v27, %v1019_v26  ;;  %v1026_v45 = vmul.f32 %v1025_v32, %v2724_v34  ;;  %v1093_v30 = vmul.f32 %v1092_v17, %v2724_v34 }
 0x22b   : > { %s3061_s3 = sld [smem:[#allocation2 + $0xf1]]  ;;  %v3142_v62 = vadd.f32 %v3057_v48, %v913_v35  ;;  %v1033_v48 = vstv %s2953_s28  ;;  %v1038_v35 = vmul.f32 %v1037_v19, %v2925_v37 }
 0x22c   : > { %v958_v42 = vstv %s3681_s9  ;;  %s3067_s8 = sld [smem:[#allocation2 + $0xf2]]  ;;  %v1090_v56 = vadd.f32 %v1089_v36, %v1086_v39  ;;  %v1027_v38 = vadd.f32 %v1026_v45, %v1023_v44  ;;  %v1041_v39 = vstv %s2962_s26 }
 0x22d   : > { %s3073_s11 = sld [smem:[#allocation2 + $0xf3]]  ;;  %v959_v52 = vmul.f32 %v958_v42, %v2724_v34 }
 0x22e   : > { %v919_v46 = vstv %s3682_s20  ;;  %s3077_s10 = sld [smem:[#allocation2 + $0xf4]] }
 0x22f   : > { %s3086_s16 = sld [smem:[#allocation2 + $0xf5]]  ;;  %v960_v50 = vadd.f32 %v959_v52, %v956_v1  ;;  %v1096_v52 = vstv %s3031_s6 }
 0x230   : > { %v1124_v59 = vstv %s3054_s21  ;;  %s3092_s22 = sld [smem:[#allocation2 + $0xf6]] }
 0x231   : > { %v1125_v12 = vmul.f32 %v1124_v59, %v2474_v54  ;;  %v1127_v18 = vstv %s3061_s3  ;;  %s3097_s7 = sld [smem:[#allocation2 + $0xf7]]  ;;  %v1030_v59 = vmul.f32 %v1029_v51, %v2741_v43  ;;  %v964_v11 = vadd.f32 %v3080_v58, %v960_v50 }
 0x232   : > { %s3100_s23 = sld [smem:[#allocation2 + $0xef]]  ;;  %v1128_v20 = vmul.f32 %v1127_v18, %v2484_v61  ;;  %v1131_v41 = vstv %s3067_s8  ;;  %v1100_v58 = vstv %s3036_s18 }
 0x233   : > { %v1132_v29 = vmul.f32 %v1131_v41, %v2679_v6  ;;  %v1135_v31 = vstv %s3073_s11  ;;  %s3107_s24 = sld [smem:[#allocation2 + $0xf8]]  ;;  %v1097_v41 = vmul.f32 %v1096_v52, %v2741_v43  ;;  %v1031_v32 = vadd.f32 %v1030_v59, %v1027_v38 }
 0x234   : > { %s3110_s5 = sld [smem:[#allocation2 + $0x124]]  ;;  %v1129_v8 = vadd.f32 %v1128_v20, %v1125_v12  ;;  %v1136_v28 = vmul.f32 %v1135_v31, %v2684_v55  ;;  %v1139_v15 = vstv %s3077_s10  ;;  %v1094_v20 = vadd.f32 %v1093_v30, %v1090_v56 }
 0x235   : > { %v1143_v23 = vstv %s3086_s16  ;;  %s3116_s15 = sld [smem:[#allocation2 + $0xf9]]  ;;  %v1140_v42 = vmul.f32 %v1139_v15, %v2694_v4  ;;  %v968_v15 = vadd.f32 %v3083_v3, %v964_v11  ;;  %v1101_v17 = vmul.f32 %v1100_v58, %v2899_v10 }
 0x236   : > { %s3683_s29 = sld [smem:[#allocation74_spill]]  ;;  %v1133_v40 = vadd.f32 %v1132_v29, %v1129_v8  ;;  %v1147_v49 = vstv %s3092_s22  ;;  %v1144_v47 = vmul.f32 %v1143_v23, %v2709_v21  ;;  %v1034_v8 = vmul.f32 %v1033_v48, %v2899_v10 }
 0x237   : > { %s3123_s0 = sld [smem:[#allocation2 + $0xfa]]  ;;  %v1151_v57 = vstv %s3097_s7  ;;  %v1148_v7 = vmul.f32 %v1147_v49, %v2711_v24  ;;  %v1098_v23 = vadd.f32 %v1097_v41, %v1094_v20  ;;  %v1108_v56 = vstv %s3045_s13 }
 0x238   : > { %s3130_s19 = sld [smem:[#allocation2 + $0xfb]]  ;;  %v1137_v2 = vadd.f32 %v1136_v28, %v1133_v40  ;;  %v1152_v18 = vmul.f32 %v1151_v57, %v2713_v25  ;;  %v1104_v40 = vstv %s3040_s14  ;;  %v1035_v50 = vadd.f32 %v1034_v8, %v1031_v32 }
 0x239   : > { %s3684_s17 = sld [smem:[#allocation76_spill]]  ;;  %v1155_v0 = vstv %s3107_s24  ;;  %v1102_v52 = vadd.f32 %v1101_v17, %v1098_v23  ;;  %v972_v38 = vadd.f32 %v3119_v14, %v968_v15  ;;  %v1042_v48 = vmul.f32 %v1041_v39, %v2941_v60 }
 0x23a   : > { %s3134_s30 = sld [smem:[#allocation2 + $0xfc]]  ;;  %v1141_v5 = vadd.f32 %v1140_v42, %v1137_v2  ;;  %v1156_v29 = vmul.f32 %v1155_v0, %v2722_v33  ;;  %v1039_v20 = vadd.f32 %v1038_v35, %v1035_v50  ;;  %v1045_v41 = vstv %s2968_s27 }
 0x23b   : > { %s3139_s9 = sld [smem:[#allocation2 + $0xfd]]  ;;  %v1159_v28 = vstv %s3116_s15  ;;  %v1109_v14 = vmul.f32 %v1108_v56, %v2941_v60 }
 0x23c   : > { %v978_v53 = vstv %s3683_s29  ;;  %s3146_s12 = sld [smem:[#allocation2 + $0xfe]]  ;;  %v1145_v12 = vadd.f32 %v1144_v47, %v1141_v5  ;;  %v1160_v3 = vmul.f32 %v1159_v28, %v2724_v34  ;;  %v976_v28 = vadd.f32 %v3126_v22, %v972_v38 }
 0x23d   : > { %s3151_s21 = sld [smem:[#allocation2 + $0x100]]  ;;  %v3159_v1 = vmul.f32 %v978_v53, %v2964_v13  ;;  %v1163_v51 = vstv %s3123_s0  ;;  %v1105_v53 = vmul.f32 %v1104_v40, %v2925_v37  ;;  %v1049_v22 = vstv %s3001_s1 }
 0x23e   : > { %s3685_s3 = sld [smem:[#allocation81_spill]]  ;;  %v1149_v27 = vadd.f32 %v1148_v7, %v1145_v12  ;;  %v1164_v0 = vmul.f32 %v1163_v51, %v2741_v43  ;;  %v1167_v12 = vstv %s3130_s19 }
 0x23f   : > { %v982_v9 = vstv %s3684_s17  ;;  %s3156_s6 = sld [smem:[#allocation2 + $0x101]]  ;;  %v1168_v35 = vmul.f32 %v1167_v12, %v2899_v10 }
 0x240   : > { %s3163_s8 = sld [smem:[#allocation2 + $0x102]]  ;;  %v3166_v26 = vmul.f32 %v982_v9, %v2970_v16  ;;  %v1153_v36 = vadd.f32 %v1152_v18, %v1149_v27  ;;  %v1106_v27 = vadd.f32 %v1105_v53, %v1102_v52  ;;  %v1171_v23 = vstv %s3134_s30 }
 0x241   : > { %s3170_s28 = sld [smem:[#allocation2 + $0x103]]  ;;  %v1175_v53 = vstv %s3139_s9 }
 0x242   : > { %s3175_s2 = sld [smem:[#allocation2 + $0x104]]  ;;  %v1157_v44 = vadd.f32 %v1156_v29, %v1153_v36  ;;  %v1112_v29 = vstv %s3050_s25  ;;  %v1046_v36 = vmul.f32 %v1045_v41, %v2964_v13 }
 0x243   : > { %s3180_s18 = sld [smem:[#allocation2 + $0x105]]  ;;  %v1191_v42 = vstv %s3151_s21 }
 0x244   : > { %v986_v31 = vstv %s3685_s3  ;;  %s3185_s11 = sld [smem:[#allocation2 + $0x106]]  ;;  %v1192_v45 = vmul.f32 %v1191_v42, %v2474_v54  ;;  %v1161_v59 = vadd.f32 %v1160_v3, %v1157_v44  ;;  %v1043_v42 = vadd.f32 %v1042_v48, %v1039_v20 }
 0x245   : > { %v1194_v49 = vstv %s3156_s6  ;;  %s3190_s26 = sld [smem:[#allocation2 + $0x107]]  ;;  %v1113_v44 = vmul.f32 %v1112_v29, %v2964_v13 }
 0x246   : > { %s3193_s10 = sld [smem:[#allocation2 + $0xff]]  ;;  %v1195_v2 = vmul.f32 %v1194_v49, %v2484_v61  ;;  %v1198_v47 = vstv %s3163_s8  ;;  %v1165_v15 = vadd.f32 %v1164_v0, %v1161_v59  ;;  %v1116_v49 = vstv %s3100_s23 }
 0x247   : > { %v1199_v30 = vmul.f32 %v1198_v47, %v2679_v6  ;;  %v1202_v57 = vstv %s3170_s28  ;;  %s3201_s14 = sld [smem:[#allocation2 + $0x108]]  ;;  %v1172_v47 = vmul.f32 %v1171_v23, %v2925_v37  ;;  %v1117_v38 = vmul.f32 %v1116_v49, %v2970_v16 }
 0x248   : > { %s3203_s16 = sld [smem:[#allocation2 + $0x125]]  ;;  %v1196_v5 = vadd.f32 %v1195_v2, %v1192_v45  ;;  %v1203_v7 = vmul.f32 %v1202_v57, %v2684_v55  ;;  %v1206_v9 = vstv %s3175_s2  ;;  %v1110_v45 = vadd.f32 %v1109_v14, %v1106_v27 }
 0x249   : > { %v1210_v11 = vstv %s3180_s18  ;;  %s3210_s13 = sld [smem:[#allocation2 + $0x109]]  ;;  %v1207_v19 = vmul.f32 %v1206_v9, %v2694_v4  ;;  %v1169_v2 = vadd.f32 %v1168_v35, %v1165_v15  ;;  %v1179_v57 = vstv %s3146_s12 }
 0x24a   : > { %v1200_v18 = vadd.f32 %v1199_v30, %v1196_v5  ;;  %s3215_s22 = sld [smem:[#allocation2 + $0x10a]]  ;;  %v1214_v58 = vstv %s3185_s11  ;;  %v1211_v8 = vmul.f32 %v1210_v11, %v2709_v21  ;;  %v980_v30 = vadd.f32 %v3159_v1, %v976_v28 }
 0x24b   : > { %s3220_s7 = sld [smem:[#allocation2 + $0x10b]]  ;;  %v1218_v39 = vstv %s3190_s26  ;;  %v1215_v40 = vmul.f32 %v1214_v58, %v2711_v24  ;;  %v1050_v9 = vmul.f32 %v1049_v22, %v2970_v16  ;;  %v1114_v0 = vadd.f32 %v1113_v44, %v1110_v45 }
 0x24c   : > { %v1204_v32 = vadd.f32 %v1203_v7, %v1200_v18  ;;  %s3224_s24 = sld [smem:[#allocation2 + $0x10c]]  ;;  %v1219_v51 = vmul.f32 %v1218_v39, %v2713_v25  ;;  %v1047_v7 = vadd.f32 %v1046_v36, %v1043_v42  ;;  %v1176_v1 = vmul.f32 %v1175_v53, %v2941_v60 }
 0x24d   : > { %s3229_s27 = sld [smem:[#allocation2 + $0x10d]]  ;;  %v1222_v3 = vstv %s3201_s14  ;;  %v1173_v12 = vadd.f32 %v1172_v47, %v1169_v2  ;;  %v1180_v18 = vmul.f32 %v1179_v57, %v2964_v13  ;;  %v1183_v29 = vstv %s3193_s10 }
 0x24e   : > { %v1208_v17 = vadd.f32 %v1207_v19, %v1204_v32  ;;  %s3234_s25 = sld [smem:[#allocation2 + $0x10e]]  ;;  %v1223_v5 = vmul.f32 %v1222_v3, %v2722_v33  ;;  %v1053_v3 = vstv %s3005_s4  ;;  %v1184_v47 = vmul.f32 %v1183_v29, %v2970_v16 }
 0x24f   : > { %s3239_s15 = sld [smem:[#allocation2 + $0x110]]  ;;  %v1226_v56 = vstv %s3210_s13  ;;  %v1177_v36 = vadd.f32 %v1176_v1, %v1173_v12 }
 0x250   : > { %v1212_v50 = vadd.f32 %v1211_v8, %v1208_v17  ;;  %s3243_s29 = sld [smem:[#allocation2 + $0x111]]  ;;  %v1230_v59 = vstv %s3215_s22  ;;  %v1227_v48 = vmul.f32 %v1226_v56, %v2724_v34 }
 0x251   : > { %s3248_s0 = sld [smem:[#allocation2 + $0x112]]  ;;  %v1234_v19 = vstv %s3220_s7  ;;  %v1231_v14 = vmul.f32 %v1230_v59, %v2741_v43 }
 0x252   : > { %v1216_v52 = vadd.f32 %v1215_v40, %v1212_v50  ;;  %s3253_s1 = sld [smem:[#allocation2 + $0x113]]  ;;  %v1238_v32 = vstv %s3224_s24  ;;  %v1235_v35 = vmul.f32 %v1234_v19, %v2899_v10  ;;  %v1051_v50 = vadd.f32 %v1050_v9, %v1047_v7 }
 0x253   : > { %s3258_s23 = sld [smem:[#allocation2 + $0x114]]  ;;  %v1242_v22 = vstv %s3229_s27  ;;  %v1120_v7 = vstv %s3110_s5 }
 0x254   : > { %v1220_v11 = vadd.f32 %v1219_v51, %v1216_v52  ;;  %s3262_s19 = sld [smem:[#allocation2 + $0x115]]  ;;  %v1246_v57 = vstv %s3234_s25 }
 0x255   : > { %v1258_v20 = vstv %s3239_s15  ;;  %s3267_s17 = sld [smem:[#allocation2 + $0x116]] }
 0x256   : > { %v1224_v41 = vadd.f32 %v1223_v5, %v1220_v11  ;;  %v1259_v58 = vmul.f32 %v1258_v20, %v2474_v54  ;;  %v1261_v27 = vstv %s3243_s29  ;;  %s3272_s30 = sld [smem:[#allocation2 + $0x117]]  ;;  %v854_v5 = vmax.f32 %v3069_v63, 0.0 }
 0x257   : > { %s3276_s9 = sld [smem:[#allocation2 + $0x10f]]  ;;  %v1262_v8 = vmul.f32 %v1261_v27, %v2484_v61  ;;  %v1265_v28 = vstv %s3248_s0  ;;  %v1239_v61 = vmul.f32 %v1238_v32, %v2925_v37  ;;  %v1247_v11 = vmul.f32 %v1246_v57, %v2964_v13 }
 0x258   : > { %v1228_v15 = vadd.f32 %v1227_v48, %v1224_v41  ;;  %v1266_v39 = vmul.f32 %v1265_v28, %v2679_v6  ;;  %v1269_v54 = vstv %s3253_s1  ;;  %s3283_s12 = sld [smem:[#allocation2 + $0x118]]  ;;  %v984_v6 = vadd.f32 %v3166_v26, %v980_v30 }
 0x259   : > { %s3285_s21 = sld [smem:[#allocation2 + $0x126]]  ;;  %v1263_v23 = vadd.f32 %v1262_v8, %v1259_v58  ;;  %v1270_v17 = vmul.f32 %v1269_v54, %v2684_v55  ;;  %v1273_v40 = vstv %s3258_s23  ;;  %v1118_v55 = vadd.f32 %v1117_v38, %v1114_v0 }
 0x25a   : > { %v1232_v42 = vadd.f32 %v1231_v14, %v1228_v15  ;;  %v1277_v44 = vstv %s3262_s19  ;;  %s3292_s6 = sld [smem:[#allocation2 + $0x119]]  ;;  %v1274_v49 = vmul.f32 %v1273_v40, %v2694_v4  ;;  %v1243_v26 = vmul.f32 %v1242_v22, %v2941_v60 }
 0x25b   : > { %v1267_v45 = vadd.f32 %v1266_v39, %v1263_v23  ;;  %s3297_s8 = sld [smem:[#allocation2 + $0x11a]]  ;;  %v1281_v2 = vstv %s3267_s17  ;;  %v1278_v56 = vmul.f32 %v1277_v44, %v2709_v21  ;;  %v1181_v4 = vadd.f32 %v1180_v18, %v1177_v36 }
 0x25c   : > { %v1236_v51 = vadd.f32 %v1235_v35, %v1232_v42  ;;  %s3300_s28 = sld [smem:[#allocation2 + $0x11b]]  ;;  %v1285_v52 = vstv %s3272_s30  ;;  %v1282_v38 = vmul.f32 %v1281_v2, %v2711_v24  ;;  %v920_v21 = vadd.f32 %v919_v46, %v3142_v62 }
 0x25d   : > { %v1271_v53 = vadd.f32 %v1270_v17, %v1267_v45  ;;  %s3305_s4 = sld [smem:[#allocation2 + $0x11c]]  ;;  %v987_v59 = vadd.f32 %v986_v31, %v984_v6  ;;  %v1054_v0 = vadd.f32 %v1053_v3, %v1051_v50  ;;  %v1286_v24 = vmul.f32 %v1285_v52, %v2713_v25 }
 0x25e   : > { %v1240_v30 = vadd.f32 %v1239_v61, %v1236_v51  ;;  %s3309_s2 = sld [smem:[#allocation2 + $0x11d]]  ;;  %v1289_v1 = vstv %s3283_s12  ;;  %v1121_v12 = vadd.f32 %v1120_v7, %v1118_v55  ;;  %v1185_v18 = vadd.f32 %v1184_v47, %v1181_v4 }
 0x25f   : > { %v1275_v9 = vadd.f32 %v1274_v49, %v1271_v53  ;;  %s3314_s18 = sld [smem:[#allocation2 + $0x11e]]  ;;  %v1250_v19 = vstv %s3276_s9  ;;  %v1187_v62 = vstv %s3203_s16  ;;  %v1290_v20 = vmul.f32 %v1289_v1, %v2722_v33 }
 0x260   : > { %s3322_s11 = sld [smem:[#allocation2 + $0x128]]  ;;  %v1244_v63 = vadd.f32 %v1243_v26, %v1240_v30  ;;  %v1293_v46 = vstv %s3292_s6  ;;  %v921_v14 = vmax.f32 %v920_v21, 0.0  ;;  %v988_v58 = vmax.f32 %v987_v59, 0.0 }
 0x261   : > { %v1279_v48 = vadd.f32 %v1278_v56, %v1275_v9  ;;  %s3326_s5 = sld [smem:[#allocation2 + $0x129]]  ;;  %v1297_v41 = vstv %s3297_s8  ;;  %v1055_v27 = vmax.f32 %v1054_v0, 0.0  ;;  %v1251_v32 = vmul.f32 %v1250_v19, %v2970_v16 }
 0x262   : > { %s3330_s20 = sld [smem:[#allocation2 + $0x12a]]  ;;  %v1301_v25 = vstv %s3300_s28  ;;  %v1248_v29 = vadd.f32 %v1247_v11, %v1244_v63  ;;  %v1294_v28 = vmul.f32 %v1293_v46, %v2724_v34  ;;  %v1122_v33 = vmax.f32 %v1121_v12, 0.0 }
 0x263   : > { %v1283_v31 = vadd.f32 %v1282_v38, %v1279_v48  ;;  %s1765_s3 = sld [smem:[#allocation2 + $0x12b]]  ;;  %v1188_v15 = vadd.f32 %v1187_v62, %v1185_v18  ;;  %v1298_v35 = vmul.f32 %v1297_v41, %v2741_v43  ;;  %v1302_v36 = vmul.f32 %v1301_v25, %v2899_v10 }
 0x264   : > { %s3336_s26 = sld [smem:[#allocation2 + $0x12c]]  ;;  %v1305_v40 = vstv %s3305_s4  ;;  %v1309_v42 = vstv %s3309_s2  ;;  %v1252_v22 = vadd.f32 %v1251_v32, %v1248_v29  ;;  %v1254_v43 = vstv %s3285_s21  ;;  %s1945_s21 = smov [#allocation7]  }
 0x265   : > { %v1287_v8 = vadd.f32 %v1286_v24, %v1283_v31  ;;  %s3340_s10 = sld [smem:[#allocation2 + $0x11f]]  ;;  %v1306_v10 = vmul.f32 %v1305_v40, %v2925_v37  ;;  %v1189_v51 = vmax.f32 %v1188_v15, 0.0  ;;  %v1310_v2 = vmul.f32 %v1309_v42, %v2941_v60  ;;  %s1877_s6 = sshll.u32 %s1945_s21, 4  ;;  %s1878_s6 = int_to_ptr.vmem [resolvable:$false] %s1877_s6 }
 0x266   : > { %v1325_v39 = vstv %s3322_s11  ;;  %s3344_s14 = sld [smem:[#allocation2 + $0x12d]]  ;;  %v1313_v47 = vstv %s3314_s18  ;;  %v1255_v53 = vadd.f32 %v1254_v43, %v1252_v22  ;;  %s1879_s8 = scalar_lea.vmem %s1878_s6, 256 }
 0x267   : > { %v1291_v54 = vadd.f32 %v1290_v20, %v1287_v8  ;;  %v1326_v23 = vmul.f32 %v1325_v39, %v854_v5  ;;  %v1328_v17 = vstv %s3326_s5  ;;  %s1768_s16 = sld [smem:[#allocation2 + $0x12e]]  ;;  %v1314_v7 = vmul.f32 %v1313_v47, %v2964_v13 }
 0x268   : > { %v1329_v34 = vmul.f32 %v1328_v17, %v921_v14  ;;  %v1332_v61 = vstv %s3330_s20  ;;  %s1761_s13 = sld [smem:[#allocation2 + $0x127]]  ;;  %v1256_v38 = vmax.f32 %v1255_v53, 0.0 }
 0x269   : > { %v1295_v44 = vadd.f32 %v1294_v28, %v1291_v54  ;;  %v1333_v6 = vmul.f32 %v1332_v61, %v988_v58  ;;  %v1336_v3 = vstv %s1765_s3  ;;  %s1769_s22 = sld [smem:[#allocation2 + $0x12f]] }
 0x26a   : > { %v1330_v45 = vadd.f32 %v1329_v34, %v1326_v23  ;;  %v1337_v49 = vmul.f32 %v1336_v3, %v1055_v27  ;;  %v1340_v50 = vstv %s3336_s26  ;;  %s3686_s7 = sld [smem:[#allocation15_spill]] }
 0x26b   : > { %v1299_v55 = vadd.f32 %v1298_v35, %v1295_v44  ;;  %v1317_v4 = vstv %s3340_s10  ;;  %v1341_v30 = vmul.f32 %v1340_v50, %v1122_v33  ;;  %s3687_s24 = sld [smem:[#allocation20_spill]] }
 0x26c   : > { %v1334_v26 = vadd.f32 %v1333_v6, %v1330_v45  ;;  %v1344_v52 = vstv %s3344_s14  ;;  %v1318_v9 = vmul.f32 %v1317_v4, %v2970_v16  ;;  %s1770_s27 = sld [smem:[#allocation2 + $0x130]] }
 0x26d   : > { %v1303_v56 = vadd.f32 %v1302_v36, %v1299_v55  ;;  %v1345_v59 = vmul.f32 %v1344_v52, %v1189_v51  ;;  %v1348_v60 = vstv %s1768_s16  ;;  %s3688_s25 = sld [smem:[#allocation19_spill]] }
 0x26e   : > { %v1338_v57 = vadd.f32 %v1337_v49, %v1334_v26  ;;  %v1321_v1 = vstv %s1761_s13  ;;  %v1349_v48 = vmul.f32 %v1348_v60, %v1256_v38  ;;  %s3690_s17 = sld [smem:[#allocation84_spill]] }
 0x26f   : > { %v1307_v5 = vadd.f32 %v1306_v10, %v1303_v56  ;;  %v1352_v12 = vstv %s1769_s22 }
 0x270   : > { %v1342_v21 = vadd.f32 %v1341_v30, %v1338_v57  ;;  %s1772_s15 = sshll.u32 %s3686_s7, 7 }
 0x271   : > { %v1311_v37 = vadd.f32 %v1310_v2, %v1307_v5  ;;  %s3689_s29 = sshll.u32 %s3687_s24, 3  ;;  %s1362_s9 = scalar_lea.sflag [#allocation4], %s3687_s24 }
 0x272   : > { %v1346_v11 = vadd.f32 %v1345_v59, %v1342_v21  ;;  %v1356_v19 = vstv %s1770_s27  ;;  %s170_s0 = scalar_lea.vmem [#allocation7], %s3689_s29 }
 0x273   : > { %v1315_v0 = vadd.f32 %v1314_v7, %v1311_v37  ;;  %s1375_s1 = sshll.u32 %s170_s0, 4  ;;  %p3691_p8 = scmp.ne.s32.totalorder %s3688_s25, 0  ;;  %s1376_s1 = int_to_ptr.vmem [resolvable:$true] %s1375_s1 }
 0x274   : > { %v1350_v18 = vadd.f32 %v1349_v48, %v1346_v11  ;;  %s1373_s30 = scalar_lea.hbm %s3690_s17, %s1772_s15  ;;  %s1873_s12 = scalar_lea.vmem %s1376_s1, 128 }
 0x275   : > { %v1319_v63 = vadd.f32 %v1318_v9, %v1315_v0  ;;  %p1874_p6 = scmp.ne.s32.totalorder %s1376_s1, %s1873_s12  ;;  %p1880_p11 = scmp.lt.s32.totalorder %s1376_s1, %s1878_s6 }
 0x276   : > { %p1881_p0 = scmp.lt.s32.totalorder %s1879_s8, %s1873_s12 }
 0x277   : > { %v1322_v24 = vadd.f32 %v1321_v1, %v1319_v63  ;;  %p1875_p7 = pnand %p1874_p6, %p3691_p8 }
 0x278   : > { %p1882_p3 = por %p1881_p0, %p1880_p11 }
 0x279   : > { %v1323_v13 = vmax.f32 %v1322_v24, 0.0  ;;  %p1876_p10 = pneg %p1875_p7 }
 0x27b   : > { %v1353_v16 = vmul.f32 %v1352_v12, %v1323_v13  ;;  %p1883_p5 = pnand %p1882_p3, %p1876_p10 }
 0x27d   : > { %v1354_v46 = vadd.f32 %v1353_v16, %v1350_v18 }
 0x27f   : > { %v1357_v62 = vadd.f32 %v1356_v19, %v1354_v46 }
 0x281   : > { %1832 = vtanh.f32 %v1357_v62 }
 0x28e   : > { %v1833_v31 = vpop.eup %1832 }
 0x28f   : > { %v1359_v20 = vmul.f32 6.2831855, %v1833_v31 }
 0x291   : > { %1360 = vst [vmem:[%s170_s0] sm:$0xff] %v1359_v20 }
 0x292   : > { %1886 = shalt.err (!%p1883_p5)
}
 0x293   : > { %s1887_s28 = scalar_lea.hbm %s1373_s30, 128  ;;  %s1891_s18 = scalar_lea.hbm %s3690_s17, 256 }
 0x294   : > { %p1888_p2 = scmp.ne.s32.totalorder %s1373_s30, %s1887_s28  ;;  %p1892_p9 = scmp.lt.s32.totalorder %s1373_s30, %s3690_s17 }
 0x295   : > { %p1893_p1 = scmp.lt.s32.totalorder %s1891_s18, %s1887_s28 }
 0x296   : > { %p1889_p12 = pnand %p1888_p2, %p3691_p8 }
 0x297   : > { %p1894_p4 = por %p1893_p1, %p1892_p9 }
 0x298   : > { %p1890_p13 = pneg %p1889_p12 }
 0x29a   : > { %p1895_p6 = pnand %p1894_p4, %p1890_p13 }
 0x29c   : > { %1898 = shalt.err (!%p1895_p6)
}
 0x29d   : > { %1781 = dma.vmem_to_hbm [thread:$0]  (%p3691_p8), %s1376_s1, 128, %s1373_s30, %s1362_s9  }
 0x29e PF: > { %s3692_s20 = sld [smem:[#allocation11_spill]] }
 0x29f   : > { %s3693_s3 = sld [smem:[#allocation16_spill]] }
 0x2a0   : > { %s3694_s26 = sld [smem:[#allocation14_spill]] }
 0x2a4   : > { %s1387_s10 = sand.u32 1, %s3692_s20  }
 0x2a5   : > { %p3695_p7 = scmp.ne.s32.totalorder %s3693_s3, 0  ;;  %s1388_s14 = scalar_lea.sflag [#allocation4], %s1387_s10 }
 0x2a6   : > { %p3696_p10 = scmp.ge.s32.totalorder %s3694_s26, 2 }
 0x2a8   : > { %p1792_p11 = pnand %p3696_p10, %p3695_p7 }
 0x2aa   : > { %p1793_p0 = pneg %p1792_p11 }
 0x2ac   : > { %1924 = dma.done.wait (%p1793_p0), %s1388_s14, 128  }
 0x2ad   : > { %1926 = vsyncadd (%p1793_p0), %s1388_s14, 4294967168  ;;  %s3697_s12 = sld [smem:[#allocation17_spill]] }
 0x2ae   : > { %s3698_s9 = sld [smem:[#allocation12_spill]] }
 0x2af   : > { %s3699_s10 = sld [smem:[#allocation13_spill]] }
 0x2b0   : > { %s3700_s11 = sld [smem:[#allocation18_spill]] }
 0x2b3   : > { %p16_p3 = scmp.ge.s32.totalorder %s3697_s12, 4  }
 0x2b5   :  { %18 = sbr.rel (!%p16_p3) target bundleno = 10 (0xa), region = 78 }
 0x2ba   :  { %1393 = vsyncpa [#allocation3], 1 }
 0x2bb   :  { %1395 = vsyncpa [#allocation3 + $0x1], 1 }
 0x2bc   :  { %1396 = vsyncpa [#allocation4], 1 }
 0x2bd   :  { %1398 = vsyncpa [#allocation4 + $0x1], 1 }
 0x2be   :  { %1399 = vsyncpa [#allocation5], 1 }
 0x2bf   :  { %1401 = vsyncpa [#allocation5 + $0x1], 1 }

</bundles_post_ra>
